<compile_context>
chip_gen: v6e
topology: v6e:2x2x1
jax: 0.10.0
libtpu: 0.0.40
codegen_flags: <defaults>
</compile_context>

<pallas_src>
import functools

import jax
import jax.numpy as jnp
from jax.experimental import pallas as pl
from jax.experimental.pallas import tpu as pltpu


# ---------------------------------------------------------------------------
# In-kernel kNN: k one-hot (N,N) neighbor-selection matrices (no self loops).
# Iterative masked argmin; ties broken toward the smallest column index.
# ---------------------------------------------------------------------------
def _knn_select_mats(x, n, k):
    sq = jnp.sum(x * x, axis=1, keepdims=True)                              # (N, 1)
    d = sq + sq.T - 2.0 * jnp.dot(x, x.T, preferred_element_type=jnp.float32)
    row = jax.lax.broadcasted_iota(jnp.int32, (n, n), 0)
    col = jax.lax.broadcasted_iota(jnp.int32, (n, n), 1)
    col_f = col.astype(jnp.float32)
    d = jnp.where(row == col, 1e30, d)                                      # mask self loops
    sels = []
    for _ in range(k):
        rowmin = jnp.min(d, axis=1, keepdims=True)
        is_min = d <= rowmin
        cand = jnp.where(is_min, col_f, jnp.float32(n))                     # tie-break: min index
        pick = jnp.min(cand, axis=1, keepdims=True)
        onehot = (col_f == pick)
        sels.append(onehot.astype(jnp.float32))
        d = jnp.where(onehot, 1e30, d)                                      # exclude picked col
    return sels


# ---------------------------------------------------------------------------
# Single fused kernel: entire Net forward, everything resident in VMEM.
# ---------------------------------------------------------------------------
def _net_fused_kernel(
    x0_ref,
    c1w1s_ref, c1w1n_ref, c1b1_ref, c1w2_ref, c1b2_ref, c1w3_ref, c1b3_ref,
    c2ws_ref, c2wn_ref, c2b_ref,
    l1wa_ref, l1wb_ref, l1b_ref,
    m1w_ref, m1b_ref, m2w_ref, m2b_ref, m3w_ref, m3b_ref,
    out_ref, *, n, k,
):
    f32 = jnp.float32

    # ----- DynamicEdgeConv 1: kNN on x0, 3-layer message MLP, max aggregation.
    x0 = x0_ref[...]                                                        # (N, 4)
    sels1 = _knn_select_mats(x0, n, k)
    # message(e) = MLP([x_i, x_j - x_i]); first layer split into self/neighbor parts.
    h_self = jnp.dot(x0, c1w1s_ref[...], preferred_element_type=f32) + c1b1_ref[...]
    x1 = None
    for t in range(k):                                                       # k=4, unrolled
        xj = jnp.dot(sels1[t], x0, preferred_element_type=f32)              # (N, 4) gather via MXU
        h = jnp.maximum(h_self + jnp.dot(xj, c1w1n_ref[...], preferred_element_type=f32), 0.0)
        h = jnp.maximum(jnp.dot(h, c1w2_ref[...], preferred_element_type=f32) + c1b2_ref[...], 0.0)
        h = jnp.dot(h, c1w3_ref[...], preferred_element_type=f32) + c1b3_ref[...]   # plain last
        x1 = h if x1 is None else jnp.maximum(x1, h)                        # 'max' aggregation
    # x1: (N, 64)

    # ----- DynamicEdgeConv 2: kNN rebuilt on x1, single-layer message MLP, max aggregation.
    sels2 = _knn_select_mats(x1, n, k)
    g_self = jnp.dot(x1, c2ws_ref[...], preferred_element_type=f32) + c2b_ref[...]
    x2 = None
    for t in range(k):
        xj = jnp.dot(sels2[t], x1, preferred_element_type=f32)              # (N, 64)
        g = g_self + jnp.dot(xj, c2wn_ref[...], preferred_element_type=f32)
        x2 = g if x2 is None else jnp.maximum(x2, g)
    # x2: (N, 128)

    # ----- lin1 + node-sum readout, rewritten as a 1-row matmul:
    #   sum_i (cat([x1,x2])_i @ W + b) = (sum_i x1_i)@W_top + (sum_i x2_i)@W_bot + N*b
    s1 = jnp.sum(x1, axis=0, keepdims=True).astype(jnp.bfloat16)            # (1, 64)
    s2 = jnp.sum(x2, axis=0, keepdims=True).astype(jnp.bfloat16)            # (1, 128)
    out2 = (jnp.dot(s1, l1wa_ref[...], preferred_element_type=f32)
            + jnp.dot(s2, l1wb_ref[...], preferred_element_type=f32)
            + f32(n) * l1b_ref[...])                                        # (1, 1024)

    # ----- Head MLP([1024, 512, 256, C]) + log_softmax (dropout = identity in eval).
    h = jnp.maximum(
        jnp.dot(out2.astype(jnp.bfloat16), m1w_ref[...], preferred_element_type=f32)
        + m1b_ref[...], 0.0)                                                # (1, 512)
    h = jnp.maximum(
        jnp.dot(h.astype(jnp.bfloat16), m2w_ref[...], preferred_element_type=f32)
        + m2b_ref[...], 0.0)                                                # (1, 256)
    logits = jnp.dot(h, m3w_ref[...], preferred_element_type=f32) + m3b_ref[...]   # (1, C)

    m = jnp.max(logits, axis=1, keepdims=True)
    z = logits - m
    lse = jnp.log(jnp.sum(jnp.exp(z), axis=1, keepdims=True))
    out_ref[...] = z - lse


# ---------------------------------------------------------------------------
# Wrapper: one pallas_call, whole arrays in VMEM (total weights ~2 MB, tiny activations).
# ---------------------------------------------------------------------------
def net_forward(params, pos, p, k):
    n = pos.shape[0]
    x0 = jnp.concatenate([pos, p], axis=1).astype(jnp.float32)              # (N, 4) single XLA concat
    num_classes = params["m3b"].shape[1]

    flat_in = (
        x0,
        params["c1w1s"], params["c1w1n"], params["c1b1"],
        params["c1w2"], params["c1b2"], params["c1w3"], params["c1b3"],
        params["c2ws"], params["c2wn"], params["c2b"],
        params["l1wa"], params["l1wb"], params["l1b"],
        params["m1w"], params["m1b"], params["m2w"], params["m2b"],
        params["m3w"], params["m3b"],
    )
    return pl.pallas_call(
        functools.partial(_net_fused_kernel, n=n, k=k),
        out_shape=jax.ShapeDtypeStruct((1, num_classes), jnp.float32),
        in_specs=[pl.BlockSpec(memory_space=pltpu.MemorySpace.VMEM)] * len(flat_in),
        out_specs=pl.BlockSpec(memory_space=pltpu.MemorySpace.VMEM),
        compiler_params=pltpu.CompilerParams(vmem_limit_bytes=32 * 1024 * 1024),
    )(*flat_in)


# ---------------------------------------------------------------------------
# Parameters (deterministic, PyTorch-Linear-style uniform init), pre-split /
# pre-cast into the layout the fused kernel expects.
# ---------------------------------------------------------------------------
def _linear_params(key, fan_in, fan_out):
    kw, kb = jax.random.split(key)
    bound = 1.0 / (fan_in ** 0.5)
    w = jax.random.uniform(kw, (fan_in, fan_out), jnp.float32, -bound, bound)
    b = jax.random.uniform(kb, (1, fan_out), jnp.float32, -bound, bound)
    return w, b


def init_params(key, num_classes):
    keys = jax.random.split(key, 8)
    prm = {}

    # conv1: EdgeConv message MLP([2*4, 64, 64, 64]).  First layer split so the kernel
    # never builds [x_i, x_j - x_i]:  e@W1 = x_i@(W1_top - W1_bot) + x_j@W1_bot
    w1, b1 = _linear_params(keys[0], 8, 64)
    prm["c1w1s"] = w1[:4] - w1[4:]
    prm["c1w1n"] = w1[4:]
    prm["c1b1"] = b1
    prm["c1w2"], prm["c1b2"] = _linear_params(keys[1], 64, 64)
    prm["c1w3"], prm["c1b3"] = _linear_params(keys[2], 64, 64)

    # conv2: EdgeConv message MLP([2*64, 128]), same self/neighbor split.
    w, b = _linear_params(keys[3], 128, 128)
    prm["c2ws"] = w[:64] - w[64:]
    prm["c2wn"] = w[64:]
    prm["c2b"] = b

    # lin1: Linear(64 + 128, 1024), split along the [x1 | x2] concat; large weight in bf16.
    w, b = _linear_params(keys[4], 192, 1024)
    prm["l1wa"] = w[:64].astype(jnp.bfloat16)
    prm["l1wb"] = w[64:].astype(jnp.bfloat16)
    prm["l1b"] = b

    # head MLP([1024, 512, 256, num_classes]); large weights in bf16, f32 accumulate in-kernel.
    w, b = _linear_params(keys[5], 1024, 512)
    prm["m1w"], prm["m1b"] = w.astype(jnp.bfloat16), b
    w, b = _linear_params(keys[6], 512, 256)
    prm["m2w"], prm["m2b"] = w.astype(jnp.bfloat16), b
    prm["m3w"], prm["m3b"] = _linear_params(keys[7], 256, num_classes)
    return prm


if __name__ == "__main__":
    N, K, NUM_CLASSES = 32, 4, 10

    key = jax.random.PRNGKey(0)
    k_param, k_pos, k_feat = jax.random.split(key, 3)

    params = init_params(k_param, NUM_CLASSES)
    pos = jax.random.normal(k_pos, (N, 3), jnp.float32)   # data.pos
    p = jax.random.normal(k_feat, (N, 1), jnp.float32)    # data.x  (pos(3) + x(1) = 4)

    fwd = jax.jit(functools.partial(net_forward, k=K))
    out = fwd(params, pos, p)
    jax.block_until_ready(out)

    assert out.shape == (1, NUM_CLASSES)
    assert bool(jnp.isfinite(out).all())
    print("KERNEL_OK")
</pallas_src>

<mosaic_0001>
module attributes {stable_mosaic.version = 11 : i64} {
  func.func @_net_fused_kernel(%arg0: memref<32x4xf32, #tpu.memory_space<vmem>>, %arg1: memref<4x64xf32, #tpu.memory_space<vmem>>, %arg2: memref<4x64xf32, #tpu.memory_space<vmem>>, %arg3: memref<1x64xf32, #tpu.memory_space<vmem>>, %arg4: memref<64x64xf32, #tpu.memory_space<vmem>>, %arg5: memref<1x64xf32, #tpu.memory_space<vmem>>, %arg6: memref<64x64xf32, #tpu.memory_space<vmem>>, %arg7: memref<1x64xf32, #tpu.memory_space<vmem>>, %arg8: memref<64x128xf32, #tpu.memory_space<vmem>>, %arg9: memref<64x128xf32, #tpu.memory_space<vmem>>, %arg10: memref<1x128xf32, #tpu.memory_space<vmem>>, %arg11: memref<64x1024xbf16, #tpu.memory_space<vmem>>, %arg12: memref<128x1024xbf16, #tpu.memory_space<vmem>>, %arg13: memref<1x1024xf32, #tpu.memory_space<vmem>>, %arg14: memref<1024x512xbf16, #tpu.memory_space<vmem>>, %arg15: memref<1x512xf32, #tpu.memory_space<vmem>>, %arg16: memref<512x256xbf16, #tpu.memory_space<vmem>>, %arg17: memref<1x256xf32, #tpu.memory_space<vmem>>, %arg18: memref<256x10xf32, #tpu.memory_space<vmem>>, %arg19: memref<1x10xf32, #tpu.memory_space<vmem>>, %arg20: memref<1x10xf32, #tpu.memory_space<vmem>>) attributes {dimension_semantics = [], scalar_prefetch = 0 : i64, scratch_operands = 0 : i64, tpu.core_type = #tpu.core_type<tc>} {
    %c0 = arith.constant 0 : index
    %c0_0 = arith.constant 0 : index
    %0 = vector.load %arg0[%c0, %c0_0] : memref<32x4xf32, #tpu.memory_space<vmem>>, vector<32x4xf32>
    %1 = arith.mulf %0, %0 : vector<32x4xf32>
    %cst = arith.constant dense<0.000000e+00> : vector<32xf32>
    %2 = vector.multi_reduction <add>, %1, %cst [1] : vector<32x4xf32> to vector<32xf32>
    %3 = vector.shape_cast %2 : vector<32xf32> to vector<32x1xf32>
    %4 = tpu.transpose %3, [1, 0] : vector<32x1xf32> -> vector<1x32xf32>
    %5 = vector.broadcast %3 : vector<32x1xf32> to vector<32x32xf32>
    %6 = vector.broadcast %4 : vector<1x32xf32> to vector<32x32xf32>
    %7 = arith.addf %5, %6 : vector<32x32xf32>
    %8 = tpu.transpose %0, [1, 0] : vector<32x4xf32> -> vector<4x32xf32>
    %cst_1 = arith.constant dense<0.000000e+00> : vector<32x32xf32>
    %9 = tpu.matmul %0, %8, %cst_1 {dimension_numbers = #tpu.dot_dimension_numbers<[1], [0], [0], [1], [0, 0, 1, 1], [], []>} : vector<32x4xf32>, vector<4x32xf32>, vector<32x32xf32> -> vector<32x32xf32>
    %cst_2 = arith.constant 2.000000e+00 : f32
    %10 = vector.broadcast %cst_2 : f32 to vector<32x32xf32>
    %11 = arith.mulf %10, %9 : vector<32x32xf32>
    %12 = arith.subf %7, %11 : vector<32x32xf32>
    %13 = tpu.iota {dimensions = array<i32: 0>} : vector<32x32xi32>
    %14 = tpu.iota {dimensions = array<i32: 1>} : vector<32x32xi32>
    %15 = arith.sitofp %14 : vector<32x32xi32> to vector<32x32xf32>
    %16 = arith.cmpi eq, %13, %14 : vector<32x32xi32>
    %cst_3 = arith.constant 1.000000e+30 : f32
    %17 = vector.broadcast %cst_3 : f32 to vector<32x32xf32>
    %18 = arith.select %16, %17, %12 : vector<32x32xi1>, vector<32x32xf32>
    %cst_4 = arith.constant dense<0x7F800000> : vector<32xf32>
    %19 = vector.multi_reduction <minimumf>, %18, %cst_4 [1] : vector<32x32xf32> to vector<32xf32>
    %20 = vector.shape_cast %19 : vector<32xf32> to vector<32x1xf32>
    %21 = vector.broadcast %20 : vector<32x1xf32> to vector<32x32xf32>
    %22 = arith.cmpf ole, %18, %21 : vector<32x32xf32>
    %cst_5 = arith.constant 3.200000e+01 : f32
    %23 = vector.broadcast %cst_5 : f32 to vector<32x32xf32>
    %24 = arith.select %22, %15, %23 : vector<32x32xi1>, vector<32x32xf32>
    %cst_6 = arith.constant dense<0x7F800000> : vector<32xf32>
    %25 = vector.multi_reduction <minimumf>, %24, %cst_6 [1] : vector<32x32xf32> to vector<32xf32>
    %26 = vector.shape_cast %25 : vector<32xf32> to vector<32x1xf32>
    %27 = vector.broadcast %26 : vector<32x1xf32> to vector<32x32xf32>
    %28 = arith.cmpf oeq, %15, %27 : vector<32x32xf32>
    %29 = arith.extui %28 : vector<32x32xi1> to vector<32x32xi32>
    %30 = arith.sitofp %29 : vector<32x32xi32> to vector<32x32xf32>
    %cst_7 = arith.constant 1.000000e+30 : f32
    %31 = vector.broadcast %cst_7 : f32 to vector<32x32xf32>
    %32 = arith.select %28, %31, %18 : vector<32x32xi1>, vector<32x32xf32>
    %cst_8 = arith.constant dense<0x7F800000> : vector<32xf32>
    %33 = vector.multi_reduction <minimumf>, %32, %cst_8 [1] : vector<32x32xf32> to vector<32xf32>
    %34 = vector.shape_cast %33 : vector<32xf32> to vector<32x1xf32>
    %35 = vector.broadcast %34 : vector<32x1xf32> to vector<32x32xf32>
    %36 = arith.cmpf ole, %32, %35 : vector<32x32xf32>
    %cst_9 = arith.constant 3.200000e+01 : f32
    %37 = vector.broadcast %cst_9 : f32 to vector<32x32xf32>
    %38 = arith.select %36, %15, %37 : vector<32x32xi1>, vector<32x32xf32>
    %cst_10 = arith.constant dense<0x7F800000> : vector<32xf32>
    %39 = vector.multi_reduction <minimumf>, %38, %cst_10 [1] : vector<32x32xf32> to vector<32xf32>
    %40 = vector.shape_cast %39 : vector<32xf32> to vector<32x1xf32>
    %41 = vector.broadcast %40 : vector<32x1xf32> to vector<32x32xf32>
    %42 = arith.cmpf oeq, %15, %41 : vector<32x32xf32>
    %43 = arith.extui %42 : vector<32x32xi1> to vector<32x32xi32>
    %44 = arith.sitofp %43 : vector<32x32xi32> to vector<32x32xf32>
    %cst_11 = arith.constant 1.000000e+30 : f32
    %45 = vector.broadcast %cst_11 : f32 to vector<32x32xf32>
    %46 = arith.select %42, %45, %32 : vector<32x32xi1>, vector<32x32xf32>
    %cst_12 = arith.constant dense<0x7F800000> : vector<32xf32>
    %47 = vector.multi_reduction <minimumf>, %46, %cst_12 [1] : vector<32x32xf32> to vector<32xf32>
    %48 = vector.shape_cast %47 : vector<32xf32> to vector<32x1xf32>
    %49 = vector.broadcast %48 : vector<32x1xf32> to vector<32x32xf32>
    %50 = arith.cmpf ole, %46, %49 : vector<32x32xf32>
    %cst_13 = arith.constant 3.200000e+01 : f32
    %51 = vector.broadcast %cst_13 : f32 to vector<32x32xf32>
    %52 = arith.select %50, %15, %51 : vector<32x32xi1>, vector<32x32xf32>
    %cst_14 = arith.constant dense<0x7F800000> : vector<32xf32>
    %53 = vector.multi_reduction <minimumf>, %52, %cst_14 [1] : vector<32x32xf32> to vector<32xf32>
    %54 = vector.shape_cast %53 : vector<32xf32> to vector<32x1xf32>
    %55 = vector.broadcast %54 : vector<32x1xf32> to vector<32x32xf32>
    %56 = arith.cmpf oeq, %15, %55 : vector<32x32xf32>
    %57 = arith.extui %56 : vector<32x32xi1> to vector<32x32xi32>
    %58 = arith.sitofp %57 : vector<32x32xi32> to vector<32x32xf32>
    %cst_15 = arith.constant 1.000000e+30 : f32
    %59 = vector.broadcast %cst_15 : f32 to vector<32x32xf32>
    %60 = arith.select %56, %59, %46 : vector<32x32xi1>, vector<32x32xf32>
    %cst_16 = arith.constant dense<0x7F800000> : vector<32xf32>
    %61 = vector.multi_reduction <minimumf>, %60, %cst_16 [1] : vector<32x32xf32> to vector<32xf32>
    %62 = vector.shape_cast %61 : vector<32xf32> to vector<32x1xf32>
    %63 = vector.broadcast %62 : vector<32x1xf32> to vector<32x32xf32>
    %64 = arith.cmpf ole, %60, %63 : vector<32x32xf32>
    %cst_17 = arith.constant 3.200000e+01 : f32
    %65 = vector.broadcast %cst_17 : f32 to vector<32x32xf32>
    %66 = arith.select %64, %15, %65 : vector<32x32xi1>, vector<32x32xf32>
    %cst_18 = arith.constant dense<0x7F800000> : vector<32xf32>
    %67 = vector.multi_reduction <minimumf>, %66, %cst_18 [1] : vector<32x32xf32> to vector<32xf32>
    %68 = vector.shape_cast %67 : vector<32xf32> to vector<32x1xf32>
    %69 = vector.broadcast %68 : vector<32x1xf32> to vector<32x32xf32>
    %70 = arith.cmpf oeq, %15, %69 : vector<32x32xf32>
    %71 = arith.extui %70 : vector<32x32xi1> to vector<32x32xi32>
    %72 = arith.sitofp %71 : vector<32x32xi32> to vector<32x32xf32>
    %c0_19 = arith.constant 0 : index
    %c0_20 = arith.constant 0 : index
    %73 = vector.load %arg1[%c0_19, %c0_20] : memref<4x64xf32, #tpu.memory_space<vmem>>, vector<4x64xf32>
    %cst_21 = arith.constant dense<0.000000e+00> : vector<32x64xf32>
    %74 = tpu.matmul %0, %73, %cst_21 {dimension_numbers = #tpu.dot_dimension_numbers<[1], [0], [0], [1], [0, 0, 1, 1], [], []>} : vector<32x4xf32>, vector<4x64xf32>, vector<32x64xf32> -> vector<32x64xf32>
    %c0_22 = arith.constant 0 : index
    %c0_23 = arith.constant 0 : index
    %75 = vector.load %arg3[%c0_22, %c0_23] : memref<1x64xf32, #tpu.memory_space<vmem>>, vector<1x64xf32>
    %76 = vector.broadcast %75 : vector<1x64xf32> to vector<32x64xf32>
    %77 = arith.addf %74, %76 : vector<32x64xf32>
    %cst_24 = arith.constant dense<0.000000e+00> : vector<32x4xf32>
    %78 = tpu.matmul %30, %0, %cst_24 {dimension_numbers = #tpu.dot_dimension_numbers<[1], [0], [0], [1], [0, 0, 1, 1], [], []>} : vector<32x32xf32>, vector<32x4xf32>, vector<32x4xf32> -> vector<32x4xf32>
    %c0_25 = arith.constant 0 : index
    %c0_26 = arith.constant 0 : index
    %79 = vector.load %arg2[%c0_25, %c0_26] : memref<4x64xf32, #tpu.memory_space<vmem>>, vector<4x64xf32>
    %cst_27 = arith.constant dense<0.000000e+00> : vector<32x64xf32>
    %80 = tpu.matmul %78, %79, %cst_27 {dimension_numbers = #tpu.dot_dimension_numbers<[1], [0], [0], [1], [0, 0, 1, 1], [], []>} : vector<32x4xf32>, vector<4x64xf32>, vector<32x64xf32> -> vector<32x64xf32>
    %81 = arith.addf %77, %80 : vector<32x64xf32>
    %cst_28 = arith.constant 0.000000e+00 : f32
    %82 = vector.broadcast %cst_28 : f32 to vector<32x64xf32>
    %83 = arith.maximumf %81, %82 : vector<32x64xf32>
    %c0_29 = arith.constant 0 : index
    %c0_30 = arith.constant 0 : index
    %84 = vector.load %arg4[%c0_29, %c0_30] : memref<64x64xf32, #tpu.memory_space<vmem>>, vector<64x64xf32>
    %cst_31 = arith.constant dense<0.000000e+00> : vector<32x64xf32>
    %85 = tpu.matmul %83, %84, %cst_31 {dimension_numbers = #tpu.dot_dimension_numbers<[1], [0], [0], [1], [0, 0, 1, 1], [], []>} : vector<32x64xf32>, vector<64x64xf32>, vector<32x64xf32> -> vector<32x64xf32>
    %c0_32 = arith.constant 0 : index
    %c0_33 = arith.constant 0 : index
    %86 = vector.load %arg5[%c0_32, %c0_33] : memref<1x64xf32, #tpu.memory_space<vmem>>, vector<1x64xf32>
    %87 = vector.broadcast %86 : vector<1x64xf32> to vector<32x64xf32>
    %88 = arith.addf %85, %87 : vector<32x64xf32>
    %cst_34 = arith.constant 0.000000e+00 : f32
    %89 = vector.broadcast %cst_34 : f32 to vector<32x64xf32>
    %90 = arith.maximumf %88, %89 : vector<32x64xf32>
    %c0_35 = arith.constant 0 : index
    %c0_36 = arith.constant 0 : index
    %91 = vector.load %arg6[%c0_35, %c0_36] : memref<64x64xf32, #tpu.memory_space<vmem>>, vector<64x64xf32>
    %cst_37 = arith.constant dense<0.000000e+00> : vector<32x64xf32>
    %92 = tpu.matmul %90, %91, %cst_37 {dimension_numbers = #tpu.dot_dimension_numbers<[1], [0], [0], [1], [0, 0, 1, 1], [], []>} : vector<32x64xf32>, vector<64x64xf32>, vector<32x64xf32> -> vector<32x64xf32>
    %c0_38 = arith.constant 0 : index
    %c0_39 = arith.constant 0 : index
    %93 = vector.load %arg7[%c0_38, %c0_39] : memref<1x64xf32, #tpu.memory_space<vmem>>, vector<1x64xf32>
    %94 = vector.broadcast %93 : vector<1x64xf32> to vector<32x64xf32>
    %95 = arith.addf %92, %94 : vector<32x64xf32>
    %cst_40 = arith.constant dense<0.000000e+00> : vector<32x4xf32>
    %96 = tpu.matmul %44, %0, %cst_40 {dimension_numbers = #tpu.dot_dimension_numbers<[1], [0], [0], [1], [0, 0, 1, 1], [], []>} : vector<32x32xf32>, vector<32x4xf32>, vector<32x4xf32> -> vector<32x4xf32>
    %c0_41 = arith.constant 0 : index
    %c0_42 = arith.constant 0 : index
    %97 = vector.load %arg2[%c0_41, %c0_42] : memref<4x64xf32, #tpu.memory_space<vmem>>, vector<4x64xf32>
    %cst_43 = arith.constant dense<0.000000e+00> : vector<32x64xf32>
    %98 = tpu.matmul %96, %97, %cst_43 {dimension_numbers = #tpu.dot_dimension_numbers<[1], [0], [0], [1], [0, 0, 1, 1], [], []>} : vector<32x4xf32>, vector<4x64xf32>, vector<32x64xf32> -> vector<32x64xf32>
    %99 = arith.addf %77, %98 : vector<32x64xf32>
    %cst_44 = arith.constant 0.000000e+00 : f32
    %100 = vector.broadcast %cst_44 : f32 to vector<32x64xf32>
    %101 = arith.maximumf %99, %100 : vector<32x64xf32>
    %c0_45 = arith.constant 0 : index
    %c0_46 = arith.constant 0 : index
    %102 = vector.load %arg4[%c0_45, %c0_46] : memref<64x64xf32, #tpu.memory_space<vmem>>, vector<64x64xf32>
    %cst_47 = arith.constant dense<0.000000e+00> : vector<32x64xf32>
    %103 = tpu.matmul %101, %102, %cst_47 {dimension_numbers = #tpu.dot_dimension_numbers<[1], [0], [0], [1], [0, 0, 1, 1], [], []>} : vector<32x64xf32>, vector<64x64xf32>, vector<32x64xf32> -> vector<32x64xf32>
    %c0_48 = arith.constant 0 : index
    %c0_49 = arith.constant 0 : index
    %104 = vector.load %arg5[%c0_48, %c0_49] : memref<1x64xf32, #tpu.memory_space<vmem>>, vector<1x64xf32>
    %105 = vector.broadcast %104 : vector<1x64xf32> to vector<32x64xf32>
    %106 = arith.addf %103, %105 : vector<32x64xf32>
    %cst_50 = arith.constant 0.000000e+00 : f32
    %107 = vector.broadcast %cst_50 : f32 to vector<32x64xf32>
    %108 = arith.maximumf %106, %107 : vector<32x64xf32>
    %c0_51 = arith.constant 0 : index
    %c0_52 = arith.constant 0 : index
    %109 = vector.load %arg6[%c0_51, %c0_52] : memref<64x64xf32, #tpu.memory_space<vmem>>, vector<64x64xf32>
    %cst_53 = arith.constant dense<0.000000e+00> : vector<32x64xf32>
    %110 = tpu.matmul %108, %109, %cst_53 {dimension_numbers = #tpu.dot_dimension_numbers<[1], [0], [0], [1], [0, 0, 1, 1], [], []>} : vector<32x64xf32>, vector<64x64xf32>, vector<32x64xf32> -> vector<32x64xf32>
    %c0_54 = arith.constant 0 : index
    %c0_55 = arith.constant 0 : index
    %111 = vector.load %arg7[%c0_54, %c0_55] : memref<1x64xf32, #tpu.memory_space<vmem>>, vector<1x64xf32>
    %112 = vector.broadcast %111 : vector<1x64xf32> to vector<32x64xf32>
    %113 = arith.addf %110, %112 : vector<32x64xf32>
    %114 = arith.maximumf %95, %113 : vector<32x64xf32>
    %cst_56 = arith.constant dense<0.000000e+00> : vector<32x4xf32>
    %115 = tpu.matmul %58, %0, %cst_56 {dimension_numbers = #tpu.dot_dimension_numbers<[1], [0], [0], [1], [0, 0, 1, 1], [], []>} : vector<32x32xf32>, vector<32x4xf32>, vector<32x4xf32> -> vector<32x4xf32>
    %c0_57 = arith.constant 0 : index
    %c0_58 = arith.constant 0 : index
    %116 = vector.load %arg2[%c0_57, %c0_58] : memref<4x64xf32, #tpu.memory_space<vmem>>, vector<4x64xf32>
    %cst_59 = arith.constant dense<0.000000e+00> : vector<32x64xf32>
    %117 = tpu.matmul %115, %116, %cst_59 {dimension_numbers = #tpu.dot_dimension_numbers<[1], [0], [0], [1], [0, 0, 1, 1], [], []>} : vector<32x4xf32>, vector<4x64xf32>, vector<32x64xf32> -> vector<32x64xf32>
    %118 = arith.addf %77, %117 : vector<32x64xf32>
    %cst_60 = arith.constant 0.000000e+00 : f32
    %119 = vector.broadcast %cst_60 : f32 to vector<32x64xf32>
    %120 = arith.maximumf %118, %119 : vector<32x64xf32>
    %c0_61 = arith.constant 0 : index
    %c0_62 = arith.constant 0 : index
    %121 = vector.load %arg4[%c0_61, %c0_62] : memref<64x64xf32, #tpu.memory_space<vmem>>, vector<64x64xf32>
    %cst_63 = arith.constant dense<0.000000e+00> : vector<32x64xf32>
    %122 = tpu.matmul %120, %121, %cst_63 {dimension_numbers = #tpu.dot_dimension_numbers<[1], [0], [0], [1], [0, 0, 1, 1], [], []>} : vector<32x64xf32>, vector<64x64xf32>, vector<32x64xf32> -> vector<32x64xf32>
    %c0_64 = arith.constant 0 : index
    %c0_65 = arith.constant 0 : index
    %123 = vector.load %arg5[%c0_64, %c0_65] : memref<1x64xf32, #tpu.memory_space<vmem>>, vector<1x64xf32>
    %124 = vector.broadcast %123 : vector<1x64xf32> to vector<32x64xf32>
    %125 = arith.addf %122, %124 : vector<32x64xf32>
    %cst_66 = arith.constant 0.000000e+00 : f32
    %126 = vector.broadcast %cst_66 : f32 to vector<32x64xf32>
    %127 = arith.maximumf %125, %126 : vector<32x64xf32>
    %c0_67 = arith.constant 0 : index
    %c0_68 = arith.constant 0 : index
    %128 = vector.load %arg6[%c0_67, %c0_68] : memref<64x64xf32, #tpu.memory_space<vmem>>, vector<64x64xf32>
    %cst_69 = arith.constant dense<0.000000e+00> : vector<32x64xf32>
    %129 = tpu.matmul %127, %128, %cst_69 {dimension_numbers = #tpu.dot_dimension_numbers<[1], [0], [0], [1], [0, 0, 1, 1], [], []>} : vector<32x64xf32>, vector<64x64xf32>, vector<32x64xf32> -> vector<32x64xf32>
    %c0_70 = arith.constant 0 : index
    %c0_71 = arith.constant 0 : index
    %130 = vector.load %arg7[%c0_70, %c0_71] : memref<1x64xf32, #tpu.memory_space<vmem>>, vector<1x64xf32>
    %131 = vector.broadcast %130 : vector<1x64xf32> to vector<32x64xf32>
    %132 = arith.addf %129, %131 : vector<32x64xf32>
    %133 = arith.maximumf %114, %132 : vector<32x64xf32>
    %cst_72 = arith.constant dense<0.000000e+00> : vector<32x4xf32>
    %134 = tpu.matmul %72, %0, %cst_72 {dimension_numbers = #tpu.dot_dimension_numbers<[1], [0], [0], [1], [0, 0, 1, 1], [], []>} : vector<32x32xf32>, vector<32x4xf32>, vector<32x4xf32> -> vector<32x4xf32>
    %c0_73 = arith.constant 0 : index
    %c0_74 = arith.constant 0 : index
    %135 = vector.load %arg2[%c0_73, %c0_74] : memref<4x64xf32, #tpu.memory_space<vmem>>, vector<4x64xf32>
    %cst_75 = arith.constant dense<0.000000e+00> : vector<32x64xf32>
    %136 = tpu.matmul %134, %135, %cst_75 {dimension_numbers = #tpu.dot_dimension_numbers<[1], [0], [0], [1], [0, 0, 1, 1], [], []>} : vector<32x4xf32>, vector<4x64xf32>, vector<32x64xf32> -> vector<32x64xf32>
    %137 = arith.addf %77, %136 : vector<32x64xf32>
    %cst_76 = arith.constant 0.000000e+00 : f32
    %138 = vector.broadcast %cst_76 : f32 to vector<32x64xf32>
    %139 = arith.maximumf %137, %138 : vector<32x64xf32>
    %c0_77 = arith.constant 0 : index
    %c0_78 = arith.constant 0 : index
    %140 = vector.load %arg4[%c0_77, %c0_78] : memref<64x64xf32, #tpu.memory_space<vmem>>, vector<64x64xf32>
    %cst_79 = arith.constant dense<0.000000e+00> : vector<32x64xf32>
    %141 = tpu.matmul %139, %140, %cst_79 {dimension_numbers = #tpu.dot_dimension_numbers<[1], [0], [0], [1], [0, 0, 1, 1], [], []>} : vector<32x64xf32>, vector<64x64xf32>, vector<32x64xf32> -> vector<32x64xf32>
    %c0_80 = arith.constant 0 : index
    %c0_81 = arith.constant 0 : index
    %142 = vector.load %arg5[%c0_80, %c0_81] : memref<1x64xf32, #tpu.memory_space<vmem>>, vector<1x64xf32>
    %143 = vector.broadcast %142 : vector<1x64xf32> to vector<32x64xf32>
    %144 = arith.addf %141, %143 : vector<32x64xf32>
    %cst_82 = arith.constant 0.000000e+00 : f32
    %145 = vector.broadcast %cst_82 : f32 to vector<32x64xf32>
    %146 = arith.maximumf %144, %145 : vector<32x64xf32>
    %c0_83 = arith.constant 0 : index
    %c0_84 = arith.constant 0 : index
    %147 = vector.load %arg6[%c0_83, %c0_84] : memref<64x64xf32, #tpu.memory_space<vmem>>, vector<64x64xf32>
    %cst_85 = arith.constant dense<0.000000e+00> : vector<32x64xf32>
    %148 = tpu.matmul %146, %147, %cst_85 {dimension_numbers = #tpu.dot_dimension_numbers<[1], [0], [0], [1], [0, 0, 1, 1], [], []>} : vector<32x64xf32>, vector<64x64xf32>, vector<32x64xf32> -> vector<32x64xf32>
    %c0_86 = arith.constant 0 : index
    %c0_87 = arith.constant 0 : index
    %149 = vector.load %arg7[%c0_86, %c0_87] : memref<1x64xf32, #tpu.memory_space<vmem>>, vector<1x64xf32>
    %150 = vector.broadcast %149 : vector<1x64xf32> to vector<32x64xf32>
    %151 = arith.addf %148, %150 : vector<32x64xf32>
    %152 = arith.maximumf %133, %151 : vector<32x64xf32>
    %153 = arith.mulf %152, %152 : vector<32x64xf32>
    %cst_88 = arith.constant dense<0.000000e+00> : vector<32xf32>
    %154 = vector.multi_reduction <add>, %153, %cst_88 [1] : vector<32x64xf32> to vector<32xf32>
    %155 = vector.shape_cast %154 : vector<32xf32> to vector<32x1xf32>
    %156 = tpu.transpose %155, [1, 0] : vector<32x1xf32> -> vector<1x32xf32>
    %157 = vector.broadcast %155 : vector<32x1xf32> to vector<32x32xf32>
    %158 = vector.broadcast %156 : vector<1x32xf32> to vector<32x32xf32>
    %159 = arith.addf %157, %158 : vector<32x32xf32>
    %160 = tpu.transpose %152, [1, 0] : vector<32x64xf32> -> vector<64x32xf32>
    %cst_89 = arith.constant dense<0.000000e+00> : vector<32x32xf32>
    %161 = tpu.matmul %152, %160, %cst_89 {dimension_numbers = #tpu.dot_dimension_numbers<[1], [0], [0], [1], [0, 0, 1, 1], [], []>} : vector<32x64xf32>, vector<64x32xf32>, vector<32x32xf32> -> vector<32x32xf32>
    %cst_90 = arith.constant 2.000000e+00 : f32
    %162 = vector.broadcast %cst_90 : f32 to vector<32x32xf32>
    %163 = arith.mulf %162, %161 : vector<32x32xf32>
    %164 = arith.subf %159, %163 : vector<32x32xf32>
    %165 = tpu.iota {dimensions = array<i32: 0>} : vector<32x32xi32>
    %166 = tpu.iota {dimensions = array<i32: 1>} : vector<32x32xi32>
    %167 = arith.sitofp %166 : vector<32x32xi32> to vector<32x32xf32>
    %168 = arith.cmpi eq, %165, %166 : vector<32x32xi32>
    %cst_91 = arith.constant 1.000000e+30 : f32
    %169 = vector.broadcast %cst_91 : f32 to vector<32x32xf32>
    %170 = arith.select %168, %169, %164 : vector<32x32xi1>, vector<32x32xf32>
    %cst_92 = arith.constant dense<0x7F800000> : vector<32xf32>
    %171 = vector.multi_reduction <minimumf>, %170, %cst_92 [1] : vector<32x32xf32> to vector<32xf32>
    %172 = vector.shape_cast %171 : vector<32xf32> to vector<32x1xf32>
    %173 = vector.broadcast %172 : vector<32x1xf32> to vector<32x32xf32>
    %174 = arith.cmpf ole, %170, %173 : vector<32x32xf32>
    %cst_93 = arith.constant 3.200000e+01 : f32
    %175 = vector.broadcast %cst_93 : f32 to vector<32x32xf32>
    %176 = arith.select %174, %167, %175 : vector<32x32xi1>, vector<32x32xf32>
    %cst_94 = arith.constant dense<0x7F800000> : vector<32xf32>
    %177 = vector.multi_reduction <minimumf>, %176, %cst_94 [1] : vector<32x32xf32> to vector<32xf32>
    %178 = vector.shape_cast %177 : vector<32xf32> to vector<32x1xf32>
    %179 = vector.broadcast %178 : vector<32x1xf32> to vector<32x32xf32>
    %180 = arith.cmpf oeq, %167, %179 : vector<32x32xf32>
    %181 = arith.extui %180 : vector<32x32xi1> to vector<32x32xi32>
    %182 = arith.sitofp %181 : vector<32x32xi32> to vector<32x32xf32>
    %cst_95 = arith.constant 1.000000e+30 : f32
    %183 = vector.broadcast %cst_95 : f32 to vector<32x32xf32>
    %184 = arith.select %180, %183, %170 : vector<32x32xi1>, vector<32x32xf32>
    %cst_96 = arith.constant dense<0x7F800000> : vector<32xf32>
    %185 = vector.multi_reduction <minimumf>, %184, %cst_96 [1] : vector<32x32xf32> to vector<32xf32>
    %186 = vector.shape_cast %185 : vector<32xf32> to vector<32x1xf32>
    %187 = vector.broadcast %186 : vector<32x1xf32> to vector<32x32xf32>
    %188 = arith.cmpf ole, %184, %187 : vector<32x32xf32>
    %cst_97 = arith.constant 3.200000e+01 : f32
    %189 = vector.broadcast %cst_97 : f32 to vector<32x32xf32>
    %190 = arith.select %188, %167, %189 : vector<32x32xi1>, vector<32x32xf32>
    %cst_98 = arith.constant dense<0x7F800000> : vector<32xf32>
    %191 = vector.multi_reduction <minimumf>, %190, %cst_98 [1] : vector<32x32xf32> to vector<32xf32>
    %192 = vector.shape_cast %191 : vector<32xf32> to vector<32x1xf32>
    %193 = vector.broadcast %192 : vector<32x1xf32> to vector<32x32xf32>
    %194 = arith.cmpf oeq, %167, %193 : vector<32x32xf32>
    %195 = arith.extui %194 : vector<32x32xi1> to vector<32x32xi32>
    %196 = arith.sitofp %195 : vector<32x32xi32> to vector<32x32xf32>
    %cst_99 = arith.constant 1.000000e+30 : f32
    %197 = vector.broadcast %cst_99 : f32 to vector<32x32xf32>
    %198 = arith.select %194, %197, %184 : vector<32x32xi1>, vector<32x32xf32>
    %cst_100 = arith.constant dense<0x7F800000> : vector<32xf32>
    %199 = vector.multi_reduction <minimumf>, %198, %cst_100 [1] : vector<32x32xf32> to vector<32xf32>
    %200 = vector.shape_cast %199 : vector<32xf32> to vector<32x1xf32>
    %201 = vector.broadcast %200 : vector<32x1xf32> to vector<32x32xf32>
    %202 = arith.cmpf ole, %198, %201 : vector<32x32xf32>
    %cst_101 = arith.constant 3.200000e+01 : f32
    %203 = vector.broadcast %cst_101 : f32 to vector<32x32xf32>
    %204 = arith.select %202, %167, %203 : vector<32x32xi1>, vector<32x32xf32>
    %cst_102 = arith.constant dense<0x7F800000> : vector<32xf32>
    %205 = vector.multi_reduction <minimumf>, %204, %cst_102 [1] : vector<32x32xf32> to vector<32xf32>
    %206 = vector.shape_cast %205 : vector<32xf32> to vector<32x1xf32>
    %207 = vector.broadcast %206 : vector<32x1xf32> to vector<32x32xf32>
    %208 = arith.cmpf oeq, %167, %207 : vector<32x32xf32>
    %209 = arith.extui %208 : vector<32x32xi1> to vector<32x32xi32>
    %210 = arith.sitofp %209 : vector<32x32xi32> to vector<32x32xf32>
    %cst_103 = arith.constant 1.000000e+30 : f32
    %211 = vector.broadcast %cst_103 : f32 to vector<32x32xf32>
    %212 = arith.select %208, %211, %198 : vector<32x32xi1>, vector<32x32xf32>
    %cst_104 = arith.constant dense<0x7F800000> : vector<32xf32>
    %213 = vector.multi_reduction <minimumf>, %212, %cst_104 [1] : vector<32x32xf32> to vector<32xf32>
    %214 = vector.shape_cast %213 : vector<32xf32> to vector<32x1xf32>
    %215 = vector.broadcast %214 : vector<32x1xf32> to vector<32x32xf32>
    %216 = arith.cmpf ole, %212, %215 : vector<32x32xf32>
    %cst_105 = arith.constant 3.200000e+01 : f32
    %217 = vector.broadcast %cst_105 : f32 to vector<32x32xf32>
    %218 = arith.select %216, %167, %217 : vector<32x32xi1>, vector<32x32xf32>
    %cst_106 = arith.constant dense<0x7F800000> : vector<32xf32>
    %219 = vector.multi_reduction <minimumf>, %218, %cst_106 [1] : vector<32x32xf32> to vector<32xf32>
    %220 = vector.shape_cast %219 : vector<32xf32> to vector<32x1xf32>
    %221 = vector.broadcast %220 : vector<32x1xf32> to vector<32x32xf32>
    %222 = arith.cmpf oeq, %167, %221 : vector<32x32xf32>
    %223 = arith.extui %222 : vector<32x32xi1> to vector<32x32xi32>
    %224 = arith.sitofp %223 : vector<32x32xi32> to vector<32x32xf32>
    %c0_107 = arith.constant 0 : index
    %c0_108 = arith.constant 0 : index
    %225 = vector.load %arg8[%c0_107, %c0_108] : memref<64x128xf32, #tpu.memory_space<vmem>>, vector<64x128xf32>
    %cst_109 = arith.constant dense<0.000000e+00> : vector<32x128xf32>
    %226 = tpu.matmul %152, %225, %cst_109 {dimension_numbers = #tpu.dot_dimension_numbers<[1], [0], [0], [1], [0, 0, 1, 1], [], []>} : vector<32x64xf32>, vector<64x128xf32>, vector<32x128xf32> -> vector<32x128xf32>
    %c0_110 = arith.constant 0 : index
    %c0_111 = arith.constant 0 : index
    %227 = vector.load %arg10[%c0_110, %c0_111] : memref<1x128xf32, #tpu.memory_space<vmem>>, vector<1x128xf32>
    %228 = vector.broadcast %227 : vector<1x128xf32> to vector<32x128xf32>
    %229 = arith.addf %226, %228 : vector<32x128xf32>
    %cst_112 = arith.constant dense<0.000000e+00> : vector<32x64xf32>
    %230 = tpu.matmul %182, %152, %cst_112 {dimension_numbers = #tpu.dot_dimension_numbers<[1], [0], [0], [1], [0, 0, 1, 1], [], []>} : vector<32x32xf32>, vector<32x64xf32>, vector<32x64xf32> -> vector<32x64xf32>
    %c0_113 = arith.constant 0 : index
    %c0_114 = arith.constant 0 : index
    %231 = vector.load %arg9[%c0_113, %c0_114] : memref<64x128xf32, #tpu.memory_space<vmem>>, vector<64x128xf32>
    %cst_115 = arith.constant dense<0.000000e+00> : vector<32x128xf32>
    %232 = tpu.matmul %230, %231, %cst_115 {dimension_numbers = #tpu.dot_dimension_numbers<[1], [0], [0], [1], [0, 0, 1, 1], [], []>} : vector<32x64xf32>, vector<64x128xf32>, vector<32x128xf32> -> vector<32x128xf32>
    %233 = arith.addf %229, %232 : vector<32x128xf32>
    %cst_116 = arith.constant dense<0.000000e+00> : vector<32x64xf32>
    %234 = tpu.matmul %196, %152, %cst_116 {dimension_numbers = #tpu.dot_dimension_numbers<[1], [0], [0], [1], [0, 0, 1, 1], [], []>} : vector<32x32xf32>, vector<32x64xf32>, vector<32x64xf32> -> vector<32x64xf32>
    %c0_117 = arith.constant 0 : index
    %c0_118 = arith.constant 0 : index
    %235 = vector.load %arg9[%c0_117, %c0_118] : memref<64x128xf32, #tpu.memory_space<vmem>>, vector<64x128xf32>
    %cst_119 = arith.constant dense<0.000000e+00> : vector<32x128xf32>
    %236 = tpu.matmul %234, %235, %cst_119 {dimension_numbers = #tpu.dot_dimension_numbers<[1], [0], [0], [1], [0, 0, 1, 1], [], []>} : vector<32x64xf32>, vector<64x128xf32>, vector<32x128xf32> -> vector<32x128xf32>
    %237 = arith.addf %229, %236 : vector<32x128xf32>
    %238 = arith.maximumf %233, %237 : vector<32x128xf32>
    %cst_120 = arith.constant dense<0.000000e+00> : vector<32x64xf32>
    %239 = tpu.matmul %210, %152, %cst_120 {dimension_numbers = #tpu.dot_dimension_numbers<[1], [0], [0], [1], [0, 0, 1, 1], [], []>} : vector<32x32xf32>, vector<32x64xf32>, vector<32x64xf32> -> vector<32x64xf32>
    %c0_121 = arith.constant 0 : index
    %c0_122 = arith.constant 0 : index
    %240 = vector.load %arg9[%c0_121, %c0_122] : memref<64x128xf32, #tpu.memory_space<vmem>>, vector<64x128xf32>
    %cst_123 = arith.constant dense<0.000000e+00> : vector<32x128xf32>
    %241 = tpu.matmul %239, %240, %cst_123 {dimension_numbers = #tpu.dot_dimension_numbers<[1], [0], [0], [1], [0, 0, 1, 1], [], []>} : vector<32x64xf32>, vector<64x128xf32>, vector<32x128xf32> -> vector<32x128xf32>
    %242 = arith.addf %229, %241 : vector<32x128xf32>
    %243 = arith.maximumf %238, %242 : vector<32x128xf32>
    %cst_124 = arith.constant dense<0.000000e+00> : vector<32x64xf32>
    %244 = tpu.matmul %224, %152, %cst_124 {dimension_numbers = #tpu.dot_dimension_numbers<[1], [0], [0], [1], [0, 0, 1, 1], [], []>} : vector<32x32xf32>, vector<32x64xf32>, vector<32x64xf32> -> vector<32x64xf32>
    %c0_125 = arith.constant 0 : index
    %c0_126 = arith.constant 0 : index
    %245 = vector.load %arg9[%c0_125, %c0_126] : memref<64x128xf32, #tpu.memory_space<vmem>>, vector<64x128xf32>
    %cst_127 = arith.constant dense<0.000000e+00> : vector<32x128xf32>
    %246 = tpu.matmul %244, %245, %cst_127 {dimension_numbers = #tpu.dot_dimension_numbers<[1], [0], [0], [1], [0, 0, 1, 1], [], []>} : vector<32x64xf32>, vector<64x128xf32>, vector<32x128xf32> -> vector<32x128xf32>
    %247 = arith.addf %229, %246 : vector<32x128xf32>
    %248 = arith.maximumf %243, %247 : vector<32x128xf32>
    %cst_128 = arith.constant dense<0.000000e+00> : vector<64xf32>
    %249 = vector.multi_reduction <add>, %152, %cst_128 [0] : vector<32x64xf32> to vector<64xf32>
    %250 = vector.shape_cast %249 : vector<64xf32> to vector<1x64xf32>
    %251 = arith.truncf %250 : vector<1x64xf32> to vector<1x64xbf16>
    %cst_129 = arith.constant dense<0.000000e+00> : vector<128xf32>
    %252 = vector.multi_reduction <add>, %248, %cst_129 [0] : vector<32x128xf32> to vector<128xf32>
    %253 = vector.shape_cast %252 : vector<128xf32> to vector<1x128xf32>
    %254 = arith.truncf %253 : vector<1x128xf32> to vector<1x128xbf16>
    %c0_130 = arith.constant 0 : index
    %c0_131 = arith.constant 0 : index
    %255 = vector.load %arg11[%c0_130, %c0_131] : memref<64x1024xbf16, #tpu.memory_space<vmem>>, vector<64x1024xbf16>
    %cst_132 = arith.constant dense<0.000000e+00> : vector<1x1024xf32>
    %256 = tpu.matmul %251, %255, %cst_132 {dimension_numbers = #tpu.dot_dimension_numbers<[1], [0], [0], [1], [0, 0, 1, 1], [], []>} : vector<1x64xbf16>, vector<64x1024xbf16>, vector<1x1024xf32> -> vector<1x1024xf32>
    %c0_133 = arith.constant 0 : index
    %c0_134 = arith.constant 0 : index
    %257 = vector.load %arg12[%c0_133, %c0_134] : memref<128x1024xbf16, #tpu.memory_space<vmem>>, vector<128x1024xbf16>
    %cst_135 = arith.constant dense<0.000000e+00> : vector<1x1024xf32>
    %258 = tpu.matmul %254, %257, %cst_135 {dimension_numbers = #tpu.dot_dimension_numbers<[1], [0], [0], [1], [0, 0, 1, 1], [], []>} : vector<1x128xbf16>, vector<128x1024xbf16>, vector<1x1024xf32> -> vector<1x1024xf32>
    %259 = arith.addf %256, %258 : vector<1x1024xf32>
    %c0_136 = arith.constant 0 : index
    %c0_137 = arith.constant 0 : index
    %260 = vector.load %arg13[%c0_136, %c0_137] : memref<1x1024xf32, #tpu.memory_space<vmem>>, vector<1x1024xf32>
    %cst_138 = arith.constant 3.200000e+01 : f32
    %261 = vector.broadcast %cst_138 : f32 to vector<1x1024xf32>
    %262 = arith.mulf %261, %260 : vector<1x1024xf32>
    %263 = arith.addf %259, %262 : vector<1x1024xf32>
    %264 = arith.truncf %263 : vector<1x1024xf32> to vector<1x1024xbf16>
    %c0_139 = arith.constant 0 : index
    %c0_140 = arith.constant 0 : index
    %265 = vector.load %arg14[%c0_139, %c0_140] : memref<1024x512xbf16, #tpu.memory_space<vmem>>, vector<1024x512xbf16>
    %cst_141 = arith.constant dense<0.000000e+00> : vector<1x512xf32>
    %266 = tpu.matmul %264, %265, %cst_141 {dimension_numbers = #tpu.dot_dimension_numbers<[1], [0], [0], [1], [0, 0, 1, 1], [], []>} : vector<1x1024xbf16>, vector<1024x512xbf16>, vector<1x512xf32> -> vector<1x512xf32>
    %c0_142 = arith.constant 0 : index
    %c0_143 = arith.constant 0 : index
    %267 = vector.load %arg15[%c0_142, %c0_143] : memref<1x512xf32, #tpu.memory_space<vmem>>, vector<1x512xf32>
    %268 = arith.addf %266, %267 : vector<1x512xf32>
    %cst_144 = arith.constant 0.000000e+00 : f32
    %269 = vector.broadcast %cst_144 : f32 to vector<1x512xf32>
    %270 = arith.maximumf %268, %269 : vector<1x512xf32>
    %271 = arith.truncf %270 : vector<1x512xf32> to vector<1x512xbf16>
    %c0_145 = arith.constant 0 : index
    %c0_146 = arith.constant 0 : index
    %272 = vector.load %arg16[%c0_145, %c0_146] : memref<512x256xbf16, #tpu.memory_space<vmem>>, vector<512x256xbf16>
    %cst_147 = arith.constant dense<0.000000e+00> : vector<1x256xf32>
    %273 = tpu.matmul %271, %272, %cst_147 {dimension_numbers = #tpu.dot_dimension_numbers<[1], [0], [0], [1], [0, 0, 1, 1], [], []>} : vector<1x512xbf16>, vector<512x256xbf16>, vector<1x256xf32> -> vector<1x256xf32>
    %c0_148 = arith.constant 0 : index
    %c0_149 = arith.constant 0 : index
    %274 = vector.load %arg17[%c0_148, %c0_149] : memref<1x256xf32, #tpu.memory_space<vmem>>, vector<1x256xf32>
    %275 = arith.addf %273, %274 : vector<1x256xf32>
    %cst_150 = arith.constant 0.000000e+00 : f32
    %276 = vector.broadcast %cst_150 : f32 to vector<1x256xf32>
    %277 = arith.maximumf %275, %276 : vector<1x256xf32>
    %c0_151 = arith.constant 0 : index
    %c0_152 = arith.constant 0 : index
    %278 = vector.load %arg18[%c0_151, %c0_152] : memref<256x10xf32, #tpu.memory_space<vmem>>, vector<256x10xf32>
    %cst_153 = arith.constant dense<0.000000e+00> : vector<1x10xf32>
    %279 = tpu.matmul %277, %278, %cst_153 {dimension_numbers = #tpu.dot_dimension_numbers<[1], [0], [0], [1], [0, 0, 1, 1], [], []>} : vector<1x256xf32>, vector<256x10xf32>, vector<1x10xf32> -> vector<1x10xf32>
    %c0_154 = arith.constant 0 : index
    %c0_155 = arith.constant 0 : index
    %280 = vector.load %arg19[%c0_154, %c0_155] : memref<1x10xf32, #tpu.memory_space<vmem>>, vector<1x10xf32>
    %281 = arith.addf %279, %280 : vector<1x10xf32>
    %cst_156 = arith.constant dense<0xFF800000> : vector<1xf32>
    %282 = vector.multi_reduction <maximumf>, %281, %cst_156 [1] : vector<1x10xf32> to vector<1xf32>
    %283 = vector.shape_cast %282 : vector<1xf32> to vector<1x1xf32>
    %284 = vector.broadcast %283 : vector<1x1xf32> to vector<1x10xf32>
    %285 = arith.subf %281, %284 : vector<1x10xf32>
    %286 = math.exp %285 : vector<1x10xf32>
    %cst_157 = arith.constant dense<0.000000e+00> : vector<1xf32>
    %287 = vector.multi_reduction <add>, %286, %cst_157 [1] : vector<1x10xf32> to vector<1xf32>
    %288 = vector.shape_cast %287 : vector<1xf32> to vector<1x1xf32>
    %289 = math.log %288 : vector<1x1xf32>
    %290 = vector.broadcast %289 : vector<1x1xf32> to vector<1x10xf32>
    %291 = arith.subf %285, %290 : vector<1x10xf32>
    %c0_158 = arith.constant 0 : index
    %c0_159 = arith.constant 0 : index
    %292 = vector.load %arg20[%c0_158, %c0_159] : memref<1x10xf32, #tpu.memory_space<vmem>>, vector<1x10xf32>
    tpu.vector_store %arg20[%c0_158, %c0_159], %291 {strides = array<i32>} : memref<1x10xf32, #tpu.memory_space<vmem>>, vector<1x10xf32>,
    return
  }
}

</mosaic_0001>

<bundles_post_ra>
// kernel: net_forward.1
= control target key start
LH: loop header
LB: loop body
LE: loop exit
PB: predicated region body
PF: predicated region fallthrough
CT: control target
= control target key end

     0   :  { %s10921_s0 = inlined_call_operand.vmem [shape: f32[32,4], index: 0, kind: input, shape index: {}]   ;;  %s10922_s1 = inlined_call_operand.hbm [shape: f32[4,64], index: 1, kind: input, shape index: {}]   ;;  %s10923_s2 = inlined_call_operand.hbm [shape: f32[4,64], index: 2, kind: input, shape index: {}]   ;;  %s10924_s3 = inlined_call_operand.hbm [shape: f32[1,64], index: 3, kind: input, shape index: {}]   ;;  %s10925_s4 = inlined_call_operand.vmem [shape: f32[64,64], index: 4, kind: input, shape index: {}]   ;;  %s10926_s5 = inlined_call_operand.hbm [shape: f32[1,64], index: 5, kind: input, shape index: {}]   ;;  %s10927_s6 = inlined_call_operand.hbm [shape: f32[64,64], index: 6, kind: input, shape index: {}]   ;;  %s10928_s7 = inlined_call_operand.hbm [shape: f32[1,64], index: 7, kind: input, shape index: {}]   ;;  %s10929_s8 = inlined_call_operand.hbm [shape: f32[64,128], index: 8, kind: input, shape index: {}]   ;;  %s10930_s9 = inlined_call_operand.hbm [shape: f32[64,128], index: 9, kind: input, shape index: {}]   ;;  %s10931_s10 = inlined_call_operand.hbm [shape: f32[1,128], index: 10, kind: input, shape index: {}]   ;;  %s10932_s11 = inlined_call_operand.vmem [shape: bf16[64,1024], index: 11, kind: input, shape index: {}]   ;;  %s10933_s12 = inlined_call_operand.hbm [shape: bf16[128,1024], index: 12, kind: input, shape index: {}]   ;;  %s10934_s13 = inlined_call_operand.hbm [shape: f32[1,1024], index: 13, kind: input, shape index: {}]   ;;  %s10935_s14 = inlined_call_operand.hbm [shape: bf16[1024,512], index: 14, kind: input, shape index: {}]   ;;  %s10936_s15 = inlined_call_operand.hbm [shape: f32[1,512], index: 15, kind: input, shape index: {}]   ;;  %s10937_s16 = inlined_call_operand.hbm [shape: bf16[512,256], index: 16, kind: input, shape index: {}]   ;;  %s10938_s17 = inlined_call_operand.vmem [shape: f32[1,256], index: 17, kind: input, shape index: {}]   ;;  %s10939_s18 = inlined_call_operand.vmem [shape: f32[256,10], index: 18, kind: input, shape index: {}]   ;;  %s10940_s19 = inlined_call_operand.vmem [shape: f32[1,10], index: 19, kind: input, shape index: {}]   ;;  %s10941_s20 = inlined_call_operand.hbm [shape: f32[1,10], index: 20, kind: output, shape index: {}]  }
   0x1   :  { %10944 = sst [smem:[#allocation35_spill]] %s10921_s0 }
   0x2   :  { %10945 = sst [smem:[#allocation36_spill]] %s10922_s1 }
   0x3   :  { %10946 = sst [smem:[#allocation37_spill]] %s10923_s2 }
   0x4   :  { %10947 = sst [smem:[#allocation38_spill]] %s10924_s3 }
   0x5   :  { %10948 = sst [smem:[#allocation39_spill]] %s10925_s4 }
   0x6   :  { %25 = vsyncpa [#allocation3], 0 }
   0x7   :  { %26 = vsyncpa [#allocation6], 0 }
   0x8   :  { %27 = vsyncpa [#allocation9], 0 }
   0x9   :  { %28 = vsyncpa [#allocation12], 0 }
   0xa   :  { %29 = vsyncpa [#allocation15], 0 }
   0xb   :  { %30 = vsyncpa [#allocation18], 0 }
   0xc   :  { %31 = vsyncpa [#allocation21], 0 }
   0xd   :  { %32 = vsyncpa [#allocation24], 0 }
   0xe   :  { %33 = vsyncpa [#allocation4], 0  ;;  %s9296_s1 = smov [#allocation5]   ;;  %s9297_s23 = smov [#allocation8]  }
   0xf   :  { %s52_s22 = sshll.u32 %s9296_s1, 4  ;;  %s74_s24 = sshll.u32 %s9297_s23, 4  ;;  %s53_s22 = int_to_ptr.vmem [resolvable:$true] %s52_s22  ;;  %s75_s24 = int_to_ptr.vmem [resolvable:$true] %s74_s24 }
  0x10   :  { %s8986_s2 = scalar_lea.vmem %s53_s22, 64  ;;  %p8991_p1 = scmp.lt.s32.totalorder %s53_s22, %s53_s22 }
  0x11   :  { %p8987_p0 = scmp.ne.s32.totalorder %s53_s22, %s8986_s2  ;;  %p8992_p2 = scmp.lt.s32.totalorder %s8986_s2, %s8986_s2 }
  0x13   :  { %p8993_p3 = por %p8992_p2, %p8991_p1 }
  0x15   :  { %p8994_p4 = pnand %p8993_p3, %p8987_p0 }
  0x17   :  { %8997 = shalt.err (!%p8994_p4)
}
  0x18   :  { %s10949_s26 = sld [smem:[#allocation37_spill]]  ;;  %s9006_s27 = scalar_lea.vmem %s75_s24, 16 }
  0x19   :  { %p9007_p5 = scmp.ne.s32.totalorder %s75_s24, %s9006_s27  ;;  %s9010_s28 = scalar_lea.vmem %s75_s24, 32 }
  0x1a   :  { %p9011_p6 = scmp.lt.s32.totalorder %s75_s24, %s75_s24  ;;  %p9012_p7 = scmp.lt.s32.totalorder %s9010_s28, %s9006_s27 }
  0x1c   :  { %p9013_p8 = por %p9012_p7, %p9011_p6 }
  0x1e   :  { %55 = dma.hbm_to_vmem [thread:$0]  %s10949_s26, 64, %s53_s22, [#allocation6]  }
  0x1f   :  { %p9014_p9 = pnand %p9013_p8, %p9007_p5 }
  0x21   :  { %9017 = shalt.err (!%p9014_p9)
}
  0x22   :  { %77 = dma.hbm_to_vmem [thread:$0]  %s10926_s5, 16, %s75_s24, [#allocation9]  }
  0x23   :  { %s9298_s30 = smov [#allocation11]  }
  0x24   :  { %s96_s0 = sshll.u32 %s9298_s30, 4  ;;  %s97_s0 = int_to_ptr.vmem [resolvable:$true] %s96_s0 }
  0x25   :  { %s9026_s21 = scalar_lea.vmem %s97_s0, 16  ;;  %s9030_s1 = scalar_lea.vmem %s97_s0, 32 }
  0x26   :  { %p9027_p10 = scmp.ne.s32.totalorder %s97_s0, %s9026_s21  ;;  %p9031_p11 = scmp.lt.s32.totalorder %s97_s0, %s97_s0 }
  0x27   :  { %p9032_p12 = scmp.lt.s32.totalorder %s9030_s1, %s9026_s21 }
  0x29   :  { %p9033_p13 = por %p9032_p12, %p9031_p11 }
  0x2b   :  { %p9034_p0 = pnand %p9033_p13, %p9027_p10 }
  0x2d   :  { %9037 = shalt.err (!%p9034_p0)
}
  0x2e   :  { %99 = dma.hbm_to_vmem [thread:$0]  %s10928_s7, 16, %s97_s0, [#allocation12]  }
  0x2f   :  { %s9299_s2 = smov [#allocation14]   ;;  %s9300_s3 = smov [#allocation17]  }
  0x30   :  { %s117_s25 = sshll.u32 %s9299_s2, 4  ;;  %s141_s5 = sshll.u32 %s9300_s3, 4  ;;  %s118_s25 = int_to_ptr.vmem [resolvable:$true] %s117_s25  ;;  %s142_s5 = int_to_ptr.vmem [resolvable:$true] %s141_s5 }
  0x31   :  { %s9046_s24 = scalar_lea.vmem %s118_s25, 1024  ;;  %p9051_p2 = scmp.lt.s32.totalorder %s118_s25, %s118_s25 }
  0x32   :  { %p9047_p1 = scmp.ne.s32.totalorder %s118_s25, %s9046_s24  ;;  %p9052_p3 = scmp.lt.s32.totalorder %s9046_s24, %s9046_s24 }
  0x34   :  { %p9053_p4 = por %p9052_p3, %p9051_p2 }
  0x36   :  { %p9054_p5 = pnand %p9053_p4, %p9047_p1 }
  0x38   :  { %9057 = shalt.err (!%p9054_p5)
}
  0x39   :  { %s9301_s26 = smov 128   ;;  %s9302_s27 = smov 8  }
  0x3a   :  { %123 = dma.hbm_to_vmem [thread:$0]  %s10930_s9, 1024, %s118_s25, [#allocation15], %s9301_s26, %s9301_s26, %s9302_s27  }
  0x3b   :  { %s9066_s7 = scalar_lea.vmem %s142_s5, 8192  ;;  %p9071_p7 = scmp.lt.s32.totalorder %s142_s5, %s142_s5 }
  0x3c   :  { %p9067_p6 = scmp.ne.s32.totalorder %s142_s5, %s9066_s7  ;;  %p9072_p8 = scmp.lt.s32.totalorder %s9066_s7, %s9066_s7 }
  0x3e   :  { %p9073_p9 = por %p9072_p8, %p9071_p7 }
  0x40   :  { %p9074_p10 = pnand %p9073_p9, %p9067_p6 }
  0x42   :  { %9077 = shalt.err (!%p9074_p10)
}
  0x43   :  { %s9303_s29 = smov 512   ;;  %s9304_s30 = smov 32  }
  0x44   :  { %147 = dma.hbm_to_vmem [thread:$0]  %s10933_s12, 8192, %s142_s5, [#allocation18], %s9303_s29, %s9303_s29, %s9304_s30  }
  0x45   :  { %s9305_s1 = smov [#allocation20]  }
  0x46   :  { %s163_s22 = sshll.u32 %s9305_s1, 4  ;;  %s164_s22 = int_to_ptr.vmem [resolvable:$true] %s163_s22 }
  0x47   :  { %s9086_s23 = scalar_lea.vmem %s164_s22, 32768  ;;  %p9091_p12 = scmp.lt.s32.totalorder %s164_s22, %s164_s22 }
  0x48   :  { %p9087_p11 = scmp.ne.s32.totalorder %s164_s22, %s9086_s23  ;;  %p9092_p13 = scmp.lt.s32.totalorder %s9086_s23, %s9086_s23 }
  0x4a   :  { %p9093_p0 = por %p9092_p13, %p9091_p12 }
  0x4c   :  { %p9094_p1 = pnand %p9093_p0, %p9087_p11 }
  0x4e   :  { %9097 = shalt.err (!%p9094_p1)
}
  0x4f   :  { %s9306_s9 = smov 256   ;;  %s9307_s2 = smov 16  }
  0x50   :  { %169 = dma.hbm_to_vmem [thread:$0]  %s10935_s14, 32768, %s164_s22, [#allocation21], %s9306_s9, %s9306_s9, %s9307_s2  }
  0x51   :  { %s9308_s24 = smov [#allocation2]   ;;  %s9309_s4 = smov [#allocation7]  }
  0x52   :  { %s42_s28 = sshll.u32 %s9308_s24, 4  ;;  %s62_s12 = sshll.u32 %s9309_s4, 4  ;;  %s43_s28 = int_to_ptr.vmem [resolvable:$true] %s42_s28  ;;  %s63_s12 = int_to_ptr.vmem [resolvable:$true] %s62_s12 }
  0x53   :  { %s9106_s5 = scalar_lea.vmem %s43_s28, 64  ;;  %p9111_p3 = scmp.lt.s32.totalorder %s43_s28, %s43_s28 }
  0x54   :  { %p9107_p2 = scmp.ne.s32.totalorder %s43_s28, %s9106_s5  ;;  %p9112_p4 = scmp.lt.s32.totalorder %s9106_s5, %s9106_s5 }
  0x56   :  { %p9113_p5 = por %p9112_p4, %p9111_p3 }
  0x58   :  { %p9114_p6 = pnand %p9113_p5, %p9107_p2 }
  0x5a   :  { %9117 = shalt.err (!%p9114_p6)
}
  0x5b   :  { %s10950_s30 = sld [smem:[#allocation36_spill]]  ;;  %s9126_s0 = scalar_lea.vmem %s63_s12, 16 }
  0x5c   :  { %p9127_p7 = scmp.ne.s32.totalorder %s63_s12, %s9126_s0  ;;  %s9130_s14 = scalar_lea.vmem %s63_s12, 32 }
  0x5d   :  { %p9131_p8 = scmp.lt.s32.totalorder %s63_s12, %s63_s12  ;;  %p9132_p9 = scmp.lt.s32.totalorder %s9130_s14, %s9126_s0 }
  0x5f   :  { %p9133_p10 = por %p9132_p9, %p9131_p8 }
  0x61   :  { %45 = dma.hbm_to_vmem [thread:$0]  %s10950_s30, 64, %s43_s28, [#allocation3]  }
  0x62   :  { %p9134_p11 = pnand %p9133_p10, %p9127_p7 }
  0x64   :  { %9137 = shalt.err (!%p9134_p11)
}
  0x65   :  { %s10951_s22 = sld [smem:[#allocation38_spill]]  ;;  %s9310_s23 = smov [#allocation10]  }
  0x66   :  { %s83_s9 = sshll.u32 %s9310_s23, 4  ;;  %s9311_s2 = smov [#allocation13]   ;;  %s84_s9 = int_to_ptr.vmem [resolvable:$true] %s83_s9 }
  0x67   :  { %s105_s25 = sshll.u32 %s9311_s2, 4  ;;  %s9146_s3 = scalar_lea.vmem %s84_s9, 1024  ;;  %s106_s25 = int_to_ptr.vmem [resolvable:$true] %s105_s25 }
  0x68   :  { %p9147_p12 = scmp.ne.s32.totalorder %s84_s9, %s9146_s3  ;;  %p9151_p13 = scmp.lt.s32.totalorder %s84_s9, %s84_s9 }
  0x69   :  { %p9152_p0 = scmp.lt.s32.totalorder %s9146_s3, %s9146_s3 }
  0x6b   :  { %65 = dma.hbm_to_vmem [thread:$0]  %s10951_s22, 16, %s63_s12, [#allocation6]  }
  0x6c   :  { %p9153_p1 = por %p9152_p0, %p9151_p13 }
  0x6e   :  { %p9154_p2 = pnand %p9153_p1, %p9147_p12 }
  0x70   :  { %9157 = shalt.err (!%p9154_p2)
}
  0x71   :  { %89 = dma.hbm_to_vmem [thread:$0]  %s10927_s6, 1024, %s84_s9, [#allocation9], %s9301_s26, %s9301_s26, %s9302_s27  }
  0x72   :  { %s9166_s4 = scalar_lea.vmem %s106_s25, 1024  ;;  %p9171_p4 = scmp.lt.s32.totalorder %s106_s25, %s106_s25 }
  0x73   :  { %p9167_p3 = scmp.ne.s32.totalorder %s106_s25, %s9166_s4  ;;  %p9172_p5 = scmp.lt.s32.totalorder %s9166_s4, %s9166_s4 }
  0x75   :  { %p9173_p6 = por %p9172_p5, %p9171_p4 }
  0x77   :  { %p9174_p7 = pnand %p9173_p6, %p9167_p3 }
  0x79   :  { %9177 = shalt.err (!%p9174_p7)
}
  0x7a   :  { %111 = dma.hbm_to_vmem [thread:$0]  %s10929_s8, 1024, %s106_s25, [#allocation12], %s9301_s26, %s9301_s26, %s9302_s27  }
  0x7b   :  { %s9312_s7 = smov [#allocation16]   ;;  %s9313_s30 = smov [#allocation19]  }
  0x7c   :  { %s130_s29 = sshll.u32 %s9312_s7, 4  ;;  %s154_s0 = sshll.u32 %s9313_s30, 4  ;;  %s131_s29 = int_to_ptr.vmem [resolvable:$true] %s130_s29  ;;  %s155_s0 = int_to_ptr.vmem [resolvable:$true] %s154_s0 }
  0x7d   :  { %s9186_s6 = scalar_lea.vmem %s131_s29, 16  ;;  %s9190_s14 = scalar_lea.vmem %s131_s29, 32 }
  0x7e   :  { %p9187_p8 = scmp.ne.s32.totalorder %s131_s29, %s9186_s6  ;;  %p9191_p9 = scmp.lt.s32.totalorder %s131_s29, %s131_s29 }
  0x7f   :  { %p9192_p10 = scmp.lt.s32.totalorder %s9190_s14, %s9186_s6 }
  0x81   :  { %p9193_p11 = por %p9192_p10, %p9191_p9 }
  0x83   :  { %p9194_p12 = pnand %p9193_p11, %p9187_p8 }
  0x85   :  { %9197 = shalt.err (!%p9194_p12)
}
  0x86   :  { %133 = dma.hbm_to_vmem [thread:$0]  %s10931_s10, 16, %s131_s29, [#allocation15]  }
  0x87   :  { %s9206_s22 = scalar_lea.vmem %s155_s0, 128  ;;  %p9211_p0 = scmp.lt.s32.totalorder %s155_s0, %s155_s0 }
  0x88   :  { %p9207_p13 = scmp.ne.s32.totalorder %s155_s0, %s9206_s22  ;;  %p9212_p1 = scmp.lt.s32.totalorder %s9206_s22, %s9206_s22 }
  0x8a   :  { %p9213_p2 = por %p9212_p1, %p9211_p0 }
  0x8c   :  { %p9214_p3 = pnand %p9213_p2, %p9207_p13 }
  0x8e   :  { %9217 = shalt.err (!%p9214_p3)
}
  0x8f   :  { %157 = dma.hbm_to_vmem [thread:$0]  %s10934_s13, 128, %s155_s0, [#allocation18]  }
  0x90   :  { %s9314_s9 = smov [#allocation22]   ;;  %s9315_s25 = smov [#allocation23]  }
  0x91   :  { %s176_s2 = sshll.u32 %s9314_s9, 4  ;;  %s185_s3 = sshll.u32 %s9315_s25, 4  ;;  %s177_s2 = int_to_ptr.vmem [resolvable:$true] %s176_s2  ;;  %s186_s3 = int_to_ptr.vmem [resolvable:$true] %s185_s3 }
  0x92   :  { %s9226_s24 = scalar_lea.vmem %s177_s2, 64  ;;  %p9231_p5 = scmp.lt.s32.totalorder %s177_s2, %s177_s2 }
  0x93   :  { %p9227_p4 = scmp.ne.s32.totalorder %s177_s2, %s9226_s24  ;;  %p9232_p6 = scmp.lt.s32.totalorder %s9226_s24, %s9226_s24 }
  0x95   :  { %p9233_p7 = por %p9232_p6, %p9231_p5 }
  0x97   :  { %p9234_p8 = pnand %p9233_p7, %p9227_p4 }
  0x99   :  { %9237 = shalt.err (!%p9234_p8)
}
  0x9a   :  { %179 = dma.hbm_to_vmem [thread:$0]  %s10936_s15, 64, %s177_s2, [#allocation21]  }
  0x9b   :  { %s9246_s4 = scalar_lea.vmem %s186_s3, 8192  ;;  %p9251_p10 = scmp.lt.s32.totalorder %s186_s3, %s186_s3 }
  0x9c   :  { %p9247_p9 = scmp.ne.s32.totalorder %s186_s3, %s9246_s4  ;;  %p9252_p11 = scmp.lt.s32.totalorder %s9246_s4, %s9246_s4 }
  0x9e   :  { %p9253_p12 = por %p9252_p11, %p9251_p10 }
  0xa0   :  { %p9254_p13 = pnand %p9253_p12, %p9247_p9 }
  0xa2   :  { %9257 = shalt.err (!%p9254_p13)
}
  0xa3   :  { %191 = dma.hbm_to_vmem [thread:$0]  %s10937_s16, 8192, %s186_s3, [#allocation24], %s9301_s26, %s9301_s26, %s9302_s27  }
  0xa4   :  { %9278 = dma.done.wait [#allocation3], 64  }
  0xa5   :  { %9279 = vsyncadd [#allocation3], 4294967232 }
  0xa6   :  { %9280 = dma.done.wait [#allocation6], 80  }
  0xa7   :  { %9281 = vsyncadd [#allocation6], 4294967216 }
  0xa8   :  { %9282 = dma.done.wait [#allocation9], 1040  }
  0xa9   :  { %9283 = vsyncadd [#allocation9], 4294966256 }
  0xaa   :  { %9284 = dma.done.wait [#allocation12], 1040  }
  0xab   :  { %9285 = vsyncadd [#allocation12], 4294966256 }
  0xac   :  { %9286 = dma.done.wait [#allocation15], 1040  }
  0xad   :  { %9287 = vsyncadd [#allocation15], 4294966256 }
  0xae   :  { %9288 = dma.done.wait [#allocation18], 8320  }
  0xaf   :  { %9289 = vsyncadd [#allocation18], 4294958976 }
  0xb0   :  { %9290 = dma.done.wait [#allocation21], 32832  }
  0xb1   :  { %9291 = vsyncadd [#allocation21], 4294934464 }
  0xb2   :  { %9292 = dma.done.wait [#allocation24], 8192  }
  0xb3   :  { %9293 = vsyncadd [#allocation24], 4294959104  ;;  %s10952_s7 = sld [smem:[#allocation35_spill]]  ;;  %vm249_vm0 = vcmask 31744   ;;  %v294_v16 = vlaneseq  ;;  %vm423_vm2 = vcmask 261120   ;;  %v9316_v63 = vmov 0.0  }
  0xb4   :  { %vm620_vm14 = vcmask 1043456   ;;  %s10953_s21 = sld [smem:[#allocation39_spill]]  ;;  %s9318_s29 = smov [#allocation25]  }
  0xb5   :  { %v9534_v18 = vshrl.u32 %v294_v16, 7  ;;  %v9539_v23 = vand.u32 127, %v294_v16  ;;  %s7108_s30 = sshll.u32 %s9318_s29, 4  ;;  %s7109_s30 = int_to_ptr.vmem [resolvable:$true] %s7108_s30 }
  0xb6   :  { %s9262_s0 = scalar_lea.vmem %s7109_s30, 32  ;;  %p9263_p1 = scmp.lt.s32.totalorder %s7109_s30, %s7109_s30 }
  0xb7   :  { %v9537_v20 = vsub.s32 0, %v9534_v18  ;;  %v9543_v26 = vadd.s32 8, %v9534_v18  ;;  %vm415_vm1 = vcmp.eq.s32.totalorder %v9534_v18, %v9539_v23  ;;  %v9550_v35 = vadd.s32 16, %v9534_v18 }
  0xb8   :  { %v9562_v42 = vadd.s32 24, %v9534_v18  ;;  %v9576_v49 = vcvt.s32.f32 %v9539_v23 }
  0xb9   :  { %v241_v0 = vld [vmem:[%s10952_s7] sm:$0xff]  ;;  %v9484_v1 = vld [vmem:[%s10952_s7 + $0x8] sm:$0xff]  ;;  %v9489_v2 = vld [vmem:[%s10952_s7 + $0x10] sm:$0xff]  ;;  %vm416_vm3 = vcmp.eq.s32.totalorder %v9543_v26, %v9539_v23  ;;  %vm417_vm4 = vcmp.eq.s32.totalorder %v9550_v35, %v9539_v23 }
  0xba   :  { %v245_v3 = vmul.f32 %v241_v0, %v241_v0  ;;  %v246_v4 = vmul.f32 %v9484_v1, %v9484_v1  ;;  %v247_v5 = vmul.f32 %v9489_v2, %v9489_v2  ;;  %v9498_v6 = vld [vmem:[%s10952_s7 + $0x18] sm:$0xff]  ;;  %8009 = vmatprep.mubr.msk.f32.mxu0 %vm249_vm0, %v241_v0  ;;  %8017 = vmatprep.mubr.msk.f32.mxu1 %vm249_vm0, %v241_v0 }
  0xbb   :  { %v248_v7 = vmul.f32 %v9498_v6, %v9498_v6  ;;  %8001 = vmatprep.subr.msk.mxu0 %vm249_vm0, %v9498_v6  ;;  %vm418_vm5 = vcmp.eq.s32.totalorder %v9562_v42, %v9539_v23 }
  0xbc   :  { %v250_v8 = vsel %vm249_vm0, %v245_v3, 0.0  ;;  %v256_v9 = vsel %vm249_vm0, %v247_v5, 0.0  ;;  %8002 = vmatpush3.xpose.msk.msra.mxu0 %vm249_vm0, %v9498_v6  ;;  %v253_v10 = vsel %vm249_vm0, %v246_v4, 0.0 }
  0xbd   :  { %251 = vadd.xlane.f32.xlu0 %v250_v8  ;;  %257 = vadd.xlane.f32.xlu1 %v256_v9  ;;  %v259_v11 = vsel %vm249_vm0, %v248_v7, 0.0 }
  0xbe   :  { %8003 = vmatprep.subr.msk.mxu0 %vm249_vm0, %v9489_v2 }
  0xc0   :  { %8004 = vmatpush3.xpose.msk.msra.mxu0 %vm249_vm0, %v9489_v2 }
  0xc1   :  { %254 = vadd.xlane.f32.xlu0 %v253_v10  ;;  %260 = vadd.xlane.f32.xlu1 %v259_v11 }
  0xc2   :  { %8005 = vmatprep.subr.msk.mxu0 %vm249_vm0, %v9484_v1 }
  0xc4   :  { %8006 = vmatpush3.xpose.msk.msra.mxu0 %vm249_vm0, %v9484_v1 }
  0xc5   :  { %8007 = vmatprep.subr.msk.mxu0 %vm249_vm0, %v241_v0 }
  0xc8   :  { %8008 = vmatpush3.xpose.msk.msra.mxu0 %vm249_vm0, %v241_v0 }
  0xc9   :  { %8023 = vmatprep.subr.mxu0 %v9498_v6 }
  0xcb   :  { %8010 = vmatmul.mubr.msk.f32.vlgmr.msra.gmra.mxu0 %vm249_vm0, %v9484_v1 }
  0xcc   :  { %8012 = vmatprep.mubr.msk.f32.mxu0 %vm249_vm0, %v9489_v2  ;;  %8024 = vmatpush3.msra.mxu0 %v9498_v6 }
  0xcd   :  { %8025 = vmatprep.subr.mxu0 %v9489_v2 }
  0xce   :  { %8026 = vmatpush3.msra.mxu0 %v9489_v2 }
  0xcf   :  { %8013 = vmatmul.mubr.msk.f32.gmra.mxu0 %vm249_vm0, %v9498_v6  ;;  %8027 = vmatprep.subr.mxu0 %v9484_v1 }
  0xd0   :  { %8028 = vmatpush3.msra.mxu0 %v9484_v1 }
  0xd1   :  { %8029 = vmatprep.subr.mxu0 %v241_v0 }
  0xd2   :  { %8030 = vmatpush3.msra.mxu0 %v241_v0 }
 0x146   :  { %v252_v12 = vpop.xlane.xlu0 %251  ;;  %v258_v14 = vpop.xlane.xlu1 %257 }
 0x147   :  { %262 = vxpose.xlu0.b32.start [1/4] (short) (narrow) %v252_v12, 8 }
 0x14a   :  { %v255_v13 = vpop.xlane.xlu0 %254  ;;  %v261_v15 = vpop.xlane.xlu1 %260 }
 0x14b   :  { %263 = vxpose.xlu0.b32.cont [2/4] (short) (narrow) %v255_v13, 8 }
 0x14f   :  { %264 = vxpose.xlu0.b32.cont [3/4] (short) (narrow) %v258_v14, 8 }
 0x153   :  { %265 = vxpose.xlu0.b32.end [4/4] (short) (narrow) %v261_v15, 8 }
 0x18b   :  { %v8011_v17 = vpop.f32.mrf.mxu0 }
 0x18c   :  { %v400_v27 = vmul.f32 2.0, %v8011_v17 }
 0x18d   :  { %v380_v19 = vpop.f32.mrf.mxu0 }
 0x18e   :  { %v399_v28 = vmul.f32 2.0, %v380_v19  ;;  %v612_v19 = vld [vmem:[#allocation2] sm:$0xf] }
 0x18f   :  { %v8014_v21 = vpop.f32.mrf.mxu0  ;;  %8015 = vmatprep.subr.msk.mxu1 %vm620_vm14, %v612_v19 }
 0x190   :  { %v402_v38 = vmul.f32 2.0, %v8014_v21  ;;  %v9614_v21 = vld [vmem:[#allocation5] sm:$0xf]  ;;  %8016 = vmatpush3.msk.msra.mxu1 %vm620_vm14, %v612_v19 }
 0x191   :  { %v390_v25 = vpop.f32.mrf.mxu0  ;;  %8018 = vmatmul.mubr.msk.f32.vlgmr.msra.gmra.mxu1 %vm249_vm0, %v9484_v1  ;;  %8037 = vmatprep.subr.msk.mxu1 %vm620_vm14, %v9614_v21 }
 0x192   :  { %v401_v32 = vmul.f32 2.0, %v390_v25  ;;  %8020 = vmatprep.mubr.msk.f32.mxu1 %vm249_vm0, %v9489_v2  ;;  %8038 = vmatpush3.msk.msra.mxu1 %vm620_vm14, %v9614_v21 }
 0x195   :  { %8021 = vmatmul.mubr.msk.f32.gmra.mxu1 %vm249_vm0, %v9498_v6 }
 0x1c3   :  { %v278_v22 = vpop.trf.xlu0 }
 0x1c4   :  { %v297_v24 = vrot.slane %v278_v22, %v9537_v20 }
 0x1c6   :  { %v298_v29 = vadd.f32 %v297_v24, %v252_v12  ;;  %v299_v30 = vadd.f32 %v297_v24, %v255_v13  ;;  %v300_v31 = vadd.f32 %v297_v24, %v258_v14  ;;  %v301_v41 = vadd.f32 %v297_v24, %v261_v15 }
 0x1c8   :  { %v403_v33 = vsub.f32 %v298_v29, %v399_v28  ;;  %v404_v34 = vsub.f32 %v299_v30, %v400_v27  ;;  %v405_v39 = vsub.f32 %v300_v31, %v401_v32  ;;  %v406_v45 = vsub.f32 %v301_v41, %v402_v38 }
 0x1ca   :  { %v419_v36 = vsel %vm415_vm1, 1e+30, %v403_v33  ;;  %v420_v40 = vsel %vm416_vm3, 1e+30, %v404_v34  ;;  %v421_v44 = vsel %vm417_vm4, 1e+30, %v405_v39 }
 0x1cb   :  { %v424_v37 = vsel %vm423_vm2, %v419_v36, inf  ;;  %v427_v43 = vsel %vm423_vm2, %v420_v40, inf  ;;  %v430_v46 = vsel %vm423_vm2, %v421_v44, inf  ;;  %v422_v47 = vsel %vm418_vm5, 1e+30, %v406_v45  ;;  %v9643_v33 = vld [vmem:[%s10953_s21 + $0x38] sm:$0xff] }
 0x1cc   :  { %425 = vmin.xlane.f32.xlu1 %v424_v37  ;;  %v433_v48 = vsel %vm423_vm2, %v422_v47, inf  ;;  %v9648_v34 = vld [vmem:[%s10953_s21 + $0x30] sm:$0xff]  ;;  %8045 = vmatprep.subr.mxu0 %v9643_v33  ;;  %v9662_v37 = vld [vmem:[%s10953_s21 + $0x20] sm:$0xff]  ;;  %v9689_v45 = vld [vmem:[%s10953_s21 + $0x8] sm:$0xff] }
 0x1d0   :  { %428 = vmin.xlane.f32.xlu1 %v427_v43  ;;  %v9675_v43 = vld [vmem:[%s10953_s21 + $0x18] sm:$0xff] }
 0x1d4   :  { %431 = vmin.xlane.f32.xlu1 %v430_v46  ;;  %v9695_v46 = vld [vmem:[%s10953_s21] sm:$0xff] }
 0x1d8   :  { %434 = vmin.xlane.f32.xlu1 %v433_v48 }
 0x255   :  { %v426_v50 = vpop.xlane.xlu1 %425 }
 0x256   :  { %vm436_vm6 = vcmp.le.f32.partialorder %v419_v36, %v426_v50 }
 0x257   :  { %v440_v51 = vsel %vm436_vm6, %v9576_v49, 32.0 }
 0x258   :  { %v444_v52 = vsel %vm423_vm2, %v440_v51, inf }
 0x259   :  { %445 = vmin.xlane.f32.xlu1 %v444_v52  ;;  %v429_v53 = vpop.xlane.xlu1 %428 }
 0x25a   :  { %vm437_vm7 = vcmp.le.f32.partialorder %v420_v40, %v429_v53 }
 0x25b   :  { %v441_v54 = vsel %vm437_vm7, %v9576_v49, 32.0 }
 0x25c   :  { %v447_v55 = vsel %vm423_vm2, %v441_v54, inf }
 0x25d   :  { %448 = vmin.xlane.f32.xlu1 %v447_v55  ;;  %v432_v56 = vpop.xlane.xlu1 %431 }
 0x25e   :  { %vm438_vm8 = vcmp.le.f32.partialorder %v421_v44, %v432_v56 }
 0x25f   :  { %v442_v57 = vsel %vm438_vm8, %v9576_v49, 32.0 }
 0x260   :  { %v450_v58 = vsel %vm423_vm2, %v442_v57, inf }
 0x261   :  { %451 = vmin.xlane.f32.xlu1 %v450_v58  ;;  %v435_v59 = vpop.xlane.xlu1 %434 }
 0x262   :  { %vm439_vm9 = vcmp.le.f32.partialorder %v422_v47, %v435_v59 }
 0x263   :  { %v443_v60 = vsel %vm439_vm9, %v9576_v49, 32.0 }
 0x264   :  { %v453_v61 = vsel %vm423_vm2, %v443_v60, inf }
 0x265   :  { %454 = vmin.xlane.f32.xlu1 %v453_v61  ;;  %v8019_v61 = vpop.f32.mrf.mxu1 }
 0x2e2   :  { %v446_v62 = vpop.xlane.xlu1 %445 }
 0x2e3   :  { %vm456_vm10 = vcmp.eq.f32.partialorder %v9576_v49, %v446_v62  ;;  %v690_v62 = vpop.f32.mrf.mxu1 }
 0x2e4   :  { %v7132_v0 = vsel %vm456_vm10, 1.0, %v9316_v63  ;;  %v9588_v3 = vsel %vm456_vm10, 1e+30, %v419_v36  ;;  %v9655_v36 = vld [vmem:[%s10953_s21 + $0x28] sm:$0xff] }
 0x2e5   :  { %8031 = vmatprep.mubr.msk.f32.mxu0 %vm423_vm2, %v7132_v0  ;;  %v472_v4 = vsel %vm423_vm2, %v9588_v3, inf  ;;  %v8022_v0 = vpop.f32.mrf.mxu1 }
 0x2e6   :  { %473 = vmin.xlane.f32.xlu1 %v472_v4  ;;  %v449_v5 = vpop.xlane.xlu1 %448  ;;  %v7148_v4 = vld [vmem:[#allocation7] ss:$0 sm:$0xff] }
 0x2e7   :  { %vm457_vm11 = vcmp.eq.f32.partialorder %v9576_v49, %v449_v5  ;;  %v9738_v5 = vadd.f32 %v8019_v61, %v7148_v4  ;;  %v9827_v61 = vld [vmem:[#allocation10 + $0x28] sm:$0xff] }
 0x2e8   :  { %v7133_v7 = vsel %vm457_vm11, 1.0, %v9316_v63  ;;  %v9595_v8 = vsel %vm457_vm11, 1e+30, %v420_v40 }
 0x2e9   :  { %8032 = vmatmul.mubr.msk.f32.vlgmr.msra.gmra.mxu0 %vm423_vm2, %v7133_v7  ;;  %v475_v9 = vsel %vm423_vm2, %v9595_v8, inf }
 0x2ea   :  { %476 = vmin.xlane.f32.xlu1 %v475_v9  ;;  %v452_v10 = vpop.xlane.xlu1 %451  ;;  %8046 = vmatpush3.msra.mxu0 %v9643_v33 }
 0x2eb   :  { %vm458_vm12 = vcmp.eq.f32.partialorder %v9576_v49, %v452_v10  ;;  %8047 = vmatprep.subr.mxu0 %v9648_v34 }
 0x2ec   :  { %v7134_v11 = vsel %vm458_vm12, 1.0, %v9316_v63  ;;  %v9602_v12 = vsel %vm458_vm12, 1e+30, %v421_v44  ;;  %8048 = vmatpush3.msra.mxu0 %v9648_v34  ;;  %v9682_v44 = vld [vmem:[%s10953_s21 + $0x10] sm:$0xff] }
 0x2ed   :  { %8034 = vmatprep.mubr.msk.f32.mxu0 %vm423_vm2, %v7134_v11  ;;  %v478_v13 = vsel %vm423_vm2, %v9602_v12, inf  ;;  %8049 = vmatprep.subr.mxu0 %v9655_v36 }
 0x2ee   :  { %479 = vmin.xlane.f32.xlu1 %v478_v13  ;;  %v455_v14 = vpop.xlane.xlu1 %454  ;;  %8050 = vmatpush3.msra.mxu0 %v9655_v36 }
 0x2ef   :  { %vm459_vm13 = vcmp.eq.f32.partialorder %v9576_v49, %v455_v14  ;;  %8051 = vmatprep.subr.mxu0 %v9662_v37  ;;  %v9745_v14 = vadd.f32 %v8022_v0, %v7148_v4  ;;  %v9837_v0 = vld [vmem:[#allocation10 + $0x18] sm:$0xff] }
 0x2f0   :  { %v7135_v15 = vsel %vm459_vm13, 1.0, %v9316_v63  ;;  %v9609_v16 = vsel %vm459_vm13, 1e+30, %v422_v47  ;;  %8052 = vmatpush3.msra.mxu0 %v9662_v37  ;;  %v9703_v47 = vld [vmem:[%s10952_s7 + $0x18] sm:$0xff]  ;;  %vm930_vm13 = vcmask 523264  }
 0x2f1   :  { %8035 = vmatmul.mubr.msk.f32.gmra.mxu0 %vm423_vm2, %v7135_v15  ;;  %v481_v17 = vsel %vm423_vm2, %v9609_v16, inf  ;;  %8053 = vmatprep.subr.mxu0 %v9675_v43 }
 0x2f2   :  { %482 = vmin.xlane.f32.xlu1 %v481_v17  ;;  %8054 = vmatpush3.msra.mxu0 %v9675_v43 }
 0x2f3   :  { %8055 = vmatprep.subr.mxu0 %v9682_v44 }
 0x2f4   :  { %8056 = vmatpush3.msra.mxu0 %v9682_v44 }
 0x2f5   :  { %8057 = vmatprep.subr.mxu0 %v9689_v45 }
 0x2f6   :  { %8058 = vmatpush3.msra.mxu0 %v9689_v45 }
 0x2f7   :  { %8059 = vmatprep.subr.mxu0 %v9695_v46 }
 0x2f8   :  { %8060 = vmatpush3.msra.mxu0 %v9695_v46 }
 0x2f9   :  { %8089 = vmatprep.subr.mxu0 %v9703_v47 }
 0x36f   :  { %v474_v22 = vpop.xlane.xlu1 %473 }
 0x370   :  { %vm484_vm15 = vcmp.le.f32.partialorder %v9588_v3, %v474_v22  ;;  %v9755_v22 = vld [vmem:[%s10952_s7 + $0x10] sm:$0xff] }
 0x371   :  { %v488_v24 = vsel %vm484_vm15, %v9576_v49, 32.0 }
 0x372   :  { %v492_v25 = vsel %vm423_vm2, %v488_v24, inf }
 0x373   :  { %493 = vmin.xlane.f32.xlu1 %v492_v25  ;;  %v477_v1 = vpop.xlane.xlu1 %476  ;;  %v9763_v25 = vld [vmem:[%s10952_s7 + $0x8] sm:$0xff] }
 0x374   :  { %vm485_vm6 = vcmp.le.f32.partialorder %v9595_v8, %v477_v1 }
 0x375   :  { %v489_v27 = vsel %vm485_vm6, %v9576_v49, 32.0 }
 0x376   :  { %v495_v2 = vsel %vm423_vm2, %v489_v27, inf }
 0x377   :  { %496 = vmin.xlane.f32.xlu1 %v495_v2  ;;  %v480_v28 = vpop.xlane.xlu1 %479  ;;  %v9770_v2 = vld [vmem:[%s10952_s7] sm:$0xff] }
 0x378   :  { %vm486_vm7 = vcmp.le.f32.partialorder %v9602_v12, %v480_v28 }
 0x379   :  { %v490_v6 = vsel %vm486_vm7, %v9576_v49, 32.0 }
 0x37a   :  { %v498_v29 = vsel %vm423_vm2, %v490_v6, inf }
 0x37b   :  { %499 = vmin.xlane.f32.xlu1 %v498_v29  ;;  %v483_v30 = vpop.xlane.xlu1 %482 }
 0x37c   :  { %vm487_vm8 = vcmp.le.f32.partialorder %v9609_v16, %v483_v30 }
 0x37d   :  { %v491_v31 = vsel %vm487_vm8, %v9576_v49, 32.0 }
 0x37e   :  { %v501_v32 = vsel %vm423_vm2, %v491_v31, inf }
 0x37f   :  { %502 = vmin.xlane.f32.xlu0 %v501_v32 }
 0x3a9   :  { %v8033_v38 = vpop.f32.mrf.mxu0 }
 0x3ab   :  { %v787_v39 = vpop.f32.mrf.mxu0 }
 0x3ac   :  { %8039 = vmatprep.mubr.msk.f32.mxu1 %vm249_vm0, %v787_v39 }
 0x3ad   :  { %8040 = vmatmul.mubr.msk.f32.vlgmr.msra.gmra.mxu1 %vm249_vm0, %v8033_v38 }
 0x3b1   :  { %v8036_v40 = vpop.f32.mrf.mxu0 }
 0x3b3   :  { %v797_v41 = vpop.f32.mrf.mxu0 }
 0x3b4   :  { %8042 = vmatprep.mubr.msk.f32.mxu1 %vm249_vm0, %v797_v41 }
 0x3b5   :  { %8043 = vmatmul.mubr.msk.f32.gmra.mxu1 %vm249_vm0, %v8036_v40 }
 0x3fc   :  { %v494_v48 = vpop.xlane.xlu1 %493 }
 0x3fd   :  { %vm504_vm9 = vcmp.eq.f32.partialorder %v9576_v49, %v494_v48 }
 0x3fe   :  { %v9710_v50 = vsel %vm504_vm9, 1e+30, %v9588_v3  ;;  %v700_v3 = vpop.f32.mrf.mxu1  ;;  %v7136_v28 = vsel %vm504_vm9, 1.0, %v9316_v63 }
 0x3ff   :  { %v520_v51 = vsel %vm423_vm2, %v9710_v50, inf }
 0x400   :  { %521 = vmin.xlane.f32.xlu1 %v520_v51  ;;  %v497_v52 = vpop.xlane.xlu1 %496 }
 0x401   :  { %vm505_vm10 = vcmp.eq.f32.partialorder %v9576_v49, %v497_v52 }
 0x402   :  { %v9718_v53 = vsel %vm505_vm10, 1e+30, %v9595_v8  ;;  %v9740_v8 = vadd.f32 %v7148_v4, %v690_v62  ;;  %v7137_v6 = vsel %vm505_vm10, 1.0, %v9316_v63  ;;  %v9831_v62 = vld [vmem:[#allocation10 + $0x20] sm:$0xff] }
 0x403   :  { %v523_v54 = vsel %vm423_vm2, %v9718_v53, inf }
 0x404   :  { %524 = vmin.xlane.f32.xlu1 %v523_v54  ;;  %v500_v55 = vpop.xlane.xlu1 %499 }
 0x405   :  { %vm506_vm11 = vcmp.eq.f32.partialorder %v9576_v49, %v500_v55 }
 0x406   :  { %v9726_v56 = vsel %vm506_vm11, 1e+30, %v9602_v12  ;;  %v7138_v29 = vsel %vm506_vm11, 1.0, %v9316_v63 }
 0x407   :  { %v526_v57 = vsel %vm423_vm2, %v9726_v56, inf }
 0x408   :  { %v503_v58 = vpop.xlane.xlu0 %502  ;;  %527 = vmin.xlane.f32.xlu1 %v526_v57 }
 0x409   :  { %vm507_vm12 = vcmp.eq.f32.partialorder %v9576_v49, %v503_v58  ;;  %v9821_v58 = vld [vmem:[#allocation10 + $0x38] sm:$0xff] }
 0x40a   :  { %v9734_v59 = vsel %vm507_vm12, 1e+30, %v9609_v16  ;;  %v9748_v16 = vadd.f32 %v7148_v4, %v700_v3  ;;  %v7139_v30 = vsel %vm507_vm12, 1.0, %v9316_v63  ;;  %8067 = vmatprep.subr.mxu1 %v9821_v58  ;;  %v9841_v3 = vld [vmem:[#allocation10 + $0x10] sm:$0xff]  ;;  %v9845_v4 = vld [vmem:[#allocation10 + $0x8] sm:$0xff] }
 0x40b   :  { %v529_v60 = vsel %vm423_vm2, %v9734_v59, inf  ;;  %8068 = vmatpush3.msra.mxu1 %v9821_v58 }
 0x40c   :  { %530 = vmin.xlane.f32.xlu1 %v529_v60  ;;  %v9823_v60 = vld [vmem:[#allocation10 + $0x30] sm:$0xff] }
 0x40d   :  { %8069 = vmatprep.subr.mxu1 %v9823_v60 }
 0x40e   :  { %8070 = vmatpush3.msra.mxu1 %v9823_v60 }
 0x40f   :  { %8071 = vmatprep.subr.mxu1 %v9827_v61 }
 0x410   :  { %8072 = vmatpush3.msra.mxu1 %v9827_v61 }
 0x411   :  { %8073 = vmatprep.subr.mxu1 %v9831_v62 }
 0x412   :  { %8074 = vmatpush3.msra.mxu1 %v9831_v62 }
 0x413   :  { %8075 = vmatprep.subr.mxu1 %v9837_v0 }
 0x414   :  { %8076 = vmatpush3.msra.mxu1 %v9837_v0 }
 0x415   :  { %8077 = vmatprep.subr.mxu1 %v9841_v3 }
 0x416   :  { %8078 = vmatpush3.msra.mxu1 %v9841_v3 }
 0x417   :  { %8079 = vmatprep.subr.mxu1 %v9845_v4 }
 0x418   :  { %8080 = vmatpush3.msra.mxu1 %v9845_v4 }
 0x46d   :  { %v8041_v7 = vpop.f32.mrf.mxu1 }
 0x46e   :  { %v908_v9 = vadd.f32 %v8041_v7, %v9738_v5  ;;  %v9848_v7 = vld [vmem:[#allocation10] sm:$0xff] }
 0x46f   :  { %v888_v10 = vpop.f32.mrf.mxu1  ;;  %8081 = vmatprep.subr.mxu1 %v9848_v7 }
 0x470   :  { %v907_v11 = vadd.f32 %v888_v10, %v9740_v8  ;;  %v912_v13 = vmax.f32 %v908_v9, 0.0  ;;  %8082 = vmatpush3.msra.mxu1 %v9848_v7 }
 0x471   :  { %8103 = vmatprep.subr.msk.mxu1 %vm620_vm14, %v9614_v21 }
 0x472   :  { %v911_v12 = vmax.f32 %v907_v11, 0.0 }
 0x474   :  { %8061 = vmatprep.mubr.msk.f32.mxu0 %vm930_vm13, %v911_v12 }
 0x475   :  { %v8044_v15 = vpop.f32.mrf.mxu1  ;;  %8062 = vmatmul.mubr.msk.f32.vlgmr.msra.gmra.mxu0 %vm930_vm13, %v912_v13 }
 0x476   :  { %8090 = vmatpush3.msra.mxu0 %v9703_v47  ;;  %v910_v17 = vadd.f32 %v8044_v15, %v9745_v14 }
 0x477   :  { %v898_v19 = vpop.f32.mrf.mxu1  ;;  %8091 = vmatprep.subr.mxu0 %v9755_v22 }
 0x478   :  { %v909_v24 = vadd.f32 %v898_v19, %v9748_v16  ;;  %8092 = vmatpush3.msra.mxu0 %v9755_v22  ;;  %v914_v27 = vmax.f32 %v910_v17, 0.0 }
 0x479   :  { %8093 = vmatprep.subr.mxu0 %v9763_v25 }
 0x47a   :  { %v913_v1 = vmax.f32 %v909_v24, 0.0  ;;  %8094 = vmatpush3.msra.mxu0 %v9763_v25 }
 0x47b   :  { %8095 = vmatprep.subr.mxu0 %v9770_v2 }
 0x47c   :  { %8064 = vmatprep.mubr.msk.f32.mxu0 %vm930_vm13, %v913_v1  ;;  %8096 = vmatpush3.msra.mxu0 %v9770_v2 }
 0x47d   :  { %8065 = vmatmul.mubr.msk.f32.gmra.mxu0 %vm930_vm13, %v914_v27  ;;  %8111 = vmatprep.subr.mxu0 %v9643_v33 }
 0x47e   :  { %8097 = vmatprep.mubr.msk.f32.mxu0 %vm423_vm2, %v7136_v28 }
 0x481   :  { %8098 = vmatmul.mubr.msk.f32.vlgmr.msra.gmra.mxu0 %vm423_vm2, %v7137_v6 }
 0x482   :  { %8100 = vmatprep.mubr.msk.f32.mxu0 %vm423_vm2, %v7138_v29  ;;  %8112 = vmatpush3.msra.mxu0 %v9643_v33 }
 0x483   :  { %8113 = vmatprep.subr.mxu0 %v9648_v34 }
 0x484   :  { %8114 = vmatpush3.msra.mxu0 %v9648_v34 }
 0x485   :  { %8101 = vmatmul.mubr.msk.f32.gmra.mxu0 %vm423_vm2, %v7139_v30  ;;  %8115 = vmatprep.subr.mxu0 %v9655_v36 }
 0x486   :  { %8116 = vmatpush3.msra.mxu0 %v9655_v36 }
 0x487   :  { %8117 = vmatprep.subr.mxu0 %v9662_v37 }
 0x488   :  { %8118 = vmatpush3.msra.mxu0 %v9662_v37 }
 0x489   :  { %v522_v31 = vpop.xlane.xlu1 %521  ;;  %8119 = vmatprep.subr.mxu0 %v9675_v43 }
 0x48a   :  { %vm532_vm15 = vcmp.le.f32.partialorder %v9710_v50, %v522_v31  ;;  %8120 = vmatpush3.msra.mxu0 %v9675_v43 }
 0x48b   :  { %v536_v32 = vsel %vm532_vm15, %v9576_v49, 32.0  ;;  %8121 = vmatprep.subr.mxu0 %v9682_v44 }
 0x48c   :  { %v540_v38 = vsel %vm423_vm2, %v536_v32, inf  ;;  %8122 = vmatpush3.msra.mxu0 %v9682_v44 }
 0x48d   :  { %541 = vmin.xlane.f32.xlu1 %v540_v38  ;;  %v525_v39 = vpop.xlane.xlu1 %524  ;;  %8123 = vmatprep.subr.mxu0 %v9689_v45 }
 0x48e   :  { %vm533_vm6 = vcmp.le.f32.partialorder %v9718_v53, %v525_v39  ;;  %8124 = vmatpush3.msra.mxu0 %v9689_v45 }
 0x48f   :  { %v537_v40 = vsel %vm533_vm6, %v9576_v49, 32.0  ;;  %8125 = vmatprep.subr.mxu0 %v9695_v46 }
 0x490   :  { %v543_v41 = vsel %vm423_vm2, %v537_v40, inf  ;;  %8126 = vmatpush3.msra.mxu0 %v9695_v46 }
 0x491   :  { %544 = vmin.xlane.f32.xlu1 %v543_v41  ;;  %v528_v48 = vpop.xlane.xlu1 %527  ;;  %8155 = vmatprep.subr.mxu0 %v9703_v47 }
 0x492   :  { %vm534_vm7 = vcmp.le.f32.partialorder %v9726_v56, %v528_v48 }
 0x493   :  { %v538_v51 = vsel %vm534_vm7, %v9576_v49, 32.0 }
 0x494   :  { %v546_v52 = vsel %vm423_vm2, %v538_v51, inf }
 0x495   :  { %547 = vmin.xlane.f32.xlu1 %v546_v52  ;;  %v531_v54 = vpop.xlane.xlu1 %530 }
 0x496   :  { %vm535_vm8 = vcmp.le.f32.partialorder %v9734_v59, %v531_v54 }
 0x497   :  { %v539_v55 = vsel %vm535_vm8, %v9576_v49, 32.0 }
 0x498   :  { %v549_v57 = vsel %vm423_vm2, %v539_v55, inf }
 0x499   :  { %550 = vmin.xlane.f32.xlu1 %v549_v57 }
 0x516   :  { %v9855_v9 = vpop.xlane.xlu1 %541 }
 0x517   :  { %vm552_vm9 = vcmp.eq.f32.partialorder %v9576_v49, %v9855_v9 }
 0x518   :  { %v9863_v10 = vsel %vm552_vm9, 1e+30, %v9710_v50 }
 0x519   :  { %v568_v11 = vsel %vm423_vm2, %v9863_v10, inf }
 0x51a   :  { %569 = vmin.xlane.f32.xlu1 %v568_v11  ;;  %v9867_v12 = vpop.xlane.xlu1 %544 }
 0x51b   :  { %vm553_vm10 = vcmp.eq.f32.partialorder %v9576_v49, %v9867_v12 }
 0x51c   :  { %v9875_v13 = vsel %vm553_vm10, 1e+30, %v9718_v53 }
 0x51d   :  { %v571_v15 = vsel %vm423_vm2, %v9875_v13, inf }
 0x51e   :  { %572 = vmin.xlane.f32.xlu1 %v571_v15  ;;  %v9879_v50 = vpop.xlane.xlu1 %547 }
 0x51f   :  { %vm554_vm11 = vcmp.eq.f32.partialorder %v9576_v49, %v9879_v50 }
 0x520   :  { %v9887_v17 = vsel %vm554_vm11, 1e+30, %v9726_v56  ;;  %v9903_v56 = vld [vmem:[#allocation8] ss:$0 sm:$0xff]  ;;  %v7142_v9 = vsel %vm554_vm11, 1.0, %v9316_v63 }
 0x521   :  { %v574_v19 = vsel %vm423_vm2, %v9887_v17, inf }
 0x522   :  { %575 = vmin.xlane.f32.xlu1 %v574_v19  ;;  %v9891_v53 = vpop.xlane.xlu1 %550 }
 0x523   :  { %vm555_vm12 = vcmp.eq.f32.partialorder %v9576_v49, %v9891_v53 }
 0x524   :  { %v9899_v24 = vsel %vm555_vm12, 1e+30, %v9734_v59  ;;  %v7143_v12 = vsel %vm555_vm12, 1.0, %v9316_v63 }
 0x525   :  { %v577_v1 = vsel %vm423_vm2, %v9899_v24, inf }
 0x526   :  { %578 = vmin.xlane.f32.xlu0 %v577_v1 }
 0x535   :  { %v8063_v27 = vpop.f32.mrf.mxu0 }
 0x536   :  { %v1015_v28 = vadd.f32 %v8063_v27, %v9903_v56 }
 0x537   :  { %v1009_v6 = vpop.f32.mrf.mxu0 }
 0x538   :  { %v1010_v29 = vadd.f32 %v9903_v56, %v1009_v6  ;;  %v1029_v31 = vmax.f32 %v1015_v28, 0.0 }
 0x53a   :  { %v1028_v30 = vmax.f32 %v1010_v29, 0.0 }
 0x53c   :  { %8083 = vmatprep.mubr.msk.f32.mxu1 %vm930_vm13, %v1028_v30 }
 0x53d   :  { %v8066_v32 = vpop.f32.mrf.mxu0  ;;  %8084 = vmatmul.mubr.msk.f32.vlgmr.msra.gmra.mxu1 %vm930_vm13, %v1029_v31 }
 0x53e   :  { %8104 = vmatpush3.msk.msra.mxu1 %vm620_vm14, %v9614_v21  ;;  %v1025_v59 = vadd.f32 %v8066_v32, %v9903_v56 }
 0x53f   :  { %v1019_v38 = vpop.f32.mrf.mxu0  ;;  %8133 = vmatprep.subr.mxu1 %v9821_v58 }
 0x540   :  { %v1020_v39 = vadd.f32 %v9903_v56, %v1019_v38  ;;  %v1031_v48 = vmax.f32 %v1025_v59, 0.0 }
 0x541   :  { %v8099_v40 = vpop.f32.mrf.mxu0 }
 0x542   :  { %v1030_v41 = vmax.f32 %v1020_v39, 0.0 }
 0x543   :  { %v1222_v51 = vpop.f32.mrf.mxu0 }
 0x544   :  { %8086 = vmatprep.mubr.msk.f32.mxu1 %vm930_vm13, %v1030_v41 }
 0x545   :  { %8087 = vmatmul.mubr.msk.f32.gmra.mxu1 %vm930_vm13, %v1031_v48  ;;  %v8102_v52 = vpop.f32.mrf.mxu0 }
 0x546   :  { %8105 = vmatprep.mubr.msk.f32.mxu1 %vm249_vm0, %v1222_v51 }
 0x547   :  { %v1232_v54 = vpop.f32.mrf.mxu0 }
 0x549   :  { %8106 = vmatmul.mubr.msk.f32.vlgmr.msra.gmra.mxu1 %vm249_vm0, %v8099_v40 }
 0x54a   :  { %8108 = vmatprep.mubr.msk.f32.mxu1 %vm249_vm0, %v1232_v54  ;;  %8134 = vmatpush3.msra.mxu1 %v9821_v58 }
 0x54b   :  { %8135 = vmatprep.subr.mxu1 %v9823_v60 }
 0x54c   :  { %8136 = vmatpush3.msra.mxu1 %v9823_v60 }
 0x54d   :  { %8109 = vmatmul.mubr.msk.f32.gmra.mxu1 %vm249_vm0, %v8102_v52  ;;  %8137 = vmatprep.subr.mxu1 %v9827_v61 }
 0x54e   :  { %8138 = vmatpush3.msra.mxu1 %v9827_v61 }
 0x54f   :  { %8139 = vmatprep.subr.mxu1 %v9831_v62 }
 0x550   :  { %8140 = vmatpush3.msra.mxu1 %v9831_v62 }
 0x551   :  { %8141 = vmatprep.subr.mxu1 %v9837_v0 }
 0x552   :  { %8142 = vmatpush3.msra.mxu1 %v9837_v0 }
 0x553   :  { %8143 = vmatprep.subr.mxu1 %v9841_v3 }
 0x554   :  { %8144 = vmatpush3.msra.mxu1 %v9841_v3 }
 0x555   :  { %8145 = vmatprep.subr.mxu1 %v9845_v4 }
 0x556   :  { %8146 = vmatpush3.msra.mxu1 %v9845_v4 }
 0x557   :  { %8147 = vmatprep.subr.mxu1 %v9848_v7 }
 0x558   :  { %8148 = vmatpush3.msra.mxu1 %v9848_v7 }
 0x559   :  { %8169 = vmatprep.subr.msk.mxu1 %vm620_vm14, %v9614_v21 }
 0x5a3   :  { %v570_v55 = vpop.xlane.xlu1 %569 }
 0x5a4   :  { %vm580_vm15 = vcmp.le.f32.partialorder %v9863_v10, %v570_v55 }
 0x5a5   :  { %v584_v57 = vsel %vm580_vm15, %v9576_v49, 32.0 }
 0x5a6   :  { %v588_v11 = vsel %vm423_vm2, %v584_v57, inf }
 0x5a7   :  { %589 = vmin.xlane.f32.xlu1 %v588_v11  ;;  %v573_v15 = vpop.xlane.xlu1 %572  ;;  %v7140_v11 = vsel %vm552_vm9, 1.0, %v9316_v63 }
 0x5a8   :  { %vm581_vm6 = vcmp.le.f32.partialorder %v9875_v13, %v573_v15  ;;  %v7141_v15 = vsel %vm553_vm10, 1.0, %v9316_v63 }
 0x5a9   :  { %v585_v19 = vsel %vm581_vm6, %v9576_v49, 32.0 }
 0x5aa   :  { %v591_v1 = vsel %vm423_vm2, %v585_v19, inf }
 0x5ab   :  { %592 = vmin.xlane.f32.xlu0 %v591_v1  ;;  %v576_v27 = vpop.xlane.xlu1 %575 }
 0x5ac   :  { %vm582_vm7 = vcmp.le.f32.partialorder %v9887_v17, %v576_v27 }
 0x5ad   :  { %v586_v28 = vsel %vm582_vm7, %v9576_v49, 32.0 }
 0x5ae   :  { %v594_v10 = vsel %vm423_vm2, %v586_v28, inf }
 0x5af   :  { %v579_v6 = vpop.xlane.xlu0 %578  ;;  %595 = vmin.xlane.f32.xlu1 %v594_v10 }
 0x5b0   :  { %vm583_vm8 = vcmp.le.f32.partialorder %v9899_v24, %v579_v6 }
 0x5b1   :  { %v587_v29 = vsel %vm583_vm8, %v9576_v49, 32.0 }
 0x5b2   :  { %v597_v13 = vsel %vm423_vm2, %v587_v29, inf }
 0x5b3   :  { %598 = vmin.xlane.f32.xlu0 %v597_v13 }
 0x5fd   :  { %v9949_v30 = vpop.f32.mrf.mxu1 }
 0x5ff   :  { %v9951_v31 = vpop.f32.mrf.mxu1 }
 0x605   :  { %v9953_v32 = vpop.f32.mrf.mxu1 }
 0x607   :  { %v9955_v17 = vpop.f32.mrf.mxu1 }
 0x609   :  { %v8107_v59 = vpop.f32.mrf.mxu1 }
 0x60a   :  { %v1339_v38 = vadd.f32 %v8107_v59, %v9738_v5 }
 0x60b   :  { %v1319_v39 = vpop.f32.mrf.mxu1 }
 0x60c   :  { %v1338_v40 = vadd.f32 %v1319_v39, %v9740_v8  ;;  %v1343_v48 = vmax.f32 %v1339_v38, 0.0 }
 0x60d   :  { %v8110_v24 = vpop.f32.mrf.mxu1 }
 0x60e   :  { %v1342_v41 = vmax.f32 %v1338_v40, 0.0  ;;  %v1341_v51 = vadd.f32 %v8110_v24, %v9745_v14 }
 0x60f   :  { %v1329_v52 = vpop.f32.mrf.mxu1 }
 0x610   :  { %v1340_v54 = vadd.f32 %v1329_v52, %v9748_v16  ;;  %8127 = vmatprep.mubr.msk.f32.mxu0 %vm930_vm13, %v1342_v41  ;;  %v1345_v57 = vmax.f32 %v1341_v51, 0.0 }
 0x611   :  { %8128 = vmatmul.mubr.msk.f32.vlgmr.msra.gmra.mxu0 %vm930_vm13, %v1343_v48  ;;  %v10041_v48 = vld [vmem:[#allocation11] ss:$0 sm:$0xff] }
 0x612   :  { %v1344_v55 = vmax.f32 %v1340_v54, 0.0  ;;  %8156 = vmatpush3.msra.mxu0 %v9703_v47  ;;  %v10045_v52 = vadd.f32 %v9949_v30, %v10041_v48 }
 0x613   :  { %8157 = vmatprep.subr.mxu0 %v9755_v22 }
 0x614   :  { %8130 = vmatprep.mubr.msk.f32.mxu0 %vm930_vm13, %v1344_v55  ;;  %8158 = vmatpush3.msra.mxu0 %v9755_v22 }
 0x615   :  { %8131 = vmatmul.mubr.msk.f32.gmra.mxu0 %vm930_vm13, %v1345_v57  ;;  %8159 = vmatprep.subr.mxu0 %v9763_v25  ;;  %v10052_v57 = vadd.f32 %v10041_v48, %v9951_v31  ;;  %v10070_v31 = vadd.f32 %v10041_v48, %v9955_v17 }
 0x616   :  { %8160 = vmatpush3.msra.mxu0 %v9763_v25  ;;  %8163 = vmatprep.mubr.msk.f32.mxu0 %vm423_vm2, %v7140_v11 }
 0x617   :  { %8161 = vmatprep.subr.mxu0 %v9770_v2 }
 0x618   :  { %8162 = vmatpush3.msra.mxu0 %v9770_v2 }
 0x619   :  { %8164 = vmatmul.mubr.msk.f32.vlgmr.msra.gmra.mxu0 %vm423_vm2, %v7141_v15  ;;  %8177 = vmatprep.subr.mxu0 %v9643_v33 }
 0x61a   :  { %8166 = vmatprep.mubr.msk.f32.mxu0 %vm423_vm2, %v7142_v9  ;;  %8178 = vmatpush3.msra.mxu0 %v9643_v33 }
 0x61b   :  { %8179 = vmatprep.subr.mxu0 %v9648_v34 }
 0x61c   :  { %8180 = vmatpush3.msra.mxu0 %v9648_v34 }
 0x61d   :  { %8167 = vmatmul.mubr.msk.f32.gmra.mxu0 %vm423_vm2, %v7143_v12  ;;  %8181 = vmatprep.subr.mxu0 %v9655_v36  ;;  %v10061_v12 = vadd.f32 %v9953_v32, %v10041_v48 }
 0x61e   :  { %8182 = vmatpush3.msra.mxu0 %v9655_v36 }
 0x61f   :  { %8183 = vmatprep.subr.mxu0 %v9662_v37 }
 0x620   :  { %8184 = vmatpush3.msra.mxu0 %v9662_v37 }
 0x621   :  { %8185 = vmatprep.subr.mxu0 %v9675_v43 }
 0x622   :  { %8186 = vmatpush3.msra.mxu0 %v9675_v43 }
 0x623   :  { %8187 = vmatprep.subr.mxu0 %v9682_v44 }
 0x624   :  { %8188 = vmatpush3.msra.mxu0 %v9682_v44 }
 0x625   :  { %8189 = vmatprep.subr.mxu0 %v9689_v45 }
 0x626   :  { %8190 = vmatpush3.msra.mxu0 %v9689_v45 }
 0x627   :  { %8191 = vmatprep.subr.mxu0 %v9695_v46 }
 0x628   :  { %8192 = vmatpush3.msra.mxu0 %v9695_v46 }
 0x629   :  { %8221 = vmatprep.subr.mxu0 %v9703_v47 }
 0x6d1   :  { %v8129_v50 = vpop.f32.mrf.mxu0 }
 0x6d2   :  { %v1430_v53 = vadd.f32 %v8129_v50, %v9903_v56 }
 0x6d3   :  { %v1424_v19 = vpop.f32.mrf.mxu0 }
 0x6d4   :  { %v1425_v1 = vadd.f32 %v9903_v56, %v1424_v19  ;;  %v1444_v10 = vmax.f32 %v1430_v53, 0.0 }
 0x6d5   :  { %v8132_v27 = vpop.f32.mrf.mxu0 }
 0x6d6   :  { %v1443_v28 = vmax.f32 %v1425_v1, 0.0  ;;  %v1440_v6 = vadd.f32 %v8132_v27, %v9903_v56 }
 0x6d7   :  { %v1434_v29 = vpop.f32.mrf.mxu0 }
 0x6d8   :  { %v1435_v13 = vadd.f32 %v9903_v56, %v1434_v29  ;;  %8149 = vmatprep.mubr.msk.f32.mxu1 %vm930_vm13, %v1443_v28  ;;  %v1446_v39 = vmax.f32 %v1440_v6, 0.0 }
 0x6d9   :  { %8150 = vmatmul.mubr.msk.f32.vlgmr.msra.gmra.mxu1 %vm930_vm13, %v1444_v10  ;;  %v8165_v59 = vpop.f32.mrf.mxu0 }
 0x6da   :  { %v1445_v38 = vmax.f32 %v1435_v13, 0.0  ;;  %8170 = vmatpush3.msk.msra.mxu1 %vm620_vm14, %v9614_v21 }
 0x6db   :  { %v1626_v40 = vpop.f32.mrf.mxu0  ;;  %8199 = vmatprep.subr.mxu1 %v9821_v58 }
 0x6dc   :  { %8152 = vmatprep.mubr.msk.f32.mxu1 %vm930_vm13, %v1445_v38 }
 0x6dd   :  { %8153 = vmatmul.mubr.msk.f32.gmra.mxu1 %vm930_vm13, %v1446_v39  ;;  %v8168_v24 = vpop.f32.mrf.mxu0 }
 0x6de   :  { %8171 = vmatprep.mubr.msk.f32.mxu1 %vm249_vm0, %v1626_v40 }
 0x6df   :  { %v1636_v41 = vpop.f32.mrf.mxu0 }
 0x6e1   :  { %8172 = vmatmul.mubr.msk.f32.vlgmr.msra.gmra.mxu1 %vm249_vm0, %v8165_v59  ;;  %v590_v59 = vpop.xlane.xlu1 %589 }
 0x6e2   :  { %8174 = vmatprep.mubr.msk.f32.mxu1 %vm249_vm0, %v1636_v41  ;;  %8200 = vmatpush3.msra.mxu1 %v9821_v58  ;;  %vm600_vm9 = vcmp.eq.f32.partialorder %v9576_v49, %v590_v59 }
 0x6e3   :  { %8201 = vmatprep.subr.mxu1 %v9823_v60 }
 0x6e4   :  { %8202 = vmatpush3.msra.mxu1 %v9823_v60 }
 0x6e5   :  { %8175 = vmatmul.mubr.msk.f32.gmra.mxu1 %vm249_vm0, %v8168_v24  ;;  %8203 = vmatprep.subr.mxu1 %v9827_v61  ;;  %v593_v24 = vpop.xlane.xlu0 %592 }
 0x6e6   :  { %8204 = vmatpush3.msra.mxu1 %v9827_v61  ;;  %vm601_vm10 = vcmp.eq.f32.partialorder %v9576_v49, %v593_v24 }
 0x6e7   :  { %8205 = vmatprep.subr.mxu1 %v9831_v62 }
 0x6e8   :  { %8206 = vmatpush3.msra.mxu1 %v9831_v62 }
 0x6e9   :  { %8207 = vmatprep.subr.mxu1 %v9837_v0 }
 0x6ea   :  { %8208 = vmatpush3.msra.mxu1 %v9837_v0 }
 0x6eb   :  { %8209 = vmatprep.subr.mxu1 %v9841_v3 }
 0x6ec   :  { %8210 = vmatpush3.msra.mxu1 %v9841_v3 }
 0x6ed   :  { %8211 = vmatprep.subr.mxu1 %v9845_v4 }
 0x6ee   :  { %8212 = vmatpush3.msra.mxu1 %v9845_v4 }
 0x6ef   :  { %8213 = vmatprep.subr.mxu1 %v9848_v7 }
 0x6f0   :  { %8214 = vmatpush3.msra.mxu1 %v9848_v7 }
 0x6f1   :  { %8235 = vmatprep.subr.msk.mxu1 %vm620_vm14, %v9614_v21 }
 0x799   :  { %v8151_v51 = vpop.f32.mrf.mxu1 }
 0x79a   :  { %v10048_v54 = vadd.f32 %v8151_v51, %v10041_v48  ;;  %v596_v51 = vpop.xlane.xlu1 %595 }
 0x79b   :  { %v1525_v55 = vpop.f32.mrf.mxu1  ;;  %vm602_vm11 = vcmp.eq.f32.partialorder %v9576_v49, %v596_v51 }
 0x79c   :  { %v1545_v11 = vmax.f32 %v10045_v52, %v10048_v54  ;;  %v10057_v15 = vadd.f32 %v10041_v48, %v1525_v55 }
 0x79d   :  { %v8154_v9 = vpop.f32.mrf.mxu1 }
 0x79e   :  { %v1544_v30 = vmax.f32 %v10052_v57, %v10057_v15  ;;  %v10066_v50 = vadd.f32 %v8154_v9, %v10041_v48  ;;  %v7144_v9 = vsel %vm600_vm9, 1.0, %v9316_v63 }
 0x79f   :  { %v1535_v53 = vpop.f32.mrf.mxu1 }
 0x7a0   :  { %v1547_v19 = vmax.f32 %v10061_v12, %v10066_v50  ;;  %v10075_v1 = vadd.f32 %v10041_v48, %v1535_v53  ;;  %v599_v53 = vpop.xlane.xlu0 %598 }
 0x7a1   :  { %v8173_v27 = vpop.f32.mrf.mxu1  ;;  %vm603_vm12 = vcmp.eq.f32.partialorder %v9576_v49, %v599_v53 }
 0x7a2   :  { %v1546_v32 = vmax.f32 %v10070_v31, %v10075_v1  ;;  %v1743_v28 = vadd.f32 %v8173_v27, %v9738_v5 }
 0x7a3   :  { %v1723_v10 = vpop.f32.mrf.mxu1 }
 0x7a4   :  { %v1742_v6 = vadd.f32 %v1723_v10, %v9740_v8  ;;  %v1747_v17 = vmax.f32 %v1743_v28, 0.0 }
 0x7a5   :  { %v8176_v29 = vpop.f32.mrf.mxu1 }
 0x7a6   :  { %v1746_v13 = vmax.f32 %v1742_v6, 0.0  ;;  %v1745_v38 = vadd.f32 %v8176_v29, %v9745_v14 }
 0x7a7   :  { %v1733_v39 = vpop.f32.mrf.mxu1 }
 0x7a8   :  { %v1744_v40 = vadd.f32 %v1733_v39, %v9748_v16  ;;  %8193 = vmatprep.mubr.msk.f32.mxu0 %vm930_vm13, %v1746_v13  ;;  %v1749_v55 = vmax.f32 %v1745_v38, 0.0 }
 0x7a9   :  { %8194 = vmatmul.mubr.msk.f32.vlgmr.msra.gmra.mxu0 %vm930_vm13, %v1747_v17 }
 0x7aa   :  { %v1748_v41 = vmax.f32 %v1744_v40, 0.0  ;;  %8222 = vmatpush3.msra.mxu0 %v9703_v47  ;;  %v7145_v47 = vsel %vm601_vm10, 1.0, %v9316_v63 }
 0x7ab   :  { %8223 = vmatprep.subr.mxu0 %v9755_v22 }
 0x7ac   :  { %8196 = vmatprep.mubr.msk.f32.mxu0 %vm930_vm13, %v1748_v41  ;;  %8224 = vmatpush3.msra.mxu0 %v9755_v22  ;;  %v7146_v22 = vsel %vm602_vm11, 1.0, %v9316_v63 }
 0x7ad   :  { %8197 = vmatmul.mubr.msk.f32.gmra.mxu0 %vm930_vm13, %v1749_v55  ;;  %8225 = vmatprep.subr.mxu0 %v9763_v25 }
 0x7ae   :  { %8226 = vmatpush3.msra.mxu0 %v9763_v25  ;;  %8229 = vmatprep.mubr.msk.f32.mxu0 %vm423_vm2, %v7144_v9  ;;  %v7147_v25 = vsel %vm603_vm12, 1.0, %v9316_v63 }
 0x7af   :  { %8227 = vmatprep.subr.mxu0 %v9770_v2 }
 0x7b0   :  { %8228 = vmatpush3.msra.mxu0 %v9770_v2 }
 0x7b1   :  { %8230 = vmatmul.mubr.msk.f32.vlgmr.msra.gmra.mxu0 %vm423_vm2, %v7145_v47  ;;  %8243 = vmatprep.subr.mxu0 %v9643_v33  ;;  %v2715_v47 = vld [vmem:[#allocation13 + $0x30] sm:$0xff] }
 0x7b2   :  { %8232 = vmatprep.mubr.msk.f32.mxu0 %vm423_vm2, %v7146_v22  ;;  %8244 = vmatpush3.msra.mxu0 %v9643_v33 }
 0x7b3   :  { %8245 = vmatprep.subr.mxu0 %v9648_v34 }
 0x7b4   :  { %8246 = vmatpush3.msra.mxu0 %v9648_v34 }
 0x7b5   :  { %8233 = vmatmul.mubr.msk.f32.gmra.mxu0 %vm423_vm2, %v7147_v25  ;;  %8247 = vmatprep.subr.mxu0 %v9655_v36  ;;  %v2714_v25 = vld [vmem:[#allocation13 + $0x28] sm:$0xff] }
 0x7b6   :  { %8248 = vmatpush3.msra.mxu0 %v9655_v36 }
 0x7b7   :  { %8249 = vmatprep.subr.mxu0 %v9662_v37 }
 0x7b8   :  { %8250 = vmatpush3.msra.mxu0 %v9662_v37 }
 0x7b9   :  { %8251 = vmatprep.subr.mxu0 %v9675_v43 }
 0x7ba   :  { %8252 = vmatpush3.msra.mxu0 %v9675_v43 }
 0x7bb   :  { %8253 = vmatprep.subr.mxu0 %v9682_v44 }
 0x7bc   :  { %8254 = vmatpush3.msra.mxu0 %v9682_v44 }
 0x7bd   :  { %8255 = vmatprep.subr.mxu0 %v9689_v45 }
 0x7be   :  { %8256 = vmatpush3.msra.mxu0 %v9689_v45 }
 0x7bf   :  { %8257 = vmatprep.subr.mxu0 %v9695_v46 }
 0x7c0   :  { %8258 = vmatpush3.msra.mxu0 %v9695_v46 }
 0x869   :  { %v8195_v33 = vpop.f32.mrf.mxu0 }
 0x86a   :  { %v1834_v34 = vadd.f32 %v8195_v33, %v9903_v56 }
 0x86b   :  { %v1828_v36 = vpop.f32.mrf.mxu0 }
 0x86c   :  { %v1829_v37 = vadd.f32 %v9903_v56, %v1828_v36  ;;  %v1848_v27 = vmax.f32 %v1834_v34, 0.0  ;;  %v2713_v34 = vld [vmem:[#allocation13 + $0x20] sm:$0xff]  ;;  %v2712_v36 = vld [vmem:[#allocation13 + $0x18] sm:$0xff] }
 0x86d   :  { %v8198_v2 = vpop.f32.mrf.mxu0 }
 0x86e   :  { %v1847_v43 = vmax.f32 %v1829_v37, 0.0  ;;  %v1844_v28 = vadd.f32 %v8198_v2, %v9903_v56  ;;  %v2710_v37 = vld [vmem:[#allocation13 + $0x8] sm:$0xff]  ;;  %v2709_v2 = vld [vmem:[#allocation13] sm:$0xff] }
 0x86f   :  { %v1838_v44 = vpop.f32.mrf.mxu0 }
 0x870   :  { %v1839_v10 = vadd.f32 %v9903_v56, %v1838_v44  ;;  %8215 = vmatprep.mubr.msk.f32.mxu1 %vm930_vm13, %v1847_v43  ;;  %v1850_v6 = vmax.f32 %v1844_v28, 0.0  ;;  %v10192_v43 = vld [vmem:[#allocation14 + $0x38] sm:$0xff] }
 0x871   :  { %8216 = vmatmul.mubr.msk.f32.vlgmr.msra.gmra.mxu1 %vm930_vm13, %v1848_v27  ;;  %v8231_v45 = vpop.f32.mrf.mxu0 }
 0x872   :  { %v1849_v46 = vmax.f32 %v1839_v10, 0.0  ;;  %8236 = vmatpush3.msk.msra.mxu1 %vm620_vm14, %v9614_v21 }
 0x873   :  { %v2030_v29 = vpop.f32.mrf.mxu0  ;;  %8265 = vmatprep.subr.mxu1 %v9821_v58 }
 0x874   :  { %8218 = vmatprep.mubr.msk.f32.mxu1 %vm930_vm13, %v1849_v46 }
 0x875   :  { %8219 = vmatmul.mubr.msk.f32.gmra.mxu1 %vm930_vm13, %v1850_v6  ;;  %v8234_v13 = vpop.f32.mrf.mxu0 }
 0x876   :  { %8237 = vmatprep.mubr.msk.f32.mxu1 %vm249_vm0, %v2030_v29 }
 0x877   :  { %v2040_v59 = vpop.f32.mrf.mxu0 }
 0x879   :  { %8238 = vmatmul.mubr.msk.f32.vlgmr.msra.gmra.mxu1 %vm249_vm0, %v8231_v45 }
 0x87a   :  { %8240 = vmatprep.mubr.msk.f32.mxu1 %vm249_vm0, %v2040_v59  ;;  %8266 = vmatpush3.msra.mxu1 %v9821_v58 }
 0x87b   :  { %8267 = vmatprep.subr.mxu1 %v9823_v60 }
 0x87c   :  { %8268 = vmatpush3.msra.mxu1 %v9823_v60 }
 0x87d   :  { %8241 = vmatmul.mubr.msk.f32.gmra.mxu1 %vm249_vm0, %v8234_v13  ;;  %8269 = vmatprep.subr.mxu1 %v9827_v61 }
 0x87e   :  { %8270 = vmatpush3.msra.mxu1 %v9827_v61 }
 0x87f   :  { %8271 = vmatprep.subr.mxu1 %v9831_v62 }
 0x880   :  { %8272 = vmatpush3.msra.mxu1 %v9831_v62 }
 0x881   :  { %8273 = vmatprep.subr.mxu1 %v9837_v0 }
 0x882   :  { %8274 = vmatpush3.msra.mxu1 %v9837_v0 }
 0x883   :  { %8275 = vmatprep.subr.mxu1 %v9841_v3 }
 0x884   :  { %8276 = vmatpush3.msra.mxu1 %v9841_v3 }
 0x885   :  { %8277 = vmatprep.subr.mxu1 %v9845_v4 }
 0x886   :  { %8278 = vmatpush3.msra.mxu1 %v9845_v4 }
 0x887   :  { %8279 = vmatprep.subr.mxu1 %v9848_v7 }
 0x888   :  { %8280 = vmatpush3.msra.mxu1 %v9848_v7 }
 0x931   :  { %v8217_v21 = vpop.f32.mrf.mxu1 }
 0x932   :  { %v1935_v58 = vadd.f32 %v8217_v21, %v10041_v48 }
 0x933   :  { %v1929_v60 = vpop.f32.mrf.mxu1 }
 0x934   :  { %v10156_v61 = vmax.f32 %v1545_v11, %v1935_v58  ;;  %v1930_v62 = vadd.f32 %v10041_v48, %v1929_v60 }
 0x935   :  { %v8220_v0 = vpop.f32.mrf.mxu1 }
 0x936   :  { %v10162_v3 = vmax.f32 %v1544_v30, %v1930_v62  ;;  %v1945_v4 = vadd.f32 %v8220_v0, %v10041_v48 }
 0x937   :  { %v1939_v7 = vpop.f32.mrf.mxu1 }
 0x938   :  { %v10168_v17 = vmax.f32 %v1547_v19, %v1945_v4  ;;  %v1940_v52 = vadd.f32 %v10041_v48, %v1939_v7  ;;  %v10231_v4 = vld [vmem:[#allocation14 + $0x28] sm:$0xff] }
 0x939   :  { %v8239_v54 = vpop.f32.mrf.mxu1 }
 0x93a   :  { %v10174_v11 = vmax.f32 %v1546_v32, %v1940_v52  ;;  %v2147_v57 = vadd.f32 %v8239_v54, %v9738_v5  ;;  %v2716_v5 = vld [vmem:[#allocation13 + $0x38] sm:$0xff]  ;;  %v10243_v52 = vld [vmem:[#allocation14 + $0x20] sm:$0xff] }
 0x93b   :  { %v2127_v15 = vpop.f32.mrf.mxu1  ;;  %8301 = vmatprep.subr.mxu1 %v2716_v5 }
 0x93c   :  { %v2146_v30 = vadd.f32 %v2127_v15, %v9740_v8  ;;  %v2151_v40 = vmax.f32 %v2147_v57, 0.0  ;;  %v10256_v57 = vld [vmem:[#allocation14 + $0x10] sm:$0xff]  ;;  %v10262_v15 = vld [vmem:[#allocation14 + $0x8] sm:$0xff] }
 0x93d   :  { %v8242_v38 = vpop.f32.mrf.mxu1 }
 0x93e   :  { %v2150_v39 = vmax.f32 %v2146_v30, 0.0  ;;  %v2149_v12 = vadd.f32 %v8242_v38, %v9745_v14  ;;  %v10268_v30 = vld [vmem:[#allocation14] sm:$0xff] }
 0x93f   :  { %v2137_v50 = vpop.f32.mrf.mxu1 }
 0x940   :  { %v2148_v19 = vadd.f32 %v2137_v50, %v9748_v16  ;;  %8259 = vmatprep.mubr.msk.f32.mxu0 %vm930_vm13, %v2150_v39  ;;  %v2153_v1 = vmax.f32 %v2149_v12, 0.0 }
 0x941   :  { %8260 = vmatmul.mubr.msk.f32.vlgmr.msra.gmra.mxu0 %vm930_vm13, %v2151_v40 }
 0x942   :  { %v2152_v31 = vmax.f32 %v2148_v19, 0.0 }
 0x944   :  { %8262 = vmatprep.mubr.msk.f32.mxu0 %vm930_vm13, %v2152_v31 }
 0x945   :  { %8263 = vmatmul.mubr.msk.f32.gmra.mxu0 %vm930_vm13, %v2153_v1 }
 0xa01   :  { %v8261_v8 = vpop.f32.mrf.mxu0 }
 0xa02   :  { %v2238_v32 = vadd.f32 %v8261_v8, %v9903_v56 }
 0xa03   :  { %v2232_v24 = vpop.f32.mrf.mxu0 }
 0xa04   :  { %v2233_v14 = vadd.f32 %v9903_v56, %v2232_v24  ;;  %v2252_v51 = vmax.f32 %v2238_v32, 0.0 }
 0xa05   :  { %v8264_v41 = vpop.f32.mrf.mxu0 }
 0xa06   :  { %v2251_v16 = vmax.f32 %v2233_v14, 0.0  ;;  %v2248_v55 = vadd.f32 %v8264_v41, %v9903_v56 }
 0xa07   :  { %v2242_v9 = vpop.f32.mrf.mxu0 }
 0xa08   :  { %v2243_v53 = vadd.f32 %v9903_v56, %v2242_v9  ;;  %8281 = vmatprep.mubr.msk.f32.mxu1 %vm930_vm13, %v2251_v16  ;;  %v2254_v33 = vmax.f32 %v2248_v55, 0.0  ;;  %v2711_v56 = vld [vmem:[#allocation13 + $0x10] sm:$0xff] }
 0xa09   :  { %8282 = vmatmul.mubr.msk.f32.vlgmr.msra.gmra.mxu1 %vm930_vm13, %v2252_v51 }
 0xa0a   :  { %v2253_v22 = vmax.f32 %v2243_v53, 0.0  ;;  %8302 = vmatpush3.msra.mxu1 %v2716_v5 }
 0xa0b   :  { %8303 = vmatprep.subr.mxu1 %v2715_v47 }
 0xa0c   :  { %8284 = vmatprep.mubr.msk.f32.mxu1 %vm930_vm13, %v2253_v22  ;;  %8304 = vmatpush3.msra.mxu1 %v2715_v47 }
 0xa0d   :  { %8285 = vmatmul.mubr.msk.f32.gmra.mxu1 %vm930_vm13, %v2254_v33  ;;  %8305 = vmatprep.subr.mxu1 %v2714_v25 }
 0xa0e   :  { %8306 = vmatpush3.msra.mxu1 %v2714_v25 }
 0xa0f   :  { %8307 = vmatprep.subr.mxu1 %v2713_v34 }
 0xa10   :  { %8308 = vmatpush3.msra.mxu1 %v2713_v34 }
 0xa11   :  { %8309 = vmatprep.subr.mxu1 %v2712_v36 }
 0xa12   :  { %8310 = vmatpush3.msra.mxu1 %v2712_v36 }
 0xa13   :  { %8311 = vmatprep.subr.mxu1 %v2711_v56 }
 0xa14   :  { %8312 = vmatpush3.msra.mxu1 %v2711_v56 }
 0xa15   :  { %8313 = vmatprep.subr.mxu1 %v2710_v37 }
 0xa16   :  { %8314 = vmatpush3.msra.mxu1 %v2710_v37 }
 0xa17   :  { %8315 = vmatprep.subr.mxu1 %v2709_v2 }
 0xa18   :  { %8316 = vmatpush3.msra.mxu1 %v2709_v2 }
 0xa19   :  { %8337 = vmatprep.subr.mxu1 %v10192_v43 }
 0xac9   :  { %v8283_v27 = vpop.f32.mrf.mxu1 }
 0xaca   :  { %v2339_v28 = vadd.f32 %v8283_v27, %v10041_v48 }
 0xacb   :  { %v2333_v44 = vpop.f32.mrf.mxu1 }
 0xacc   :  { %v10197_v10 = vmax.f32 %v10156_v61, %v2339_v28  ;;  %v2334_v45 = vadd.f32 %v10041_v48, %v2333_v44  ;;  %v10215_v61 = vld [vmem:[#allocation14 + $0x30] sm:$0xff] }
 0xacd   :  { %v8286_v46 = vpop.f32.mrf.mxu1 }
 0xace   :  { %v10201_v6 = vmax.f32 %v10162_v3, %v2334_v45  ;;  %v2349_v29 = vadd.f32 %v8286_v46, %v10041_v48  ;;  %v2357_v13 = vmul.f32 %v10197_v10, %v10197_v10 }
 0xacf   :  { %v2343_v59 = vpop.f32.mrf.mxu1 }
 0xad0   :  { %v10207_v21 = vmax.f32 %v10168_v17, %v2349_v29  ;;  %v2344_v58 = vadd.f32 %v10041_v48, %v2343_v59  ;;  %8295 = vmatprep.mubr.msk.f32.mxu0 %vm930_vm13, %v10201_v6  ;;  %8317 = vmatprep.mubr.msk.f32.mxu1 %vm930_vm13, %v10201_v6  ;;  %v2363_v60 = vsel %vm930_vm13, %v2357_v13, 0.0  ;;  %v2356_v62 = vmul.f32 %v10201_v6, %v10201_v6 }
 0xad1   :  { %2364 = vadd.xlane.f32.xlu0 %v2363_v60  ;;  %8318 = vmatmul.mubr.msk.f32.vlgmr.msra.gmra.mxu1 %vm930_vm13, %v10197_v10 }
 0xad2   :  { %v10222_v0 = vmax.f32 %v10174_v11, %v2344_v58  ;;  %8338 = vmatpush3.msra.mxu1 %v10192_v43  ;;  %8287 = vmatprep.subr.msk.mxu0 %vm930_vm13, %v10207_v21  ;;  %v2360_v48 = vsel %vm930_vm13, %v2356_v62, 0.0  ;;  %v2359_v3 = vmul.f32 %v10207_v21, %v10207_v21  ;;  %v10248_v11 = vld [vmem:[#allocation14 + $0x18] sm:$0xff] }
 0xad3   :  { %8339 = vmatprep.subr.mxu1 %v10215_v61  ;;  %2361 = vadd.xlane.f32.xlu1 %v2360_v48 }
 0xad4   :  { %8288 = vmatpush3.xpose.msk.msra.mxu0 %vm930_vm13, %v10207_v21  ;;  %8340 = vmatpush3.msra.mxu1 %v10215_v61  ;;  %v2369_v7 = vsel %vm930_vm13, %v2359_v3, 0.0  ;;  %v2358_v17 = vmul.f32 %v10222_v0, %v10222_v0 }
 0xad5   :  { %8289 = vmatprep.subr.msk.mxu0 %vm930_vm13, %v10222_v0  ;;  %8320 = vmatprep.mubr.msk.f32.mxu1 %vm930_vm13, %v10222_v0 }
 0xad6   :  { %8341 = vmatprep.subr.mxu1 %v10231_v4  ;;  %2370 = vadd.xlane.f32.xlu0 %v2369_v7  ;;  %v2366_v54 = vsel %vm930_vm13, %v2358_v17, 0.0 }
 0xad7   :  { %8342 = vmatpush3.msra.mxu1 %v10231_v4  ;;  %2367 = vadd.xlane.f32.xlu1 %v2366_v54 }
 0xad8   :  { %8321 = vmatmul.mubr.msk.f32.gmra.mxu1 %vm930_vm13, %v10207_v21  ;;  %8343 = vmatprep.subr.mxu1 %v10243_v52 }
 0xad9   :  { %8290 = vmatpush3.xpose.msk.msra.mxu0 %vm930_vm13, %v10222_v0  ;;  %8344 = vmatpush3.msra.mxu1 %v10243_v52 }
 0xada   :  { %8291 = vmatprep.subr.msk.mxu0 %vm930_vm13, %v10197_v10  ;;  %8345 = vmatprep.subr.mxu1 %v10248_v11 }
 0xadb   :  { %8346 = vmatpush3.msra.mxu1 %v10248_v11 }
 0xadc   :  { %8347 = vmatprep.subr.mxu1 %v10256_v57 }
 0xadd   :  { %8292 = vmatpush3.xpose.msk.msra.mxu0 %vm930_vm13, %v10197_v10  ;;  %8348 = vmatpush3.msra.mxu1 %v10256_v57 }
 0xade   :  { %8293 = vmatprep.subr.msk.mxu0 %vm930_vm13, %v10201_v6  ;;  %8349 = vmatprep.subr.mxu1 %v10262_v15 }
 0xadf   :  { %8350 = vmatpush3.msra.mxu1 %v10262_v15 }
 0xae0   :  { %8351 = vmatprep.subr.mxu1 %v10268_v30 }
 0xae1   :  { %8294 = vmatpush3.xpose.msk.msra.mxu0 %vm930_vm13, %v10201_v6  ;;  %8352 = vmatpush3.msra.mxu1 %v10268_v30 }
 0xae2   :  { %8323 = vmatprep.subr.mxu0 %v10207_v21  ;;  %8395 = vmatprep.subr.mxu1 %v10207_v21 }
 0xae4   :  { %8296 = vmatmul.mubr.msk.f32.vlgmr.msra.gmra.mxu0 %vm930_vm13, %v10197_v10 }
 0xae5   :  { %8298 = vmatprep.mubr.msk.f32.mxu0 %vm930_vm13, %v10222_v0  ;;  %8324 = vmatpush3.msra.mxu0 %v10207_v21 }
 0xae6   :  { %8325 = vmatprep.subr.mxu0 %v10222_v0 }
 0xae7   :  { %8326 = vmatpush3.msra.mxu0 %v10222_v0 }
 0xae8   :  { %8299 = vmatmul.mubr.msk.f32.gmra.mxu0 %vm930_vm13, %v10207_v21  ;;  %8327 = vmatprep.subr.mxu0 %v10197_v10 }
 0xae9   :  { %8328 = vmatpush3.msra.mxu0 %v10197_v10 }
 0xaea   :  { %8329 = vmatprep.subr.mxu0 %v10201_v6 }
 0xaeb   :  { %8330 = vmatpush3.msra.mxu0 %v10201_v6 }
 0xaec   :  { %8359 = vmatprep.subr.mxu0 %v10207_v21 }
 0xb5a   :  { %v2365_v39 = vpop.xlane.xlu0 %2364 }
 0xb5c   :  { %v2362_v38 = vpop.xlane.xlu1 %2361 }
 0xb5d   :  { %2372 = vxpose.xlu1.b32.start [1/4] (short) (narrow) %v2362_v38, 8 }
 0xb5f   :  { %v2371_v12 = vpop.xlane.xlu0 %2370 }
 0xb60   :  { %v2368_v40 = vpop.xlane.xlu1 %2367 }
 0xb61   :  { %2373 = vxpose.xlu1.b32.cont [2/4] (short) (narrow) %v2365_v39, 8 }
 0xb65   :  { %2374 = vxpose.xlu1.b32.cont [3/4] (short) (narrow) %v2368_v40, 8 }
 0xb69   :  { %2375 = vxpose.xlu1.b32.end [4/4] (short) (narrow) %v2371_v12, 8 }
 0xba4   :  { %v8297_v50 = vpop.f32.mrf.mxu0 }
 0xba5   :  { %v2510_v8 = vmul.f32 2.0, %v8297_v50 }
 0xba6   :  { %v2490_v19 = vpop.f32.mrf.mxu0 }
 0xba7   :  { %v2509_v32 = vmul.f32 2.0, %v2490_v19 }
 0xba8   :  { %v8300_v31 = vpop.f32.mrf.mxu0 }
 0xba9   :  { %v2512_v34 = vmul.f32 2.0, %v8300_v31 }
 0xbaa   :  { %v2500_v41 = vpop.f32.mrf.mxu0 }
 0xbab   :  { %v2511_v9 = vmul.f32 2.0, %v2500_v41 }
 0xbd9   :  { %v2388_v1 = vpop.trf.xlu1 }
 0xbda   :  { %v2407_v5 = vrot.slane %v2388_v1, %v9537_v20 }
 0xbdc   :  { %v2408_v24 = vadd.f32 %v2407_v5, %v2362_v38  ;;  %v2409_v14 = vadd.f32 %v2407_v5, %v2365_v39  ;;  %v2410_v55 = vadd.f32 %v2407_v5, %v2368_v40  ;;  %v2411_v33 = vadd.f32 %v2407_v5, %v2371_v12 }
 0xbde   :  { %v2513_v16 = vsub.f32 %v2408_v24, %v2509_v32  ;;  %v2514_v51 = vsub.f32 %v2409_v14, %v2510_v8  ;;  %v2515_v25 = vsub.f32 %v2410_v55, %v2511_v9  ;;  %v2516_v37 = vsub.f32 %v2411_v33, %v2512_v34 }
 0xbe0   :  { %v2517_v53 = vsel %vm415_vm1, 1e+30, %v2513_v16  ;;  %v2518_v22 = vsel %vm416_vm3, 1e+30, %v2514_v51  ;;  %v2519_v56 = vsel %vm417_vm4, 1e+30, %v2515_v25 }
 0xbe1   :  { %v2521_v47 = vsel %vm423_vm2, %v2517_v53, inf  ;;  %v2524_v36 = vsel %vm423_vm2, %v2518_v22, inf  ;;  %v2527_v2 = vsel %vm423_vm2, %v2519_v56, inf  ;;  %v2520_v27 = vsel %vm418_vm5, 1e+30, %v2516_v37 }
 0xbe2   :  { %2522 = vmin.xlane.f32.xlu0 %v2521_v47  ;;  %v2530_v26 = vsel %vm423_vm2, %v2520_v27, inf }
 0xbe6   :  { %2525 = vmin.xlane.f32.xlu0 %v2524_v36 }
 0xbea   :  { %2528 = vmin.xlane.f32.xlu0 %v2527_v2 }
 0xbee   :  { %2531 = vmin.xlane.f32.xlu0 %v2530_v26 }
 0xc6b   :  { %v2523_v28 = vpop.xlane.xlu0 %2522 }
 0xc6c   :  { %vm2533_vm0 = vcmp.le.f32.partialorder %v2517_v53, %v2523_v28 }
 0xc6d   :  { %v2537_v44 = vsel %vm2533_vm0, %v9576_v49, 32.0 }
 0xc6e   :  { %v2541_v45 = vsel %vm423_vm2, %v2537_v44, inf }
 0xc6f   :  { %2542 = vmin.xlane.f32.xlu0 %v2541_v45  ;;  %v2526_v35 = vpop.xlane.xlu0 %2525 }
 0xc70   :  { %vm2534_vm1 = vcmp.le.f32.partialorder %v2518_v22, %v2526_v35 }
 0xc71   :  { %v2538_v46 = vsel %vm2534_vm1, %v9576_v49, 32.0 }
 0xc72   :  { %v2544_v29 = vsel %vm423_vm2, %v2538_v46, inf }
 0xc73   :  { %2545 = vmin.xlane.f32.xlu0 %v2544_v29  ;;  %v2529_v13 = vpop.xlane.xlu0 %2528 }
 0xc74   :  { %vm2535_vm3 = vcmp.le.f32.partialorder %v2519_v56, %v2529_v13 }
 0xc75   :  { %v2539_v23 = vsel %vm2535_vm3, %v9576_v49, 32.0 }
 0xc76   :  { %v2547_v42 = vsel %vm423_vm2, %v2539_v23, inf }
 0xc77   :  { %2548 = vmin.xlane.f32.xlu0 %v2547_v42  ;;  %v2532_v59 = vpop.xlane.xlu0 %2531 }
 0xc78   :  { %vm2536_vm4 = vcmp.le.f32.partialorder %v2520_v27, %v2532_v59 }
 0xc79   :  { %v2540_v58 = vsel %vm2536_vm4, %v9576_v49, 32.0 }
 0xc7a   :  { %v2550_v60 = vsel %vm423_vm2, %v2540_v58, inf }
 0xc7b   :  { %2551 = vmin.xlane.f32.xlu0 %v2550_v60 }
 0xcf8   :  { %v2543_v62 = vpop.xlane.xlu0 %2542 }
 0xcf9   :  { %vm2553_vm5 = vcmp.eq.f32.partialorder %v9576_v49, %v2543_v62  ;;  %v8319_v62 = vpop.f32.mrf.mxu1 }
 0xcfa   :  { %v7232_v48 = vsel %vm2553_vm5, 1.0, %v9316_v63  ;;  %v10321_v3 = vsel %vm2553_vm5, 1e+30, %v2517_v53 }
 0xcfb   :  { %8331 = vmatprep.mubr.msk.f32.mxu0 %vm423_vm2, %v7232_v48  ;;  %v2569_v7 = vsel %vm423_vm2, %v10321_v3, inf  ;;  %v2790_v48 = vpop.f32.mrf.mxu1 }
 0xcfc   :  { %2570 = vmin.xlane.f32.xlu0 %v2569_v7  ;;  %v2546_v17 = vpop.xlane.xlu0 %2545  ;;  %v10427_v7 = vld [vmem:[#allocation16] ss:$0 sm:$0xff] }
 0xcfd   :  { %vm2554_vm14 = vcmp.eq.f32.partialorder %v9576_v49, %v2546_v17 }
 0xcfe   :  { %v7233_v54 = vsel %vm2554_vm14, 1.0, %v9316_v63  ;;  %v10328_v38 = vsel %vm2554_vm14, 1e+30, %v2518_v22 }
 0xcff   :  { %8332 = vmatmul.mubr.msk.f32.vlgmr.msra.gmra.mxu0 %vm423_vm2, %v7233_v54  ;;  %v2572_v39 = vsel %vm423_vm2, %v10328_v38, inf  ;;  %v10432_v54 = vadd.f32 %v8319_v62, %v10427_v7 }
 0xd00   :  { %8360 = vmatpush3.msra.mxu0 %v10207_v21  ;;  %2573 = vmin.xlane.f32.xlu0 %v2572_v39  ;;  %v2549_v40 = vpop.xlane.xlu0 %2548  ;;  %v10435_v39 = vadd.f32 %v10427_v7, %v2790_v48 }
 0xd01   :  { %8361 = vmatprep.subr.mxu0 %v10222_v0  ;;  %vm2555_vm15 = vcmp.eq.f32.partialorder %v9576_v49, %v2549_v40 }
 0xd02   :  { %v7234_v12 = vsel %vm2555_vm15, 1.0, %v9316_v63  ;;  %v10337_v50 = vsel %vm2555_vm15, 1e+30, %v2519_v56  ;;  %8362 = vmatpush3.msra.mxu0 %v10222_v0 }
 0xd03   :  { %8363 = vmatprep.subr.mxu0 %v10197_v10  ;;  %8334 = vmatprep.mubr.msk.f32.mxu0 %vm423_vm2, %v7234_v12  ;;  %v2575_v19 = vsel %vm423_vm2, %v10337_v50, inf }
 0xd04   :  { %8364 = vmatpush3.msra.mxu0 %v10197_v10  ;;  %2576 = vmin.xlane.f32.xlu0 %v2575_v19  ;;  %v2552_v31 = vpop.xlane.xlu0 %2551 }
 0xd05   :  { %8365 = vmatprep.subr.mxu0 %v10201_v6  ;;  %vm2556_vm6 = vcmp.eq.f32.partialorder %v9576_v49, %v2552_v31 }
 0xd06   :  { %v7235_v1 = vsel %vm2556_vm6, 1.0, %v9316_v63  ;;  %v10348_v5 = vsel %vm2556_vm6, 1e+30, %v2520_v27  ;;  %8366 = vmatpush3.msra.mxu0 %v10201_v6 }
 0xd07   :  { %8335 = vmatmul.mubr.msk.f32.gmra.mxu0 %vm423_vm2, %v7235_v1  ;;  %v2578_v8 = vsel %vm423_vm2, %v10348_v5, inf  ;;  %8373 = vmatprep.subr.mxu0 %v10192_v43 }
 0xd08   :  { %2579 = vmin.xlane.f32.xlu0 %v2578_v8 }
 0xd85   :  { %v2571_v32 = vpop.xlane.xlu0 %2570 }
 0xd86   :  { %vm2581_vm7 = vcmp.le.f32.partialorder %v10321_v3, %v2571_v32 }
 0xd87   :  { %v2585_v24 = vsel %vm2581_vm7, %v9576_v49, 32.0 }
 0xd88   :  { %v2589_v14 = vsel %vm423_vm2, %v2585_v24, inf }
 0xd89   :  { %2590 = vmin.xlane.f32.xlu0 %v2589_v14  ;;  %v2574_v41 = vpop.xlane.xlu0 %2573 }
 0xd8a   :  { %vm2582_vm8 = vcmp.le.f32.partialorder %v10328_v38, %v2574_v41 }
 0xd8b   :  { %v2586_v16 = vsel %vm2582_vm8, %v9576_v49, 32.0 }
 0xd8c   :  { %v2592_v51 = vsel %vm423_vm2, %v2586_v16, inf }
 0xd8d   :  { %2593 = vmin.xlane.f32.xlu0 %v2592_v51  ;;  %v2577_v55 = vpop.xlane.xlu0 %2576 }
 0xd8e   :  { %vm2583_vm9 = vcmp.le.f32.partialorder %v10337_v50, %v2577_v55 }
 0xd8f   :  { %v2587_v9 = vsel %vm2583_vm9, %v9576_v49, 32.0 }
 0xd90   :  { %v2595_v53 = vsel %vm423_vm2, %v2587_v9, inf }
 0xd91   :  { %2596 = vmin.xlane.f32.xlu0 %v2595_v53  ;;  %v2580_v47 = vpop.xlane.xlu0 %2579 }
 0xd92   :  { %vm2584_vm10 = vcmp.le.f32.partialorder %v10348_v5, %v2580_v47 }
 0xd93   :  { %v2588_v22 = vsel %vm2584_vm10, %v9576_v49, 32.0 }
 0xd94   :  { %v2598_v25 = vsel %vm423_vm2, %v2588_v22, inf }
 0xd95   :  { %2599 = vmin.xlane.f32.xlu0 %v2598_v25 }
 0xdbf   :  { %v8333_v33 = vpop.f32.mrf.mxu0 }
 0xdc1   :  { %v2887_v34 = vpop.f32.mrf.mxu0 }
 0xdc2   :  { %8353 = vmatprep.mubr.msk.f32.mxu1 %vm930_vm13, %v2887_v34 }
 0xdc3   :  { %8354 = vmatmul.mubr.msk.f32.vlgmr.msra.gmra.mxu1 %vm930_vm13, %v8333_v33 }
 0xdc4   :  { %8396 = vmatpush3.msra.mxu1 %v10207_v21 }
 0xdc5   :  { %8397 = vmatprep.subr.mxu1 %v10222_v0 }
 0xdc6   :  { %8398 = vmatpush3.msra.mxu1 %v10222_v0 }
 0xdc7   :  { %8399 = vmatprep.subr.mxu1 %v10197_v10  ;;  %v8336_v36 = vpop.f32.mrf.mxu0 }
 0xdc8   :  { %8400 = vmatpush3.msra.mxu1 %v10197_v10 }
 0xdc9   :  { %8401 = vmatprep.subr.mxu1 %v10201_v6  ;;  %v2897_v56 = vpop.f32.mrf.mxu0 }
 0xdca   :  { %8402 = vmatpush3.msra.mxu1 %v10201_v6  ;;  %8356 = vmatprep.mubr.msk.f32.mxu1 %vm930_vm13, %v2897_v56 }
 0xdcb   :  { %8357 = vmatmul.mubr.msk.f32.gmra.mxu1 %vm930_vm13, %v8336_v36  ;;  %8409 = vmatprep.subr.mxu1 %v10192_v43 }
 0xe12   :  { %v2591_v37 = vpop.xlane.xlu0 %2590 }
 0xe13   :  { %vm2601_vm11 = vcmp.eq.f32.partialorder %v9576_v49, %v2591_v37 }
 0xe14   :  { %v7236_v2 = vsel %vm2601_vm11, 1.0, %v9316_v63  ;;  %v10382_v27 = vsel %vm2601_vm11, 1e+30, %v10321_v3  ;;  %v8322_v3 = vpop.f32.mrf.mxu1 }
 0xe15   :  { %8367 = vmatprep.mubr.msk.f32.mxu0 %vm423_vm2, %v7236_v2  ;;  %v2617_v26 = vsel %vm423_vm2, %v10382_v27, inf  ;;  %v10444_v19 = vadd.f32 %v8322_v3, %v10427_v7 }
 0xe16   :  { %2618 = vmin.xlane.f32.xlu1 %v2617_v26  ;;  %v2594_v28 = vpop.xlane.xlu0 %2593  ;;  %v10429_v17 = vpop.f32.mrf.mxu1 }
 0xe17   :  { %vm2602_vm12 = vcmp.eq.f32.partialorder %v9576_v49, %v2594_v28 }
 0xe18   :  { %v7237_v44 = vsel %vm2602_vm12, 1.0, %v9316_v63  ;;  %v10390_v45 = vsel %vm2602_vm12, 1e+30, %v10328_v38 }
 0xe19   :  { %8368 = vmatmul.mubr.msk.f32.vlgmr.msra.gmra.mxu0 %vm423_vm2, %v7237_v44  ;;  %v2620_v35 = vsel %vm423_vm2, %v10390_v45, inf }
 0xe1a   :  { %8374 = vmatpush3.msra.mxu0 %v10192_v43  ;;  %2621 = vmin.xlane.f32.xlu0 %v2620_v35  ;;  %v2597_v46 = vpop.xlane.xlu0 %2596 }
 0xe1b   :  { %8375 = vmatprep.subr.mxu0 %v10215_v61  ;;  %vm2603_vm0 = vcmp.eq.f32.partialorder %v9576_v49, %v2597_v46 }
 0xe1c   :  { %v7238_v29 = vsel %vm2603_vm0, 1.0, %v9316_v63  ;;  %v10400_v13 = vsel %vm2603_vm0, 1e+30, %v10337_v50  ;;  %8376 = vmatpush3.msra.mxu0 %v10215_v61 }
 0xe1d   :  { %8377 = vmatprep.subr.mxu0 %v10231_v4  ;;  %8370 = vmatprep.mubr.msk.f32.mxu0 %vm423_vm2, %v7238_v29  ;;  %v2623_v23 = vsel %vm423_vm2, %v10400_v13, inf }
 0xe1e   :  { %8378 = vmatpush3.msra.mxu0 %v10231_v4  ;;  %2624 = vmin.xlane.f32.xlu0 %v2623_v23  ;;  %v2600_v42 = vpop.xlane.xlu0 %2599 }
 0xe1f   :  { %8379 = vmatprep.subr.mxu0 %v10243_v52  ;;  %vm2604_vm1 = vcmp.eq.f32.partialorder %v9576_v49, %v2600_v42 }
 0xe20   :  { %v7239_v59 = vsel %vm2604_vm1, 1.0, %v9316_v63  ;;  %v10412_v58 = vsel %vm2604_vm1, 1e+30, %v10348_v5  ;;  %8380 = vmatpush3.msra.mxu0 %v10243_v52 }
 0xe21   :  { %8381 = vmatprep.subr.mxu0 %v10248_v11  ;;  %8371 = vmatmul.mubr.msk.f32.gmra.mxu0 %vm423_vm2, %v7239_v59  ;;  %v2626_v60 = vsel %vm423_vm2, %v10412_v58, inf }
 0xe22   :  { %8382 = vmatpush3.msra.mxu0 %v10248_v11  ;;  %2627 = vmin.xlane.f32.xlu0 %v2626_v60 }
 0xe23   :  { %8383 = vmatprep.subr.mxu0 %v10256_v57 }
 0xe24   :  { %8384 = vmatpush3.msra.mxu0 %v10256_v57 }
 0xe25   :  { %8385 = vmatprep.subr.mxu0 %v10262_v15 }
 0xe26   :  { %8386 = vmatpush3.msra.mxu0 %v10262_v15 }
 0xe27   :  { %8387 = vmatprep.subr.mxu0 %v10268_v30 }
 0xe28   :  { %8388 = vmatpush3.msra.mxu0 %v10268_v30 }
 0xe29   :  { %8431 = vmatprep.subr.mxu0 %v10207_v21 }
 0xe83   :  { %v8355_v38 = vpop.f32.mrf.mxu1 }
 0xe84   :  { %v10438_v40 = vadd.f32 %v8355_v38, %v10432_v54 }
 0xe85   :  { %v2992_v12 = vpop.f32.mrf.mxu1 }
 0xe86   :  { %v10441_v50 = vadd.f32 %v2992_v12, %v10435_v39 }
 0xe8b   :  { %v8358_v31 = vpop.f32.mrf.mxu1 }
 0xe8c   :  { %v10447_v1 = vadd.f32 %v8358_v31, %v10444_v19 }
 0xe9f   :  { %v2619_v5 = vpop.xlane.xlu1 %2618 }
 0xea0   :  { %vm2629_vm3 = vcmp.le.f32.partialorder %v10382_v27, %v2619_v5 }
 0xea1   :  { %v2633_v8 = vsel %vm2629_vm3, %v9576_v49, 32.0 }
 0xea2   :  { %v2637_v32 = vsel %vm423_vm2, %v2633_v8, inf }
 0xea3   :  { %2638 = vmin.xlane.f32.xlu0 %v2637_v32  ;;  %v2622_v24 = vpop.xlane.xlu0 %2621 }
 0xea4   :  { %vm2630_vm4 = vcmp.le.f32.partialorder %v10390_v45, %v2622_v24 }
 0xea5   :  { %v2634_v14 = vsel %vm2630_vm4, %v9576_v49, 32.0 }
 0xea6   :  { %v2640_v41 = vsel %vm423_vm2, %v2634_v14, inf }
 0xea7   :  { %2641 = vmin.xlane.f32.xlu0 %v2640_v41  ;;  %v2625_v16 = vpop.xlane.xlu0 %2624 }
 0xea8   :  { %vm2631_vm5 = vcmp.le.f32.partialorder %v10400_v13, %v2625_v16 }
 0xea9   :  { %v2635_v51 = vsel %vm2631_vm5, %v9576_v49, 32.0 }
 0xeaa   :  { %v2643_v55 = vsel %vm423_vm2, %v2635_v51, inf }
 0xeab   :  { %2644 = vmin.xlane.f32.xlu0 %v2643_v55  ;;  %v2628_v9 = vpop.xlane.xlu0 %2627 }
 0xeac   :  { %vm2632_vm14 = vcmp.le.f32.partialorder %v10412_v58, %v2628_v9 }
 0xead   :  { %v2636_v53 = vsel %vm2632_vm14, %v9576_v49, 32.0 }
 0xeae   :  { %v2646_v47 = vsel %vm423_vm2, %v2636_v53, inf }
 0xeaf   :  { %2647 = vmin.xlane.f32.xlu0 %v2646_v47 }
 0xed9   :  { %v8369_v22 = vpop.f32.mrf.mxu0 }
 0xedb   :  { %v3093_v25 = vpop.f32.mrf.mxu0 }
 0xedc   :  { %8389 = vmatprep.mubr.msk.f32.mxu0 %vm930_vm13, %v3093_v25  ;;  %v10531_v25 = vpop.f32.mrf.mxu1 }
 0xedd   :  { %8390 = vmatmul.mubr.msk.f32.vlgmr.msra.gmra.mxu0 %vm930_vm13, %v8369_v22 }
 0xede   :  { %8432 = vmatpush3.msra.mxu0 %v10207_v21 }
 0xedf   :  { %8433 = vmatprep.subr.mxu0 %v10222_v0 }
 0xee0   :  { %8434 = vmatpush3.msra.mxu0 %v10222_v0 }
 0xee1   :  { %8435 = vmatprep.subr.mxu0 %v10197_v10  ;;  %v8372_v33 = vpop.f32.mrf.mxu0 }
 0xee2   :  { %8436 = vmatpush3.msra.mxu0 %v10197_v10 }
 0xee3   :  { %8437 = vmatprep.subr.mxu0 %v10201_v6  ;;  %v3103_v34 = vpop.f32.mrf.mxu0 }
 0xee4   :  { %8438 = vmatpush3.msra.mxu0 %v10201_v6  ;;  %8392 = vmatprep.mubr.msk.f32.mxu0 %vm930_vm13, %v3103_v34 }
 0xee5   :  { %8393 = vmatmul.mubr.msk.f32.gmra.mxu0 %vm930_vm13, %v8372_v33  ;;  %8445 = vmatprep.subr.mxu0 %v10192_v43 }
 0xf2c   :  { %v2639_v36 = vpop.xlane.xlu0 %2638 }
 0xf2d   :  { %vm2649_vm15 = vcmp.eq.f32.partialorder %v9576_v49, %v2639_v36 }
 0xf2e   :  { %v7240_v56 = vsel %vm2649_vm15, 1.0, %v9316_v63  ;;  %v2661_v37 = vsel %vm2649_vm15, 1e+30, %v10382_v27 }
 0xf2f   :  { %8403 = vmatprep.mubr.msk.f32.mxu1 %vm423_vm2, %v7240_v56  ;;  %v2665_v2 = vsel %vm423_vm2, %v2661_v37, inf }
 0xf30   :  { %2666 = vmin.xlane.f32.xlu0 %v2665_v2  ;;  %v2642_v26 = vpop.xlane.xlu0 %2641 }
 0xf31   :  { %vm2650_vm6 = vcmp.eq.f32.partialorder %v9576_v49, %v2642_v26 }
 0xf32   :  { %v7241_v28 = vsel %vm2650_vm6, 1.0, %v9316_v63  ;;  %v2662_v44 = vsel %vm2650_vm6, 1e+30, %v10390_v45 }
 0xf33   :  { %8404 = vmatmul.mubr.msk.f32.vlgmr.msra.gmra.mxu1 %vm423_vm2, %v7241_v28  ;;  %v2668_v35 = vsel %vm423_vm2, %v2662_v44, inf }
 0xf34   :  { %2669 = vmin.xlane.f32.xlu0 %v2668_v35  ;;  %v2645_v46 = vpop.xlane.xlu0 %2644  ;;  %8410 = vmatpush3.msra.mxu1 %v10192_v43 }
 0xf35   :  { %vm2651_vm7 = vcmp.eq.f32.partialorder %v9576_v49, %v2645_v46  ;;  %8411 = vmatprep.subr.mxu1 %v10215_v61 }
 0xf36   :  { %v7242_v27 = vsel %vm2651_vm7, 1.0, %v9316_v63  ;;  %v2663_v29 = vsel %vm2651_vm7, 1e+30, %v10400_v13  ;;  %8412 = vmatpush3.msra.mxu1 %v10215_v61 }
 0xf37   :  { %8406 = vmatprep.mubr.msk.f32.mxu1 %vm423_vm2, %v7242_v27  ;;  %v2671_v45 = vsel %vm423_vm2, %v2663_v29, inf  ;;  %8413 = vmatprep.subr.mxu1 %v10231_v4 }
 0xf38   :  { %2672 = vmin.xlane.f32.xlu0 %v2671_v45  ;;  %v2648_v23 = vpop.xlane.xlu0 %2647  ;;  %8414 = vmatpush3.msra.mxu1 %v10231_v4 }
 0xf39   :  { %vm2652_vm8 = vcmp.eq.f32.partialorder %v9576_v49, %v2648_v23  ;;  %8415 = vmatprep.subr.mxu1 %v10243_v52  ;;  %v3733_v23 = vld [vmem:[#allocation17 + $0x1c0] sm:$0xff] }
 0xf3a   :  { %v7243_v42 = vsel %vm2652_vm8, 1.0, %v9316_v63  ;;  %v2664_v13 = vsel %vm2652_vm8, 1e+30, %v10412_v58  ;;  %8416 = vmatpush3.msra.mxu1 %v10243_v52 }
 0xf3b   :  { %8407 = vmatmul.mubr.msk.f32.gmra.mxu1 %vm423_vm2, %v7243_v42  ;;  %v2674_v59 = vsel %vm423_vm2, %v2664_v13, inf  ;;  %8417 = vmatprep.subr.mxu1 %v10248_v11  ;;  %v3737_v42 = vld [vmem:[#allocation17 + $0x1e0] sm:$0xff] }
 0xf3c   :  { %2675 = vmin.xlane.f32.xlu1 %v2674_v59  ;;  %8418 = vmatpush3.msra.mxu1 %v10248_v11  ;;  %v3738_v59 = vld [vmem:[#allocation17 + $0x1e8] sm:$0xff] }
 0xf3d   :  { %8419 = vmatprep.subr.mxu1 %v10256_v57 }
 0xf3e   :  { %8420 = vmatpush3.msra.mxu1 %v10256_v57 }
 0xf3f   :  { %8421 = vmatprep.subr.mxu1 %v10262_v15 }
 0xf40   :  { %8422 = vmatpush3.msra.mxu1 %v10262_v15 }
 0xf41   :  { %8423 = vmatprep.subr.mxu1 %v10268_v30 }
 0xf42   :  { %8424 = vmatpush3.msra.mxu1 %v10268_v30 }
 0xf9d   :  { %v8391_v58 = vpop.f32.mrf.mxu0 }
 0xf9e   :  { %v10509_v60 = vadd.f32 %v8391_v58, %v10432_v54  ;;  %v7341_v58 = vcombine.low %v3733_v23, %v3737_v42 }
 0xf9f   :  { %v3190_v62 = vpop.f32.mrf.mxu0 }
 0xfa0   :  { %v3214_v48 = vmax.f32 %v10438_v40, %v10509_v60  ;;  %v10514_v3 = vadd.f32 %v3190_v62, %v10435_v39 }
 0xfa2   :  { %v3213_v38 = vmax.f32 %v10441_v50, %v10514_v3  ;;  %v3729_v3 = vld [vmem:[#allocation17 + $0x1a0] sm:$0xff] }
 0xfa5   :  { %v8394_v12 = vpop.f32.mrf.mxu0 }
 0xfa6   :  { %v10519_v31 = vadd.f32 %v8394_v12, %v10444_v19 }
 0xfa7   :  { %v10582_v27 = vpop.f32.mrf.mxu0 }
 0xfa8   :  { %v3216_v5 = vmax.f32 %v10447_v1, %v10519_v31  ;;  %v7342_v1 = vcombine.high %v3733_v23, %v3737_v42  ;;  %v3730_v31 = vld [vmem:[#allocation17 + $0x1a8] sm:$0xff]  ;;  %v3685_v23 = vld [vmem:[#allocation17 + $0x40] sm:$0xff] }
 0xfa9   :  { %v3689_v42 = vld [vmem:[#allocation17 + $0x60] sm:$0xff] }
 0xfaa   :  { %4061 = vmatprep.subr.bf16.mxu1 %v7342_v1  ;;  %v7294_v1 = vcombine.high %v3685_v23, %v3689_v42 }
 0xfb9   :  { %v2667_v8 = vpop.xlane.xlu0 %2666 }
 0xfba   :  { %vm2677_vm9 = vcmp.le.f32.partialorder %v2661_v37, %v2667_v8 }
 0xfbb   :  { %v2681_v32 = vsel %vm2677_vm9, %v9576_v49, 32.0 }
 0xfbc   :  { %v2685_v24 = vsel %vm423_vm2, %v2681_v32, inf }
 0xfbd   :  { %2686 = vmin.xlane.f32.xlu0 %v2685_v24  ;;  %v2670_v14 = vpop.xlane.xlu0 %2669  ;;  %v3717_v24 = vld [vmem:[#allocation17 + $0x140] sm:$0xff] }
 0xfbe   :  { %vm2678_vm10 = vcmp.le.f32.partialorder %v2662_v44, %v2670_v14  ;;  %v3721_v14 = vld [vmem:[#allocation17 + $0x160] sm:$0xff] }
 0xfbf   :  { %v2682_v41 = vsel %vm2678_vm10, %v9576_v49, 32.0 }
 0xfc0   :  { %v2688_v16 = vsel %vm423_vm2, %v2682_v41, inf  ;;  %v3718_v41 = vld [vmem:[#allocation17 + $0x148] sm:$0xff] }
 0xfc1   :  { %2689 = vmin.xlane.f32.xlu1 %v2688_v16  ;;  %v2673_v51 = vpop.xlane.xlu0 %2672  ;;  %v7326_v16 = vcombine.high %v3717_v24, %v3721_v14 }
 0xfc2   :  { %vm2679_vm11 = vcmp.le.f32.partialorder %v2663_v29, %v2673_v51  ;;  %v3722_v51 = vld [vmem:[#allocation17 + $0x168] sm:$0xff] }
 0xfc3   :  { %v2683_v55 = vsel %vm2679_vm11, %v9576_v49, 32.0 }
 0xfc4   :  { %v2691_v9 = vsel %vm423_vm2, %v2683_v55, inf  ;;  %v7325_v55 = vcombine.low %v3717_v24, %v3721_v14 }
 0xfc5   :  { %v2676_v53 = vpop.xlane.xlu1 %2675  ;;  %2692 = vmin.xlane.f32.xlu0 %v2691_v9  ;;  %v7327_v9 = vcombine.low %v3718_v41, %v3722_v51 }
 0xfc6   :  { %vm2680_vm12 = vcmp.le.f32.partialorder %v2664_v13, %v2676_v53  ;;  %v3734_v13 = vld [vmem:[#allocation17 + $0x1c8] sm:$0xff]  ;;  %v7328_v53 = vcombine.high %v3718_v41, %v3722_v51  ;;  %v9317_v41 = vmov 0   ;;  %v3736_v51 = vld [vmem:[#allocation17 + $0x1d8] sm:$0xff] }
 0xfc7   :  { %v2684_v47 = vsel %vm2680_vm12, %v9576_v49, 32.0  ;;  %v7343_v60 = vcombine.low %v3734_v13, %v3738_v59  ;;  %v7344_v62 = vcombine.high %v3734_v13, %v3738_v59  ;;  %v3686_v13 = vld [vmem:[#allocation17 + $0x48] sm:$0xff] }
 0xfc8   :  { %v2694_v22 = vsel %vm423_vm2, %v2684_v47, inf  ;;  %v3709_v47 = vld [vmem:[#allocation17 + $0x100] sm:$0xff]  ;;  %v3690_v59 = vld [vmem:[#allocation17 + $0x68] sm:$0xff] }
 0xfc9   :  { %2695 = vmin.xlane.f32.xlu1 %v2694_v22  ;;  %v3713_v22 = vld [vmem:[#allocation17 + $0x120] sm:$0xff] }
 0xff3   :  { %v8405_v33 = vpop.f32.mrf.mxu1 }
 0xff5   :  { %v3295_v34 = vpop.f32.mrf.mxu1 }
 0xff6   :  { %8425 = vmatprep.mubr.msk.f32.mxu1 %vm930_vm13, %v3295_v34  ;;  %v7318_v34 = vcombine.high %v3709_v47, %v3713_v22 }
 0xff7   :  { %8426 = vmatmul.mubr.msk.f32.vlgmr.msra.gmra.mxu1 %vm930_vm13, %v8405_v33  ;;  %v3710_v33 = vld [vmem:[#allocation17 + $0x108] sm:$0xff] }
 0xff8   :  { %4062 = vmatpush1.bf16.msra.mxu1 %v7341_v58  ;;  %v7293_v58 = vcombine.low %v3685_v23, %v3689_v42 }
 0xffb   :  { %v8408_v36 = vpop.f32.mrf.mxu1 }
 0xffd   :  { %v3305_v56 = vpop.f32.mrf.mxu1 }
 0xffe   :  { %8428 = vmatprep.mubr.msk.f32.mxu1 %vm930_vm13, %v3305_v56  ;;  %v7317_v56 = vcombine.low %v3709_v47, %v3713_v22 }
 0xfff   :  { %8429 = vmatmul.mubr.msk.f32.gmra.mxu1 %vm930_vm13, %v8408_v36  ;;  %v3714_v36 = vld [vmem:[#allocation17 + $0x128] sm:$0xff] }
0x1000   :  { %4093 = vmatprep.mubr.bf16.mxu1 %v9317_v41 }
0x1046   :  { %v2687_v37 = vpop.xlane.xlu0 %2686 }
0x1047   :  { %vm2697_vm0 = vcmp.eq.f32.partialorder %v9576_v49, %v2687_v37  ;;  %v7319_v37 = vcombine.low %v3710_v33, %v3714_v36 }
0x1048   :  { %v7244_v2 = vsel %vm2697_vm0, 1.0, %v9316_v63 }
0x1049   :  { %8439 = vmatprep.mubr.msk.f32.mxu0 %vm423_vm2, %v7244_v2  ;;  %v7320_v2 = vcombine.high %v3710_v33, %v3714_v36  ;;  %v2801_v36 = vadd.f32 %v10427_v7, %v10429_v17 }
0x104a   :  { %v2690_v26 = vpop.xlane.xlu1 %2689 }
0x104b   :  { %vm2698_vm1 = vcmp.eq.f32.partialorder %v9576_v49, %v2690_v26  ;;  %v3701_v26 = vld [vmem:[#allocation17 + $0xc0] sm:$0xff] }
0x104c   :  { %v7245_v28 = vsel %vm2698_vm1, 1.0, %v9316_v63 }
0x104d   :  { %8440 = vmatmul.mubr.msk.f32.vlgmr.msra.gmra.mxu0 %vm423_vm2, %v7245_v28  ;;  %v3705_v28 = vld [vmem:[#allocation17 + $0xe0] sm:$0xff] }
0x104e   :  { %v2693_v44 = vpop.xlane.xlu0 %2692  ;;  %8446 = vmatpush3.msra.mxu0 %v10192_v43 }
0x104f   :  { %vm2699_vm3 = vcmp.eq.f32.partialorder %v9576_v49, %v2693_v44  ;;  %8447 = vmatprep.subr.mxu0 %v10215_v61  ;;  %v3702_v44 = vld [vmem:[#allocation17 + $0xc8] sm:$0xff] }
0x1050   :  { %v7246_v35 = vsel %vm2699_vm3, 1.0, %v9316_v63  ;;  %8448 = vmatpush3.msra.mxu0 %v10215_v61 }
0x1051   :  { %8442 = vmatprep.mubr.msk.f32.mxu0 %vm423_vm2, %v7246_v35  ;;  %8449 = vmatprep.subr.mxu0 %v10231_v4  ;;  %v7310_v35 = vcombine.high %v3701_v26, %v3705_v28 }
0x1052   :  { %v2696_v46 = vpop.xlane.xlu1 %2695  ;;  %8450 = vmatpush3.msra.mxu0 %v10231_v4 }
0x1053   :  { %vm2700_vm4 = vcmp.eq.f32.partialorder %v9576_v49, %v2696_v46  ;;  %8451 = vmatprep.subr.mxu0 %v10243_v52  ;;  %v3706_v46 = vld [vmem:[#allocation17 + $0xe8] sm:$0xff] }
0x1054   :  { %v7247_v43 = vsel %vm2700_vm4, 1.0, %v9316_v63  ;;  %8452 = vmatpush3.msra.mxu0 %v10243_v52 }
0x1055   :  { %8443 = vmatmul.mubr.msk.f32.gmra.mxu0 %vm423_vm2, %v7247_v43  ;;  %8453 = vmatprep.subr.mxu0 %v10248_v11  ;;  %v7309_v43 = vcombine.low %v3701_v26, %v3705_v28  ;;  %v3211_v26 = vadd.f32 %v10582_v27, %v2801_v36  ;;  %vm7088_vm2 = vcmask 73728  }
0x1056   :  { %8454 = vmatpush3.msra.mxu0 %v10248_v11 }
0x1057   :  { %8455 = vmatprep.subr.mxu0 %v10256_v57 }
0x1058   :  { %8456 = vmatpush3.msra.mxu0 %v10256_v57 }
0x1059   :  { %8457 = vmatprep.subr.mxu0 %v10262_v15 }
0x105a   :  { %8458 = vmatpush3.msra.mxu0 %v10262_v15 }
0x105b   :  { %8459 = vmatprep.subr.mxu0 %v10268_v30 }
0x105c   :  { %8460 = vmatpush3.msra.mxu0 %v10268_v30 }
0x105d   :  { %4102 = vmatprep.subr.bf16.mxu0 %v7344_v62  ;;  %v7296_v62 = vcombine.high %v3686_v13, %v3690_v59 }
0x10b7   :  { %v8427_v49 = vpop.f32.mrf.mxu1 }
0x10b8   :  { %v3412_v63 = vadd.f32 %v8427_v49, %v10432_v54  ;;  %v7311_v49 = vcombine.low %v3702_v44, %v3706_v46 }
0x10b9   :  { %v3392_v61 = vpop.f32.mrf.mxu1 }
0x10ba   :  { %v10568_v4 = vmax.f32 %v3214_v48, %v3412_v63  ;;  %v3411_v52 = vadd.f32 %v3392_v61, %v10435_v39  ;;  %v3725_v48 = vld [vmem:[#allocation17 + $0x180] sm:$0xff]  ;;  %v7312_v63 = vcombine.high %v3702_v44, %v3706_v46  ;;  %v3013_v44 = vadd.f32 %v10531_v25, %v2801_v36  ;;  %v3727_v25 = vld [vmem:[#allocation17 + $0x190] sm:$0xff] }
0x10bb   :  { %v7334_v12 = vcombine.high %v3725_v48, %v3729_v3  ;;  %v3693_v61 = vld [vmem:[#allocation17 + $0x80] sm:$0xff] }
0x10bc   :  { %v10574_v11 = vmax.f32 %v3213_v38, %v3411_v52  ;;  %v3726_v38 = vld [vmem:[#allocation17 + $0x188] sm:$0xff]  ;;  %v3697_v52 = vld [vmem:[#allocation17 + $0xa0] sm:$0xff] }
0x10bd   :  { %v7335_v8 = vcombine.low %v3726_v38, %v3730_v31  ;;  %v7336_v32 = vcombine.high %v3726_v38, %v3730_v31  ;;  %4063 = vmatprep.subr.bf16.mxu1 %v7334_v12  ;;  %v3678_v38 = vld [vmem:[#allocation17 + $0x8] sm:$0xff] }
0x10bf   :  { %v8430_v57 = vpop.f32.mrf.mxu1 }
0x10c0   :  { %v3414_v15 = vadd.f32 %v8430_v57, %v10444_v19  ;;  %v3694_v57 = vld [vmem:[#allocation17 + $0x88] sm:$0xff] }
0x10c2   :  { %v10580_v30 = vmax.f32 %v3216_v5, %v3414_v15  ;;  %v7333_v5 = vcombine.low %v3725_v48, %v3729_v3  ;;  %v7302_v15 = vcombine.high %v3693_v61, %v3697_v52  ;;  %v3677_v48 = vld [vmem:[#allocation17] sm:$0xff] }
0x10c3   :  { %v3681_v3 = vld [vmem:[#allocation17 + $0x20] sm:$0xff] }
0x10c4   :  { %4064 = vmatpush1.bf16.msra.mxu1 %v7333_v5  ;;  %v7285_v12 = vcombine.low %v3677_v48, %v3681_v3  ;;  %v7286_v31 = vcombine.high %v3677_v48, %v3681_v3  ;;  %v3682_v5 = vld [vmem:[#allocation17 + $0x28] sm:$0xff] }
0x10c5   :  { %4065 = vmatprep.subr.bf16.mxu1 %v7326_v16  ;;  %v7287_v24 = vcombine.low %v3678_v38, %v3682_v5  ;;  %v7288_v14 = vcombine.high %v3678_v38, %v3682_v5  ;;  %v3711_v38 = vld [vmem:[#allocation17 + $0x110] sm:$0xff]  ;;  %v3716_v5 = vld [vmem:[#allocation17 + $0x138] sm:$0xff] }
0x10c8   :  { %4066 = vmatpush1.bf16.msra.mxu1 %v7325_v55  ;;  %v3740_v55 = vld [vmem:[#allocation17 + $0x1f8] sm:$0xff] }
0x10c9   :  { %4067 = vmatprep.subr.bf16.mxu1 %v7318_v34  ;;  %v7348_v47 = vcombine.high %v3736_v51, %v3740_v55 }
0x10cc   :  { %4068 = vmatpush1.bf16.msra.mxu1 %v7317_v56 }
0x10cd   :  { %4069 = vmatprep.subr.bf16.mxu1 %v7310_v35 }
0x10d0   :  { %4070 = vmatpush1.bf16.msra.mxu1 %v7309_v43 }
0x10d1   :  { %4071 = vmatprep.subr.bf16.mxu1 %v7302_v15 }
0x110d   :  { %v8441_v40 = vpop.f32.mrf.mxu0 }
0x110f   :  { %v3497_v29 = vpop.f32.mrf.mxu0 }
0x1110   :  { %8461 = vmatprep.mubr.msk.f32.mxu0 %vm930_vm13, %v3497_v29  ;;  %v7301_v29 = vcombine.low %v3693_v61, %v3697_v52 }
0x1111   :  { %8462 = vmatmul.mubr.msk.f32.vlgmr.msra.gmra.mxu0 %vm930_vm13, %v8441_v40  ;;  %v3698_v40 = vld [vmem:[#allocation17 + $0xa8] sm:$0xff] }
0x1112   :  { %4103 = vmatpush1.bf16.msra.mxu0 %v7343_v60  ;;  %4072 = vmatpush1.bf16.msra.mxu1 %v7301_v29  ;;  %v7295_v60 = vcombine.low %v3686_v13, %v3690_v59  ;;  %v3731_v29 = vld [vmem:[#allocation17 + $0x1b0] sm:$0xff]  ;;  %v3720_v59 = vld [vmem:[#allocation17 + $0x158] sm:$0xff] }
0x1113   :  { %4104 = vmatprep.subr.bf16.mxu0 %v7336_v32  ;;  %4073 = vmatprep.subr.bf16.mxu1 %v7294_v1  ;;  %v3739_v32 = vld [vmem:[#allocation17 + $0x1f0] sm:$0xff] }
0x1114   :  { %v3719_v1 = vld [vmem:[#allocation17 + $0x150] sm:$0xff] }
0x1115   :  { %v8444_v45 = vpop.f32.mrf.mxu0 }
0x1116   :  { %4105 = vmatpush1.bf16.msra.mxu0 %v7335_v8  ;;  %4074 = vmatpush1.bf16.msra.mxu1 %v7293_v58  ;;  %v3735_v8 = vld [vmem:[#allocation17 + $0x1d0] sm:$0xff]  ;;  %v3724_v58 = vld [vmem:[#allocation17 + $0x178] sm:$0xff] }
0x1117   :  { %v3507_v50 = vpop.f32.mrf.mxu0  ;;  %4106 = vmatprep.subr.bf16.mxu0 %v7328_v53  ;;  %v7345_v16 = vcombine.low %v3735_v8, %v3739_v32  ;;  %4075 = vmatprep.subr.bf16.mxu1 %v7286_v31  ;;  %v7347_v53 = vcombine.low %v3736_v51, %v3740_v55  ;;  %v7332_v3 = vcombine.high %v3720_v59, %v3724_v58  ;;  %v3712_v31 = vld [vmem:[#allocation17 + $0x118] sm:$0xff]  ;;  %v3707_v51 = vld [vmem:[#allocation17 + $0xf0] sm:$0xff] }
0x1118   :  { %8464 = vmatprep.mubr.msk.f32.mxu0 %vm930_vm13, %v3507_v50  ;;  %v7304_v50 = vcombine.high %v3694_v57, %v3698_v40  ;;  %v3704_v55 = vld [vmem:[#allocation17 + $0xd8] sm:$0xff] }
0x1119   :  { %8465 = vmatmul.mubr.msk.f32.gmra.mxu0 %vm930_vm13, %v8444_v45  ;;  %v7303_v45 = vcombine.low %v3694_v57, %v3698_v40 }
0x111a   :  { %4107 = vmatpush1.bf16.msra.mxu0 %v7327_v9  ;;  %4134 = vmatprep.mubr.bf16.mxu0 %v9317_v41  ;;  %v7346_v9 = vcombine.high %v3735_v8, %v3739_v32  ;;  %v7331_v32 = vcombine.low %v3720_v59, %v3724_v58 }
0x111b   :  { %4108 = vmatprep.subr.bf16.mxu0 %v7320_v2  ;;  %4076 = vmatpush1.bf16.msra.mxu1 %v7285_v12  ;;  %v3402_v2 = vpop.f32.mrf.mxu1  ;;  %v3715_v12 = vld [vmem:[#allocation17 + $0x130] sm:$0xff] }
0x111c   :  { %4143 = vmatprep.subr.bf16.mxu1 %v7346_v9  ;;  %v3413_v35 = vadd.f32 %v3402_v2, %v2801_v36  ;;  %v3708_v9 = vld [vmem:[#allocation17 + $0xf8] sm:$0xff] }
0x111d   :  { %v3700_v2 = vld [vmem:[#allocation17 + $0xb8] sm:$0xff] }
0x111e   :  { %4109 = vmatpush1.bf16.msra.mxu0 %v7319_v37 }
0x111f   :  { %4110 = vmatprep.subr.bf16.mxu0 %v7312_v63 }
0x1122   :  { %4111 = vmatpush1.bf16.msra.mxu0 %v7311_v49  ;;  %v3215_v49 = vmax.f32 %v3013_v44, %v3211_v26  ;;  %v3622_v26 = vsel %vm930_vm13, %v10197_v10, 0.0 }
0x1123   :  { %4112 = vmatprep.subr.bf16.mxu0 %v7304_v50  ;;  %v3732_v50 = vld [vmem:[#allocation17 + $0x1b8] sm:$0xff] }
0x1124   :  { %v3417_v61 = vmax.f32 %v3215_v49, %v3413_v35  ;;  %v3687_v49 = vld [vmem:[#allocation17 + $0x50] sm:$0xff] }
0x1126   :  { %4113 = vmatpush1.bf16.msra.mxu0 %v7303_v45  ;;  %v3728_v45 = vld [vmem:[#allocation17 + $0x198] sm:$0xff] }
0x1127   :  { %4114 = vmatprep.subr.bf16.mxu0 %v7296_v62  ;;  %v7340_v13 = vcombine.high %v3728_v45, %v3732_v50  ;;  %v7339_v62 = vcombine.low %v3728_v45, %v3732_v50 }
0x112a   :  { %4115 = vmatpush1.bf16.msra.mxu0 %v7295_v60  ;;  %v7337_v60 = vcombine.low %v3727_v25, %v3731_v29 }
0x112b   :  { %4116 = vmatprep.subr.bf16.mxu0 %v7288_v14  ;;  %v7324_v14 = vcombine.high %v3712_v31, %v3716_v5 }
0x112e   :  { %4117 = vmatpush1.bf16.msra.mxu0 %v7287_v24  ;;  %v7322_v24 = vcombine.high %v3711_v38, %v3715_v12 }
0x112f   :  { %4184 = vmatprep.subr.bf16.mxu0 %v7348_v47  ;;  %v7323_v47 = vcombine.low %v3712_v31, %v3716_v5 }
0x11d1   :  { %v8463_v22 = vpop.f32.mrf.mxu0 }
0x11d2   :  { %v3614_v33 = vadd.f32 %v8463_v22, %v10432_v54  ;;  %v3621_v22 = vsel %vm930_vm13, %v10201_v6, 0.0 }
0x11d3   :  { %v3594_v34 = vpop.f32.mrf.mxu0  ;;  %v3623_v44 = vadd.f32 %v3622_v26, %v3621_v22  ;;  %v3645_v22 = vld [vmem:[%s10932_s11] sm:$0xff] }
0x11d4   :  { %v3618_v56 = vmax.f32 %v10568_v4, %v3614_v33  ;;  %v3613_v37 = vadd.f32 %v3594_v34, %v10435_v39  ;;  %v7316_v34 = vcombine.high %v3704_v55, %v3708_v9 }
0x11d6   :  { %v3617_v28 = vmax.f32 %v10574_v11, %v3613_v37  ;;  %v3696_v37 = vld [vmem:[#allocation17 + $0x98] sm:$0xff] }
0x11d8   :  { %v3635_v46 = vadd.f32 %v3618_v56, %v3617_v28  ;;  %v3699_v56 = vld [vmem:[#allocation17 + $0xb0] sm:$0xff]  ;;  %v3624_v28 = vsel %vm930_vm13, %v10222_v0, 0.0  ;;  %v3626_v0 = vsel %vm930_vm13, %v10207_v21, 0.0 }
0x11d9   :  { %v8466_v43 = vpop.f32.mrf.mxu0  ;;  %v3669_v21 = vld [vmem:[%s10932_s11 + $0xc0] sm:$0xff] }
0x11da   :  { %v3616_v54 = vadd.f32 %v8466_v43, %v10444_v19  ;;  %v7338_v19 = vcombine.high %v3727_v25, %v3731_v29  ;;  %v7308_v43 = vcombine.high %v3696_v37, %v3700_v2 }
0x11db   :  { %v3604_v63 = vpop.f32.mrf.mxu0 }
0x11dc   :  { %v3620_v7 = vmax.f32 %v10580_v30, %v3616_v54  ;;  %v3615_v17 = vadd.f32 %v3604_v63, %v2801_v36  ;;  %v3723_v30 = vld [vmem:[#allocation17 + $0x170] sm:$0xff]  ;;  %v3625_v54 = vadd.f32 %v3624_v28, %v3623_v44  ;;  %v3671_v44 = vld [vmem:[%s10932_s11 + $0xd0] sm:$0xff] }
0x11dd   :  { %v7330_v48 = vcombine.high %v3719_v1, %v3723_v30  ;;  %v7329_v8 = vcombine.low %v3719_v1, %v3723_v30  ;;  %v3695_v36 = vld [vmem:[#allocation17 + $0x90] sm:$0xff] }
0x11de   :  { %v3619_v4 = vmax.f32 %v3417_v61, %v3615_v17  ;;  %v7306_v6 = vcombine.high %v3695_v36, %v3699_v56  ;;  %v3691_v63 = vld [vmem:[#allocation17 + $0x70] sm:$0xff]  ;;  %v3688_v61 = vld [vmem:[#allocation17 + $0x58] sm:$0xff]  ;;  %v7305_v10 = vcombine.low %v3695_v36, %v3699_v56  ;;  %v7307_v17 = vcombine.low %v3696_v37, %v3700_v2 }
0x11df   :  { %v3650_v36 = vld [vmem:[%s10932_s11 + $0x28] sm:$0xff] }
0x11e0   :  { %v3636_v39 = vadd.f32 %v3635_v46, %v3619_v4  ;;  %v7315_v46 = vcombine.low %v3704_v55, %v3708_v9  ;;  %v7298_v4 = vcombine.high %v3687_v49, %v3691_v63 }
0x11e2   :  { %v3637_v52 = vadd.f32 %v3636_v39, %v3620_v7  ;;  %v3692_v7 = vld [vmem:[#allocation17 + $0x78] sm:$0xff] }
0x11e3   :  { %v7300_v39 = vcombine.high %v3688_v61, %v3692_v7  ;;  %v7299_v25 = vcombine.low %v3688_v61, %v3692_v7  ;;  %v3663_v7 = vld [vmem:[%s10932_s11 + $0x90] sm:$0xff] }
0x11e4   :  { %v3638_v57 = vrot.slane %v3637_v52, 4 }
0x11e6   :  { %v3639_v27 = vadd.f32 %v3638_v57, %v3637_v52  ;;  %v3679_v52 = vld [vmem:[#allocation17 + $0x10] sm:$0xff]  ;;  %v3627_v57 = vadd.f32 %v3626_v0, %v3625_v54  ;;  %v3668_v0 = vld [vmem:[%s10932_s11 + $0xb8] sm:$0xff] }
0x11e8   :  { %v3640_v15 = vrot.slane %v3639_v27, 2  ;;  %v3628_v50 = vrot.slane %v3627_v57, 4 }
0x11ea   :  { %v3641_v11 = vadd.f32 %v3640_v15, %v3639_v27  ;;  %v3683_v27 = vld [vmem:[#allocation17 + $0x30] sm:$0xff]  ;;  %v3680_v15 = vld [vmem:[#allocation17 + $0x18] sm:$0xff] }
0x11eb   :  { %v7290_v29 = vcombine.high %v3679_v52, %v3683_v27  ;;  %v7289_v1 = vcombine.low %v3679_v52, %v3683_v27 }
0x11ec   :  { %v3642_v40 = vrot.slane %v3641_v11, 1 }
0x11ee   :  { %v3643_v23 = vadd.f32 %v3642_v40, %v3641_v11  ;;  %v3684_v11 = vld [vmem:[#allocation17 + $0x38] sm:$0xff]  ;;  %v7297_v40 = vcombine.low %v3687_v49, %v3691_v63 }
0x11ef   :  { %v7292_v45 = vcombine.high %v3680_v15, %v3684_v11  ;;  %v7291_v30 = vcombine.low %v3680_v15, %v3684_v11  ;;  %v3655_v15 = vld [vmem:[%s10932_s11 + $0x50] sm:$0xff] }
0x11f0   :  { %v10600_v42 = vpack.c.bf16 %v3643_v23, %v3643_v23  ;;  %v3673_v23 = vld [vmem:[%s10932_s11 + $0xe0] sm:$0xff]  ;;  %v3659_v11 = vld [vmem:[%s10932_s11 + $0x70] sm:$0xff] }
0x11f1   :  { %v7374_v59 = vcombine.high %v3669_v21, %v3673_v23 }
0x11f2   :  { %4094 = vmatmul.mubr.bf16.vlgmr.msra.gmra.mxu1 %v10600_v42  ;;  %4135 = vmatmul.mubr.bf16.vlgmr.msra.gmra.mxu0 %v10600_v42 }
0x11f3   :  { %4144 = vmatpush1.bf16.msra.mxu1 %v7345_v16  ;;  %4185 = vmatpush1.bf16.msra.mxu0 %v7347_v53  ;;  %v3703_v16 = vld [vmem:[#allocation17 + $0xd0] sm:$0xff]  ;;  %v7321_v53 = vcombine.low %v3711_v38, %v3715_v12  ;;  %v3666_v38 = vld [vmem:[%s10932_s11 + $0xa8] sm:$0xff]  ;;  %v7373_v12 = vcombine.low %v3669_v21, %v3673_v23  ;;  %v7362_v21 = vcombine.high %v3655_v15, %v3659_v11  ;;  %v3647_v23 = vld [vmem:[%s10932_s11 + $0x10] sm:$0xff] }
0x11f4   :  { %4145 = vmatprep.subr.bf16.mxu1 %v7338_v19  ;;  %4186 = vmatprep.subr.bf16.mxu0 %v7340_v13  ;;  %v7314_v33 = vcombine.high %v3703_v16, %v3707_v51  ;;  %v7313_v35 = vcombine.low %v3703_v16, %v3707_v51  ;;  %v3670_v19 = vld [vmem:[%s10932_s11 + $0xc8] sm:$0xff] }
0x11f5   :  { %4175 = vmatprep.mubr.bf16.mxu1 %v9317_v41  ;;  %4216 = vmatprep.mubr.bf16.mxu0 %v9317_v41  ;;  %v3674_v13 = vld [vmem:[%s10932_s11 + $0xe8] sm:$0xff] }
0x11f6   :  { %v7376_v58 = vcombine.high %v3670_v19, %v3674_v13  ;;  %v7375_v31 = vcombine.low %v3670_v19, %v3674_v13  ;;  %v3654_v16 = vld [vmem:[%s10932_s11 + $0x48] sm:$0xff]  ;;  %v3651_v19 = vld [vmem:[%s10932_s11 + $0x30] sm:$0xff]  ;;  %v3648_v13 = vld [vmem:[%s10932_s11 + $0x18] sm:$0xff] }
0x11f7   :  { %4146 = vmatpush1.bf16.msra.mxu1 %v7337_v60  ;;  %4187 = vmatpush1.bf16.msra.mxu0 %v7339_v62  ;;  %v3661_v60 = vld [vmem:[%s10932_s11 + $0x80] sm:$0xff]  ;;  %v3629_v62 = vadd.f32 %v3628_v50, %v3627_v57  ;;  %v3658_v51 = vld [vmem:[%s10932_s11 + $0x68] sm:$0xff] }
0x11f8   :  { %4147 = vmatprep.subr.bf16.mxu1 %v7330_v48  ;;  %4188 = vmatprep.subr.bf16.mxu0 %v7332_v3  ;;  %v3665_v48 = vld [vmem:[%s10932_s11 + $0xa0] sm:$0xff]  ;;  %v3662_v3 = vld [vmem:[%s10932_s11 + $0x88] sm:$0xff]  ;;  %v7359_v37 = vcombine.low %v3654_v16, %v3658_v51 }
0x11f9   :  { %v7366_v5 = vcombine.high %v3661_v60, %v3665_v48  ;;  %v7365_v55 = vcombine.low %v3661_v60, %v3665_v48  ;;  %v7367_v9 = vcombine.low %v3662_v3, %v3666_v38 }
0x11fb   :  { %4148 = vmatpush1.bf16.msra.mxu1 %v7329_v8  ;;  %4189 = vmatpush1.bf16.msra.mxu0 %v7331_v32  ;;  %v7368_v8 = vcombine.high %v3662_v3, %v3666_v38  ;;  %v3653_v32 = vld [vmem:[%s10932_s11 + $0x40] sm:$0xff]  ;;  %v8492_v3 = vld [vmem:[#allocation20 + $0xe4] ss:$16 sps:$4 sm:$0xff]  }
0x11fc   :  { %4149 = vmatprep.subr.bf16.mxu1 %v7322_v24  ;;  %4190 = vmatprep.subr.bf16.mxu0 %v7324_v14  ;;  %v3630_v24 = vrot.slane %v3629_v62, 2  ;;  %v3657_v14 = vld [vmem:[%s10932_s11 + $0x60] sm:$0xff]  ;;  %v8495_v38 = vld [vmem:[#allocation20 + $0x2e4] ss:$16 sps:$4 sm:$0xff]  }
0x11fd   :  { %v7357_v56 = vcombine.low %v3653_v32, %v3657_v14 }
0x11ff   :  { %4150 = vmatpush1.bf16.msra.mxu1 %v7321_v53  ;;  %4191 = vmatpush1.bf16.msra.mxu0 %v7323_v47  ;;  %v7358_v53 = vcombine.high %v3653_v32, %v3657_v14  ;;  %v7360_v47 = vcombine.high %v3654_v16, %v3658_v51  ;;  %v8499_v32 = vld [vmem:[#allocation20 + $0x2c0] ss:$16 sps:$4 sm:$0xff]   ;;  %v8507_v14 = vld [vmem:[#allocation20 + $0x2a4] ss:$16 sps:$4 sm:$0xff]  }
0x1200   :  { %4151 = vmatprep.subr.bf16.mxu1 %v7314_v33  ;;  %4192 = vmatprep.subr.bf16.mxu0 %v7316_v34  ;;  %v3631_v33 = vadd.f32 %v3630_v24, %v3629_v62  ;;  %v3649_v34 = vld [vmem:[%s10932_s11 + $0x20] sm:$0xff]  ;;  %v7353_v62 = vcombine.low %v3647_v23, %v3651_v19  ;;  %v8504_v24 = vld [vmem:[#allocation20 + $0xa4] ss:$16 sps:$4 sm:$0xff]   ;;  %v8502_v16 = vld [vmem:[#allocation20 + $0xa0] ss:$16 sps:$4 sm:$0xff]  }
0x1201   :  { %v7350_v2 = vcombine.high %v3645_v22, %v3649_v34  ;;  %v8505_v51 = vld [vmem:[#allocation20 + $0x2a0] ss:$16 sps:$4 sm:$0xff]  }
0x1202   :  { %v3632_v28 = vrot.slane %v3631_v33, 1 }
0x1203   :  { %4152 = vmatpush1.bf16.msra.mxu1 %v7313_v35  ;;  %4193 = vmatpush1.bf16.msra.mxu0 %v7315_v46  ;;  %v3675_v35 = vld [vmem:[%s10932_s11 + $0xf0] sm:$0xff]  ;;  %v3672_v46 = vld [vmem:[%s10932_s11 + $0xd8] sm:$0xff] }
0x1204   :  { %4153 = vmatprep.subr.bf16.mxu1 %v7306_v6  ;;  %4194 = vmatprep.subr.bf16.mxu0 %v7308_v43  ;;  %v3676_v6 = vld [vmem:[%s10932_s11 + $0xf8] sm:$0xff]  ;;  %v7349_v43 = vcombine.low %v3645_v22, %v3649_v34  ;;  %v3633_v54 = vadd.f32 %v3632_v28, %v3631_v33  ;;  %v7378_v63 = vcombine.high %v3671_v44, %v3675_v35 }
0x1205   :  { %v7380_v61 = vcombine.high %v3672_v46, %v3676_v6  ;;  %v8516_v22 = vld [vmem:[#allocation20 + $0x64] ss:$16 sps:$4 sm:$0xff]   ;;  %v8514_v34 = vld [vmem:[#allocation20 + $0x60] ss:$16 sps:$4 sm:$0xff]  }
0x1206   :  { %v3634_v52 = vpack.c.bf16 %v3633_v54, %v3633_v54  ;;  %v8519_v33 = vld [vmem:[#allocation20 + $0x264] ss:$16 sps:$4 sm:$0xff]  }
0x1207   :  { %4154 = vmatpush1.bf16.msra.mxu1 %v7305_v10  ;;  %4195 = vmatpush1.bf16.msra.mxu0 %v7307_v17  ;;  %v3667_v10 = vld [vmem:[%s10932_s11 + $0xb0] sm:$0xff]  ;;  %v3664_v17 = vld [vmem:[%s10932_s11 + $0x98] sm:$0xff] }
0x1208   :  { %4155 = vmatprep.subr.bf16.mxu1 %v7298_v4  ;;  %4196 = vmatprep.subr.bf16.mxu0 %v7300_v39  ;;  %v7377_v4 = vcombine.low %v3671_v44, %v3675_v35  ;;  %v7379_v39 = vcombine.low %v3672_v46, %v3676_v6  ;;  %v7370_v57 = vcombine.high %v3663_v7, %v3667_v10  ;;  %v8531_v28 = vld [vmem:[#allocation20 + $0x224] ss:$16 sps:$4 sm:$0xff]   ;;  %v8526_v44 = vld [vmem:[#allocation20 + $0x20] ss:$16 sps:$4 sm:$0xff]  }
0x1209   :  { %v7372_v27 = vcombine.high %v3664_v17, %v3668_v0  ;;  %v8529_v35 = vld [vmem:[#allocation20 + $0x220] ss:$16 sps:$4 sm:$0xff]   ;;  %v8534_v46 = vld [vmem:[#allocation20 + $0x4] ss:$16 sps:$4 sm:$0xff]  }
0x120a   :  { %v8537_v6 = vld [vmem:[#allocation20 + $0x204] ss:$16 sps:$4 sm:$0xff]  }
0x120b   :  { %4156 = vmatpush1.bf16.msra.mxu1 %v7297_v40  ;;  %4197 = vmatpush1.bf16.msra.mxu0 %v7299_v25  ;;  %v3656_v40 = vld [vmem:[%s10932_s11 + $0x58] sm:$0xff] }
0x120c   :  { %4157 = vmatprep.subr.bf16.mxu1 %v7290_v29  ;;  %4198 = vmatprep.subr.bf16.mxu0 %v7292_v45  ;;  %v3660_v25 = vld [vmem:[%s10932_s11 + $0x78] sm:$0xff]  ;;  %v7369_v29 = vcombine.low %v3663_v7, %v3667_v10  ;;  %v7371_v45 = vcombine.low %v3664_v17, %v3668_v0 }
0x120d   :  { %v7364_v50 = vcombine.high %v3656_v40, %v3660_v25  ;;  %v8540_v54 = vld [vmem:[#allocation20 + $0x1e4] ss:$16 sps:$4 sm:$0xff]   ;;  %v8541_v7 = vld [vmem:[#allocation20 + $0x3e0] ss:$16 sps:$4 sm:$0xff]  }
0x120e   :  { %v8546_v10 = vld [vmem:[#allocation20 + $0x1c4] ss:$16 sps:$4 sm:$0xff]   ;;  %v8544_v0 = vld [vmem:[#allocation20 + $0x1c0] ss:$16 sps:$4 sm:$0xff]  }
0x120f   :  { %4158 = vmatpush1.bf16.msra.mxu1 %v7289_v1  ;;  %4199 = vmatpush1.bf16.msra.mxu0 %v7291_v30  ;;  %v3652_v1 = vld [vmem:[%s10932_s11 + $0x38] sm:$0xff]  ;;  %v7361_v30 = vcombine.low %v3655_v15, %v3659_v11 }
0x1210   :  { %4396 = vmatprep.subr.bf16.mxu1 %v7374_v59  ;;  %4437 = vmatprep.subr.bf16.mxu0 %v7376_v58  ;;  %v7363_v59 = vcombine.low %v3656_v40, %v3660_v25  ;;  %v7354_v58 = vcombine.high %v3647_v23, %v3651_v19  ;;  %v7356_v60 = vcombine.high %v3648_v13, %v3652_v1  ;;  %v8549_v17 = vld [vmem:[#allocation20 + $0x3c4] ss:$16 sps:$4 sm:$0xff]   ;;  %v8556_v40 = vld [vmem:[#allocation20 + $0x180] ss:$16 sps:$4 sm:$0xff]  }
0x1211   :  { %v7355_v48 = vcombine.low %v3648_v13, %v3652_v1  ;;  %v8558_v15 = vld [vmem:[#allocation20 + $0x184] ss:$16 sps:$4 sm:$0xff]   ;;  %v8559_v25 = vld [vmem:[#allocation20 + $0x380] ss:$16 sps:$4 sm:$0xff]  }
0x1212   :  { %4176 = vmatmul.mubr.bf16.vlgmr.msra.gmra.mxu1 %v10600_v42  ;;  %4217 = vmatmul.mubr.bf16.vlgmr.msra.gmra.mxu0 %v10600_v42  ;;  %v3646_v42 = vld [vmem:[%s10932_s11 + $0x8] sm:$0xff] }
0x1213   :  { %4397 = vmatpush1.bf16.msra.mxu1 %v7373_v12  ;;  %4438 = vmatpush1.bf16.msra.mxu0 %v7375_v31  ;;  %v7352_v26 = vcombine.high %v3646_v42, %v3650_v36  ;;  %v7351_v49 = vcombine.low %v3646_v42, %v3650_v36  ;;  %v8490_v12 = vld [vmem:[#allocation20 + $0xe0] ss:$16 sps:$4 sm:$0xff]   ;;  %v8498_v31 = vld [vmem:[#allocation20 + $0xc4] ss:$16 sps:$4 sm:$0xff]  }
0x1214   :  { %4398 = vmatprep.subr.bf16.mxu1 %v7366_v5  ;;  %4439 = vmatprep.subr.bf16.mxu0 %v7368_v8  ;;  %v8501_v5 = vld [vmem:[#allocation20 + $0x2c4] ss:$16 sps:$4 sm:$0xff]   ;;  %v8496_v8 = vld [vmem:[#allocation20 + $0xc0] ss:$16 sps:$4 sm:$0xff]  }
0x1215   :  { %4420 = vmatprep.mubr.bf16.mxu1 %v9317_v41  ;;  %4461 = vmatprep.mubr.bf16.mxu0 %v9317_v41  ;;  %v8517_v42 = vld [vmem:[#allocation20 + $0x260] ss:$16 sps:$4 sm:$0xff]   ;;  %v8522_v36 = vld [vmem:[#allocation20 + $0x44] ss:$16 sps:$4 sm:$0xff]  }
0x1216   :  { %v8561_v11 = vld [vmem:[#allocation20 + $0x384] ss:$16 sps:$4 sm:$0xff]   ;;  %v8568_v13 = vld [vmem:[#allocation20 + $0x140] ss:$16 sps:$4 sm:$0xff]  }
0x1217   :  { %4399 = vmatpush1.bf16.msra.mxu1 %v7365_v55  ;;  %4440 = vmatpush1.bf16.msra.mxu0 %v7367_v9  ;;  %v8510_v55 = vld [vmem:[#allocation20 + $0x84] ss:$16 sps:$4 sm:$0xff]   ;;  %v8571_v1 = vld [vmem:[#allocation20 + $0x340] ss:$16 sps:$4 sm:$0xff]  }
0x1218   :  { %4400 = vmatprep.subr.bf16.mxu1 %v7358_v53  ;;  %4441 = vmatprep.subr.bf16.mxu0 %v7360_v47  ;;  %v8513_v9 = vld [vmem:[#allocation20 + $0x284] ss:$16 sps:$4 sm:$0xff]   ;;  %v8508_v53 = vld [vmem:[#allocation20 + $0x80] ss:$16 sps:$4 sm:$0xff]  }
0x1219   :  { %v8511_v47 = vld [vmem:[#allocation20 + $0x280] ss:$16 sps:$4 sm:$0xff]   ;;  %v8570_v23 = vld [vmem:[#allocation20 + $0x144] ss:$16 sps:$4 sm:$0xff]  }
0x121a   :  { %v8573_v19 = vld [vmem:[#allocation20 + $0x344] ss:$16 sps:$4 sm:$0xff]  }
0x121b   :  { %4401 = vmatpush1.bf16.msra.mxu1 %v7357_v56  ;;  %4442 = vmatpush1.bf16.msra.mxu0 %v7359_v37  ;;  %v8525_v56 = vld [vmem:[#allocation20 + $0x244] ss:$16 sps:$4 sm:$0xff]   ;;  %v8520_v37 = vld [vmem:[#allocation20 + $0x40] ss:$16 sps:$4 sm:$0xff]  }
0x121c   :  { %4402 = vmatprep.subr.bf16.mxu1 %v7350_v2  ;;  %4443 = vmatprep.subr.bf16.mxu0 %v7352_v26  ;;  %v8523_v2 = vld [vmem:[#allocation20 + $0x240] ss:$16 sps:$4 sm:$0xff]   ;;  %v8528_v26 = vld [vmem:[#allocation20 + $0x24] ss:$16 sps:$4 sm:$0xff]  }
0x121f   :  { %4403 = vmatpush1.bf16.msra.mxu1 %v7349_v43  ;;  %4444 = vmatpush1.bf16.msra.mxu0 %v7351_v49  ;;  %v8532_v43 = vld [vmem:[#allocation20] ss:$16 sps:$4 sm:$0xff]  }
0x1220   :  { %4478 = vmatprep.subr.bf16.mxu1 %v7378_v63  ;;  %4519 = vmatprep.subr.bf16.mxu0 %v7380_v61  ;;  %v8535_v49 = vld [vmem:[#allocation20 + $0x200] ss:$16 sps:$4 sm:$0xff]   ;;  %v8543_v63 = vld [vmem:[#allocation20 + $0x3e4] ss:$16 sps:$4 sm:$0xff]  }
0x1221   :  { %v8538_v61 = vld [vmem:[#allocation20 + $0x1e0] ss:$16 sps:$4 sm:$0xff]  }
0x1222   :  { %7381 = vmatmul.mubr.msk.bf16.vlgmr.msra.gmra.mxu1 %vm930_vm13, %v3634_v52  ;;  %7382 = vmatmul.mubr.msk.bf16.vlgmr.msra.gmra.mxu0 %vm930_vm13, %v3634_v52 }
0x1223   :  { %4479 = vmatpush1.bf16.msra.mxu1 %v7377_v4  ;;  %4520 = vmatpush1.bf16.msra.mxu0 %v7379_v39  ;;  %v8547_v4 = vld [vmem:[#allocation20 + $0x3c0] ss:$16 sps:$4 sm:$0xff]   ;;  %v8552_v39 = vld [vmem:[#allocation20 + $0x1a4] ss:$16 sps:$4 sm:$0xff]  }
0x1224   :  { %4480 = vmatprep.subr.bf16.mxu1 %v7370_v57  ;;  %4521 = vmatprep.subr.bf16.mxu0 %v7372_v27  ;;  %v8550_v57 = vld [vmem:[#allocation20 + $0x1a0] ss:$16 sps:$4 sm:$0xff]  }
0x1225   :  { %4502 = vmatprep.mubr.bf16.mxu1 %v9317_v41  ;;  %4543 = vmatprep.mubr.bf16.mxu0 %v9317_v41  ;;  %v8493_v41 = vld [vmem:[#allocation20 + $0x2e0] ss:$16 sps:$4 sm:$0xff]  }
0x1226   :  { %v8553_v27 = vld [vmem:[#allocation20 + $0x3a0] ss:$16 sps:$4 sm:$0xff]  }
0x1227   :  { %4481 = vmatpush1.bf16.msra.mxu1 %v7369_v29  ;;  %4522 = vmatpush1.bf16.msra.mxu0 %v7371_v45  ;;  %v8564_v29 = vld [vmem:[#allocation20 + $0x164] ss:$16 sps:$4 sm:$0xff]  }
0x1228   :  { %4482 = vmatprep.subr.bf16.mxu1 %v7362_v21  ;;  %4523 = vmatprep.subr.bf16.mxu0 %v7364_v50  ;;  %v8567_v45 = vld [vmem:[#allocation20 + $0x364] ss:$16 sps:$4 sm:$0xff]   ;;  %v8562_v21 = vld [vmem:[#allocation20 + $0x160] ss:$16 sps:$4 sm:$0xff]  }
0x1229   :  { %v8565_v50 = vld [vmem:[#allocation20 + $0x360] ss:$16 sps:$4 sm:$0xff]  }
0x122b   :  { %4483 = vmatpush1.bf16.msra.mxu1 %v7361_v30  ;;  %4524 = vmatpush1.bf16.msra.mxu0 %v7363_v59  ;;  %v8576_v30 = vld [vmem:[#allocation20 + $0x124] ss:$16 sps:$4 sm:$0xff]  }
0x122c   :  { %4484 = vmatprep.subr.bf16.mxu1 %v7354_v58  ;;  %4525 = vmatprep.subr.bf16.mxu0 %v7356_v60  ;;  %v8579_v59 = vld [vmem:[#allocation20 + $0x324] ss:$16 sps:$4 sm:$0xff]   ;;  %v8574_v58 = vld [vmem:[#allocation20 + $0x120] ss:$16 sps:$4 sm:$0xff]  }
0x122d   :  { %v8577_v60 = vld [vmem:[#allocation20 + $0x320] ss:$16 sps:$4 sm:$0xff]  }
0x122f   :  { %4485 = vmatpush1.bf16.msra.mxu1 %v7353_v62  ;;  %4526 = vmatpush1.bf16.msra.mxu0 %v7355_v48  ;;  %v8582_v62 = vld [vmem:[#allocation20 + $0x104] ss:$16 sps:$4 sm:$0xff]  }
0x1230   :  { %6169 = vmatprep.subr.bf16.mxu1 %v8492_v3  ;;  %6210 = vmatprep.subr.bf16.mxu0 %v8495_v38  ;;  %v8585_v48 = vld [vmem:[#allocation20 + $0x304] ss:$16 sps:$4 sm:$0xff]   ;;  %v8580_v3 = vld [vmem:[#allocation20 + $0x100] ss:$16 sps:$4 sm:$0xff]  }
0x1231   :  { %v8583_v38 = vld [vmem:[#allocation20 + $0x300] ss:$16 sps:$4 sm:$0xff]  }
0x1232   :  { %7383 = vmatmul.mubr.msk.bf16.vlgmr.msra.gmra.mxu1 %vm930_vm13, %v3634_v52  ;;  %7384 = vmatmul.mubr.msk.bf16.vlgmr.msra.gmra.mxu0 %vm930_vm13, %v3634_v52  ;;  %v8555_v52 = vld [vmem:[#allocation20 + $0x3a4] ss:$16 sps:$4 sm:$0xff]  }
0x1233   :  { %6170 = vmatpush1.bf16.msra.mxu1 %v8490_v12  ;;  %6211 = vmatpush1.bf16.msra.mxu0 %v8493_v41  ;;  %v8588_v12 = vld [vmem:[#allocation20 + $0x4e4] ss:$16 sps:$4 sm:$0xff]  }
0x1234   :  { %6171 = vmatprep.subr.bf16.mxu1 %v8498_v31  ;;  %6212 = vmatprep.subr.bf16.mxu0 %v8501_v5  ;;  %v8591_v41 = vld [vmem:[#allocation20 + $0x6e4] ss:$16 sps:$4 sm:$0xff]  }
0x1237   :  { %6172 = vmatpush1.bf16.msra.mxu1 %v8496_v8  ;;  %6213 = vmatpush1.bf16.msra.mxu0 %v8499_v32 }
0x1238   :  { %6173 = vmatprep.subr.bf16.mxu1 %v8504_v24  ;;  %6214 = vmatprep.subr.bf16.mxu0 %v8507_v14 }
0x123b   :  { %6174 = vmatpush1.bf16.msra.mxu1 %v8502_v16  ;;  %6215 = vmatpush1.bf16.msra.mxu0 %v8505_v51 }
0x123c   :  { %6175 = vmatprep.subr.bf16.mxu1 %v8510_v55  ;;  %6216 = vmatprep.subr.bf16.mxu0 %v8513_v9 }
0x123f   :  { %6176 = vmatpush1.bf16.msra.mxu1 %v8508_v53  ;;  %6217 = vmatpush1.bf16.msra.mxu0 %v8511_v47 }
0x1240   :  { %6177 = vmatprep.subr.bf16.mxu1 %v8516_v22  ;;  %6218 = vmatprep.subr.bf16.mxu0 %v8519_v33 }
0x1243   :  { %6178 = vmatpush1.bf16.msra.mxu1 %v8514_v34  ;;  %6219 = vmatpush1.bf16.msra.mxu0 %v8517_v42 }
0x1244   :  { %6179 = vmatprep.subr.bf16.mxu1 %v8522_v36  ;;  %6220 = vmatprep.subr.bf16.mxu0 %v8525_v56  ;;  %v4552_v36 = vld [vmem:[#allocation19] sm:$0xff] }
0x1245   :  { %v4553_v56 = vmul.f32 32.0, %v4552_v36 }
0x1247   :  { %6180 = vmatpush1.bf16.msra.mxu1 %v8520_v37  ;;  %6221 = vmatpush1.bf16.msra.mxu0 %v8523_v2  ;;  %v4565_v37 = vsub.s32 2, %v9534_v18  ;;  %v10730_v2 = vsub.s32 1, %v9534_v18 }
0x1248   :  { %6181 = vmatprep.subr.bf16.mxu1 %v8528_v26  ;;  %6222 = vmatprep.subr.bf16.mxu0 %v8531_v28  ;;  %v4569_v26 = vsub.s32 3, %v9534_v18 }
0x124b   :  { %6182 = vmatpush1.bf16.msra.mxu1 %v8526_v44  ;;  %6223 = vmatpush1.bf16.msra.mxu0 %v8529_v35  ;;  %v4558_v44 = vrot.slane %v4553_v56, %v9537_v20 }
0x124c   :  { %6183 = vmatprep.subr.bf16.mxu1 %v8534_v46  ;;  %6224 = vmatprep.subr.bf16.mxu0 %v8537_v6  ;;  %v4566_v46 = vrot.slane %v4553_v56, %v4565_v37 }
0x124f   :  { %6184 = vmatpush1.bf16.msra.mxu1 %v8532_v43  ;;  %6225 = vmatpush1.bf16.msra.mxu0 %v8535_v49  ;;  %v4562_v49 = vrot.slane %v4553_v56, %v10730_v2 }
0x1250   :  { %6185 = vmatprep.subr.bf16.mxu1 %v8540_v54  ;;  %6226 = vmatprep.subr.bf16.mxu0 %v8543_v63  ;;  %v4570_v54 = vrot.slane %v4553_v56, %v4569_v26 }
0x1253   :  { %6186 = vmatpush2.bf16.msra.mxu1 %v8538_v61  ;;  %6227 = vmatpush2.bf16.msra.mxu0 %v8541_v7 }
0x1254   :  { %6187 = vmatprep.subr.bf16.mxu1 %v8546_v10  ;;  %6228 = vmatprep.subr.bf16.mxu0 %v8549_v17 }
0x1257   :  { %6188 = vmatpush2.bf16.msra.mxu1 %v8544_v0  ;;  %6229 = vmatpush2.bf16.msra.mxu0 %v8547_v4 }
0x1258   :  { %6189 = vmatprep.subr.bf16.mxu1 %v8552_v39  ;;  %6230 = vmatprep.subr.bf16.mxu0 %v8555_v52 }
0x125b   :  { %6190 = vmatpush2.bf16.msra.mxu1 %v8550_v57  ;;  %6231 = vmatpush2.bf16.msra.mxu0 %v8553_v27 }
0x125c   :  { %6191 = vmatprep.subr.bf16.mxu1 %v8558_v15  ;;  %6232 = vmatprep.subr.bf16.mxu0 %v8561_v11 }
0x125f   :  { %6192 = vmatpush2.bf16.msra.mxu1 %v8556_v40  ;;  %6233 = vmatpush2.bf16.msra.mxu0 %v8559_v25  ;;  %v8586_v25 = vld [vmem:[#allocation20 + $0x4e0] ss:$16 sps:$4 sm:$0xff]  }
0x1260   :  { %6193 = vmatprep.subr.bf16.mxu1 %v8564_v29  ;;  %6234 = vmatprep.subr.bf16.mxu0 %v8567_v45  ;;  %v8589_v29 = vld [vmem:[#allocation20 + $0x6e0] ss:$16 sps:$4 sm:$0xff]  }
0x1263   :  { %6194 = vmatpush2.bf16.msra.mxu1 %v8562_v21  ;;  %6235 = vmatpush2.bf16.msra.mxu0 %v8565_v50  ;;  %v8594_v50 = vld [vmem:[#allocation20 + $0x4c4] ss:$16 sps:$4 sm:$0xff]  }
0x1264   :  { %6195 = vmatprep.subr.bf16.mxu1 %v8570_v23  ;;  %6236 = vmatprep.subr.bf16.mxu0 %v8573_v19  ;;  %v8597_v23 = vld [vmem:[#allocation20 + $0x6c4] ss:$16 sps:$4 sm:$0xff]   ;;  %v8592_v19 = vld [vmem:[#allocation20 + $0x4c0] ss:$16 sps:$4 sm:$0xff]  }
0x1267   :  { %6196 = vmatpush2.bf16.msra.mxu1 %v8568_v13  ;;  %6237 = vmatpush2.bf16.msra.mxu0 %v8571_v1  ;;  %v8595_v13 = vld [vmem:[#allocation20 + $0x6c0] ss:$16 sps:$4 sm:$0xff]   ;;  %v4573_v1 = vsub.s32 4, %v9534_v18 }
0x1268   :  { %6197 = vmatprep.subr.bf16.mxu1 %v8576_v30  ;;  %6238 = vmatprep.subr.bf16.mxu0 %v8579_v59  ;;  %v4581_v30 = vsub.s32 6, %v9534_v18  ;;  %v8600_v59 = vld [vmem:[#allocation20 + $0x4a4] ss:$16 sps:$4 sm:$0xff]  }
0x126b   :  { %6198 = vmatpush2.bf16.msra.mxu1 %v8574_v58  ;;  %6239 = vmatpush2.bf16.msra.mxu0 %v8577_v60  ;;  %v8603_v58 = vld [vmem:[#allocation20 + $0x6a4] ss:$16 sps:$4 sm:$0xff]   ;;  %v4577_v60 = vsub.s32 5, %v9534_v18 }
0x126c   :  { %6199 = vmatprep.subr.bf16.mxu1 %v8582_v62  ;;  %6240 = vmatprep.subr.bf16.mxu0 %v8585_v48  ;;  %v4585_v62 = vsub.s32 7, %v9534_v18  ;;  %v4574_v48 = vrot.slane %v4553_v56, %v4573_v1  ;;  %v8645_v1 = vld [vmem:[#allocation20 + $0x7c4] ss:$16 sps:$4 sm:$0xff]  }
0x126f   :  { %6200 = vmatpush2.bf16.msra.mxu1 %v8580_v3  ;;  %6241 = vmatpush2.bf16.msra.mxu0 %v8583_v38  ;;  %v4582_v3 = vrot.slane %v4553_v56, %v4581_v30  ;;  %v8598_v38 = vld [vmem:[#allocation20 + $0x4a0] ss:$16 sps:$4 sm:$0xff]  }
0x1270   :  { %6251 = vmatprep.subr.bf16.mxu1 %v8588_v12  ;;  %6292 = vmatprep.subr.bf16.mxu0 %v8591_v41  ;;  %v8640_v30 = vld [vmem:[#allocation20 + $0x5c0] ss:$16 sps:$4 sm:$0xff]  }
0x12b2   :  { %v4095_v31 = vpop.f32.mrf.mxu1  ;;  %v4136_v5 = vpop.f32.mrf.mxu0 }
0x12b4   :  { %v4097_v8 = vpop.f32.mrf.mxu1  ;;  %v4138_v32 = vpop.f32.mrf.mxu0 }
0x12b6   :  { %v4099_v24 = vpop.f32.mrf.mxu1  ;;  %v4140_v14 = vpop.f32.mrf.mxu0 }
0x12b7   :  { %v4578_v24 = vrot.slane %v4553_v56, %v4577_v60  ;;  %v4586_v14 = vrot.slane %v4553_v56, %v4585_v62  ;;  %v8651_v60 = vld [vmem:[#allocation20 + $0x7a4] ss:$16 sps:$4 sm:$0xff]   ;;  %v8646_v62 = vld [vmem:[#allocation20 + $0x5a0] ss:$16 sps:$4 sm:$0xff]  }
0x12b8   :  { %v4100_v16 = vpop.f32.mrf.mxu1  ;;  %v4141_v51 = vpop.f32.mrf.mxu0 }
0x12b9   :  { %v8609_v16 = vld [vmem:[#allocation20 + $0x684] ss:$16 sps:$4 sm:$0xff]  }
0x12d2   :  { %v10720_v55 = vpop.f32.mrf.mxu1  ;;  %v10722_v9 = vpop.f32.mrf.mxu0 }
0x12d4   :  { %v10724_v53 = vpop.f32.mrf.mxu1  ;;  %v10726_v47 = vpop.f32.mrf.mxu0 }
0x12d6   :  { %v4181_v22 = vpop.f32.mrf.mxu1  ;;  %v4222_v33 = vpop.f32.mrf.mxu0 }
0x12d8   :  { %v4182_v34 = vpop.f32.mrf.mxu1  ;;  %v4223_v42 = vpop.f32.mrf.mxu0 }
0x12e2   :  { %v4422_v28 = vpop.f32.mrf.mxu1  ;;  %v4463_v35 = vpop.f32.mrf.mxu0 }
0x12e3   :  { %v4423_v6 = vadd.f32 %v4422_v28, %v4095_v31  ;;  %v4464_v43 = vadd.f32 %v4463_v35, %v4136_v5  ;;  %v8601_v31 = vld [vmem:[#allocation20 + $0x6a0] ss:$16 sps:$4 sm:$0xff]   ;;  %v8606_v5 = vld [vmem:[#allocation20 + $0x484] ss:$16 sps:$4 sm:$0xff]  }
0x12e4   :  { %v4424_v63 = vpop.f32.mrf.mxu1  ;;  %v4465_v61 = vpop.f32.mrf.mxu0  ;;  %v8604_v28 = vld [vmem:[#allocation20 + $0x480] ss:$16 sps:$4 sm:$0xff]   ;;  %v8612_v35 = vld [vmem:[#allocation20 + $0x464] ss:$16 sps:$4 sm:$0xff]  }
0x12e5   :  { %v4425_v7 = vadd.f32 %v4424_v63, %v4097_v8  ;;  %v4466_v10 = vadd.f32 %v4465_v61, %v4138_v32  ;;  %v4595_v17 = vadd.f32 %v4558_v44, %v4423_v6  ;;  %v4597_v0 = vadd.f32 %v4566_v46, %v4464_v43  ;;  %v8615_v6 = vld [vmem:[#allocation20 + $0x664] ss:$16 sps:$4 sm:$0xff]  }
0x12e6   :  { %v4426_v4 = vpop.f32.mrf.mxu1  ;;  %v4467_v39 = vpop.f32.mrf.mxu0  ;;  %v8618_v61 = vld [vmem:[#allocation20 + $0x444] ss:$16 sps:$4 sm:$0xff]  }
0x12e7   :  { %v4596_v52 = vadd.f32 %v4562_v49, %v4425_v7  ;;  %v4598_v57 = vadd.f32 %v4570_v54, %v4466_v10  ;;  %v10743_v45 = vpack.c.bf16 %v4595_v17, %v4595_v17  ;;  %v10745_v21 = vpack.c.bf16 %v4597_v0, %v4597_v0  ;;  %v8621_v7 = vld [vmem:[#allocation20 + $0x644] ss:$16 sps:$4 sm:$0xff]   ;;  %v8616_v10 = vld [vmem:[#allocation20 + $0x440] ss:$16 sps:$4 sm:$0xff]  }
0x12e8   :  { %v4427_v27 = vpop.f32.mrf.mxu1  ;;  %v4468_v15 = vpop.f32.mrf.mxu0  ;;  %v8619_v17 = vld [vmem:[#allocation20 + $0x640] ss:$16 sps:$4 sm:$0xff]   ;;  %v8624_v0 = vld [vmem:[#allocation20 + $0x424] ss:$16 sps:$4 sm:$0xff]  }
0x12e9   :  { %v10739_v11 = vpack.c.bf16 %v4596_v52, %v4596_v52  ;;  %v10741_v40 = vpack.c.bf16 %v4598_v57, %v4598_v57  ;;  %v8627_v4 = vld [vmem:[#allocation20 + $0x624] ss:$16 sps:$4 sm:$0xff]   ;;  %v8622_v39 = vld [vmem:[#allocation20 + $0x420] ss:$16 sps:$4 sm:$0xff]  }
0x12ea   :  { %v8625_v52 = vld [vmem:[#allocation20 + $0x620] ss:$16 sps:$4 sm:$0xff]   ;;  %v8630_v57 = vld [vmem:[#allocation20 + $0x404] ss:$16 sps:$4 sm:$0xff]  }
0x12eb   :  { %6201 = vmatprep.mubr.bf16.mxu1 %v10739_v11  ;;  %6242 = vmatprep.mubr.bf16.mxu0 %v10741_v40  ;;  %v8633_v27 = vld [vmem:[#allocation20 + $0x604] ss:$16 sps:$4 sm:$0xff]   ;;  %v8628_v15 = vld [vmem:[#allocation20 + $0x400] ss:$16 sps:$4 sm:$0xff]  }
0x12ec   :  { %6202 = vmatmul.mubr.bf16.vlgmr.msra.gmra.mxu1 %v10743_v45  ;;  %6243 = vmatmul.mubr.bf16.vlgmr.msra.gmra.mxu0 %v10745_v21 }
0x12ed   :  { %6252 = vmatpush1.bf16.msra.mxu1 %v8586_v25  ;;  %6293 = vmatpush1.bf16.msra.mxu0 %v8589_v29  ;;  %v8631_v25 = vld [vmem:[#allocation20 + $0x600] ss:$16 sps:$4 sm:$0xff]   ;;  %v8636_v29 = vld [vmem:[#allocation20 + $0x5e4] ss:$16 sps:$4 sm:$0xff]  }
0x12ee   :  { %6253 = vmatprep.subr.bf16.mxu1 %v8594_v50  ;;  %6294 = vmatprep.subr.bf16.mxu0 %v8597_v23  ;;  %v8639_v50 = vld [vmem:[#allocation20 + $0x7e4] ss:$16 sps:$4 sm:$0xff]   ;;  %v8634_v23 = vld [vmem:[#allocation20 + $0x5e0] ss:$16 sps:$4 sm:$0xff]  }
0x12f1   :  { %6254 = vmatpush1.bf16.msra.mxu1 %v8592_v19  ;;  %6295 = vmatpush1.bf16.msra.mxu0 %v8595_v13  ;;  %v8637_v19 = vld [vmem:[#allocation20 + $0x7e0] ss:$16 sps:$4 sm:$0xff]   ;;  %v8642_v13 = vld [vmem:[#allocation20 + $0x5c4] ss:$16 sps:$4 sm:$0xff]  }
0x12f2   :  { %v4504_v12 = vpop.f32.mrf.mxu1  ;;  %v4545_v41 = vpop.f32.mrf.mxu0  ;;  %6255 = vmatprep.subr.bf16.mxu1 %v8600_v59  ;;  %6296 = vmatprep.subr.bf16.mxu0 %v8603_v58  ;;  %v8643_v59 = vld [vmem:[#allocation20 + $0x7c0] ss:$16 sps:$4 sm:$0xff]   ;;  %v8648_v58 = vld [vmem:[#allocation20 + $0x5a4] ss:$16 sps:$4 sm:$0xff]  }
0x12f3   :  { %v4505_v8 = vadd.f32 %v4504_v12, %v10720_v55  ;;  %v4546_v32 = vadd.f32 %v4545_v41, %v10722_v9  ;;  %v8607_v9 = vld [vmem:[#allocation20 + $0x680] ss:$16 sps:$4 sm:$0xff]  }
0x12f4   :  { %v4506_v51 = vpop.f32.mrf.mxu1  ;;  %v4547_v22 = vpop.f32.mrf.mxu0  ;;  %v8652_v12 = vld [vmem:[#allocation20 + $0x580] ss:$16 sps:$4 sm:$0xff]  }
0x12f5   :  { %v10757_v33 = vadd.f32 %v4574_v48, %v4505_v8  ;;  %v10759_v34 = vadd.f32 %v4582_v3, %v4546_v32  ;;  %v4507_v42 = vadd.f32 %v4506_v51, %v10724_v53  ;;  %v4548_v36 = vadd.f32 %v4547_v22, %v10726_v47  ;;  %6256 = vmatpush1.bf16.msra.mxu1 %v8598_v38  ;;  %v8610_v53 = vld [vmem:[#allocation20 + $0x460] ss:$16 sps:$4 sm:$0xff]   ;;  %v8654_v3 = vld [vmem:[#allocation20 + $0x584] ss:$16 sps:$4 sm:$0xff]  }
0x12f6   :  { %6297 = vmatpush1.bf16.msra.mxu0 %v8601_v31  ;;  %v4508_v44 = vpop.f32.mrf.mxu1  ;;  %v4549_v55 = vpop.f32.mrf.mxu0  ;;  %6257 = vmatprep.subr.bf16.mxu1 %v8606_v5  ;;  %v8613_v47 = vld [vmem:[#allocation20 + $0x660] ss:$16 sps:$4 sm:$0xff]   ;;  %v8657_v38 = vld [vmem:[#allocation20 + $0x784] ss:$16 sps:$4 sm:$0xff]  }
0x12f7   :  { %v4600_v56 = vadd.f32 %v4578_v24, %v4507_v42  ;;  %v4602_v46 = vadd.f32 %v4586_v14, %v4548_v36  ;;  %6298 = vmatprep.subr.bf16.mxu0 %v8609_v16  ;;  %v8649_v48 = vld [vmem:[#allocation20 + $0x7a0] ss:$16 sps:$4 sm:$0xff]   ;;  %v8660_v31 = vld [vmem:[#allocation20 + $0x564] ss:$16 sps:$4 sm:$0xff]  }
0x12f8   :  { %v4509_v43 = vpop.f32.mrf.mxu1  ;;  %v4550_v49 = vpop.f32.mrf.mxu0  ;;  %v8655_v41 = vld [vmem:[#allocation20 + $0x780] ss:$16 sps:$4 sm:$0xff]   ;;  %v8663_v5 = vld [vmem:[#allocation20 + $0x764] ss:$16 sps:$4 sm:$0xff]  }
0x12f9   :  { %v10763_v54 = vpack.c.bf16 %v4600_v56, %v4600_v56  ;;  %v10765_v63 = vpack.c.bf16 %v4602_v46, %v4602_v46  ;;  %6258 = vmatpush1.bf16.msra.mxu1 %v8604_v28  ;;  %v8658_v8 = vld [vmem:[#allocation20 + $0x560] ss:$16 sps:$4 sm:$0xff]   ;;  %v8666_v24 = vld [vmem:[#allocation20 + $0x544] ss:$16 sps:$4 sm:$0xff]   ;;  %v8684_v56 = vld [vmem:[#allocation20 + $0xec] ss:$16 sps:$4 sm:$0xff]   ;;  %v10771_v43 = vpack.c.bf16 %v10757_v33, %v10757_v33 }
0x12fa   :  { %6299 = vmatpush1.bf16.msra.mxu0 %v8607_v9  ;;  %6259 = vmatprep.subr.bf16.mxu1 %v8612_v35  ;;  %v8661_v32 = vld [vmem:[#allocation20 + $0x760] ss:$16 sps:$4 sm:$0xff]   ;;  %v8669_v14 = vld [vmem:[#allocation20 + $0x744] ss:$16 sps:$4 sm:$0xff]   ;;  %v8687_v46 = vld [vmem:[#allocation20 + $0x2ec] ss:$16 sps:$4 sm:$0xff]  }
0x12fb   :  { %6283 = vmatprep.mubr.bf16.mxu1 %v10763_v54  ;;  %6300 = vmatprep.subr.bf16.mxu0 %v8615_v6  ;;  %v8664_v16 = vld [vmem:[#allocation20 + $0x540] ss:$16 sps:$4 sm:$0xff]   ;;  %v8672_v22 = vld [vmem:[#allocation20 + $0x524] ss:$16 sps:$4 sm:$0xff]   ;;  %v8682_v6 = vld [vmem:[#allocation20 + $0xe8] ss:$16 sps:$4 sm:$0xff]  }
0x12fc   :  { %6324 = vmatprep.mubr.bf16.mxu0 %v10765_v63  ;;  %v8667_v51 = vld [vmem:[#allocation20 + $0x740] ss:$16 sps:$4 sm:$0xff]   ;;  %v8675_v42 = vld [vmem:[#allocation20 + $0x724] ss:$16 sps:$4 sm:$0xff]   ;;  %v8685_v49 = vld [vmem:[#allocation20 + $0x2e8] ss:$16 sps:$4 sm:$0xff]  }
0x12fd   :  { %6260 = vmatpush1.bf16.msra.mxu1 %v8610_v53  ;;  %v8670_v36 = vld [vmem:[#allocation20 + $0x520] ss:$16 sps:$4 sm:$0xff]   ;;  %v8678_v44 = vld [vmem:[#allocation20 + $0x504] ss:$16 sps:$4 sm:$0xff]   ;;  %v10775_v53 = vpack.c.bf16 %v10759_v34, %v10759_v34  ;;  %v8691_v33 = vld [vmem:[#allocation20 + $0x2c8] ss:$16 sps:$4 sm:$0xff]  }
0x12fe   :  { %6301 = vmatpush1.bf16.msra.mxu0 %v8613_v47  ;;  %6261 = vmatprep.subr.bf16.mxu1 %v8618_v61  ;;  %v8673_v28 = vld [vmem:[#allocation20 + $0x720] ss:$16 sps:$4 sm:$0xff]   ;;  %v8681_v55 = vld [vmem:[#allocation20 + $0x704] ss:$16 sps:$4 sm:$0xff]   ;;  %v8690_v47 = vld [vmem:[#allocation20 + $0xcc] ss:$16 sps:$4 sm:$0xff]  }
0x12ff   :  { %6302 = vmatprep.subr.bf16.mxu0 %v8621_v7  ;;  %v8676_v9 = vld [vmem:[#allocation20 + $0x500] ss:$16 sps:$4 sm:$0xff]   ;;  %v8693_v61 = vld [vmem:[#allocation20 + $0x2cc] ss:$16 sps:$4 sm:$0xff]   ;;  %v8688_v7 = vld [vmem:[#allocation20 + $0xc8] ss:$16 sps:$4 sm:$0xff]  }
0x1300   :  { %v8679_v35 = vld [vmem:[#allocation20 + $0x700] ss:$16 sps:$4 sm:$0xff]   ;;  %v8694_v34 = vld [vmem:[#allocation20 + $0xa8] ss:$16 sps:$4 sm:$0xff]  }
0x1301   :  { %6262 = vmatpush1.bf16.msra.mxu1 %v8616_v10  ;;  %v8696_v10 = vld [vmem:[#allocation20 + $0xac] ss:$16 sps:$4 sm:$0xff]  }
0x1302   :  { %6303 = vmatpush1.bf16.msra.mxu0 %v8619_v17  ;;  %6263 = vmatprep.subr.bf16.mxu1 %v8624_v0  ;;  %v8699_v17 = vld [vmem:[#allocation20 + $0x2ac] ss:$16 sps:$4 sm:$0xff]   ;;  %v8697_v0 = vld [vmem:[#allocation20 + $0x2a8] ss:$16 sps:$4 sm:$0xff]  }
0x1303   :  { %6304 = vmatprep.subr.bf16.mxu0 %v8627_v4  ;;  %v8702_v4 = vld [vmem:[#allocation20 + $0x8c] ss:$16 sps:$4 sm:$0xff]  }
0x1305   :  { %6264 = vmatpush1.bf16.msra.mxu1 %v8622_v39  ;;  %v8705_v39 = vld [vmem:[#allocation20 + $0x28c] ss:$16 sps:$4 sm:$0xff]  }
0x1306   :  { %6305 = vmatpush1.bf16.msra.mxu0 %v8625_v52  ;;  %6265 = vmatprep.subr.bf16.mxu1 %v8630_v57  ;;  %v8700_v52 = vld [vmem:[#allocation20 + $0x88] ss:$16 sps:$4 sm:$0xff]   ;;  %v8708_v57 = vld [vmem:[#allocation20 + $0x6c] ss:$16 sps:$4 sm:$0xff]  }
0x1307   :  { %6306 = vmatprep.subr.bf16.mxu0 %v8633_v27  ;;  %v8711_v27 = vld [vmem:[#allocation20 + $0x26c] ss:$16 sps:$4 sm:$0xff]  }
0x1309   :  { %6266 = vmatpush1.bf16.msra.mxu1 %v8628_v15  ;;  %v8709_v15 = vld [vmem:[#allocation20 + $0x268] ss:$16 sps:$4 sm:$0xff]  }
0x130a   :  { %6307 = vmatpush1.bf16.msra.mxu0 %v8631_v25  ;;  %6267 = vmatprep.subr.bf16.mxu1 %v8636_v29  ;;  %v8714_v25 = vld [vmem:[#allocation20 + $0x4c] ss:$16 sps:$4 sm:$0xff]  }
0x130b   :  { %6308 = vmatprep.subr.bf16.mxu0 %v8639_v50  ;;  %v8717_v29 = vld [vmem:[#allocation20 + $0x24c] ss:$16 sps:$4 sm:$0xff]   ;;  %v8712_v50 = vld [vmem:[#allocation20 + $0x48] ss:$16 sps:$4 sm:$0xff]  }
0x130d   :  { %6268 = vmatpush2.bf16.msra.mxu1 %v8634_v23  ;;  %v8715_v23 = vld [vmem:[#allocation20 + $0x248] ss:$16 sps:$4 sm:$0xff]  }
0x130e   :  { %6309 = vmatpush2.bf16.msra.mxu0 %v8637_v19  ;;  %6269 = vmatprep.subr.bf16.mxu1 %v8642_v13  ;;  %v8720_v19 = vld [vmem:[#allocation20 + $0x2c] ss:$16 sps:$4 sm:$0xff]  }
0x130f   :  { %6310 = vmatprep.subr.bf16.mxu0 %v8645_v1  ;;  %v8723_v13 = vld [vmem:[#allocation20 + $0x22c] ss:$16 sps:$4 sm:$0xff]   ;;  %v8718_v1 = vld [vmem:[#allocation20 + $0x28] ss:$16 sps:$4 sm:$0xff]  }
0x1311   :  { %6270 = vmatpush2.bf16.msra.mxu1 %v8640_v30  ;;  %v8721_v30 = vld [vmem:[#allocation20 + $0x228] ss:$16 sps:$4 sm:$0xff]  }
0x1312   :  { %6311 = vmatpush2.bf16.msra.mxu0 %v8643_v59  ;;  %6271 = vmatprep.subr.bf16.mxu1 %v8648_v58  ;;  %v8726_v59 = vld [vmem:[#allocation20 + $0xc] ss:$16 sps:$4 sm:$0xff]  }
0x1313   :  { %6312 = vmatprep.subr.bf16.mxu0 %v8651_v60  ;;  %v8729_v58 = vld [vmem:[#allocation20 + $0x20c] ss:$16 sps:$4 sm:$0xff]   ;;  %v8724_v60 = vld [vmem:[#allocation20 + $0x8] ss:$16 sps:$4 sm:$0xff]  }
0x1315   :  { %6272 = vmatpush2.bf16.msra.mxu1 %v8646_v62  ;;  %v8727_v62 = vld [vmem:[#allocation20 + $0x208] ss:$16 sps:$4 sm:$0xff]  }
0x1316   :  { %6313 = vmatpush2.bf16.msra.mxu0 %v8649_v48  ;;  %6273 = vmatprep.subr.bf16.mxu1 %v8654_v3  ;;  %v8732_v48 = vld [vmem:[#allocation20 + $0x1ec] ss:$16 sps:$4 sm:$0xff]  }
0x1317   :  { %6314 = vmatprep.subr.bf16.mxu0 %v8657_v38  ;;  %v8735_v3 = vld [vmem:[#allocation20 + $0x3ec] ss:$16 sps:$4 sm:$0xff]   ;;  %v8730_v38 = vld [vmem:[#allocation20 + $0x1e8] ss:$16 sps:$4 sm:$0xff]  }
0x1319   :  { %6274 = vmatpush2.bf16.msra.mxu1 %v8652_v12  ;;  %v8733_v12 = vld [vmem:[#allocation20 + $0x3e8] ss:$16 sps:$4 sm:$0xff]  }
0x131a   :  { %6315 = vmatpush2.bf16.msra.mxu0 %v8655_v41  ;;  %6275 = vmatprep.subr.bf16.mxu1 %v8660_v31  ;;  %v8738_v41 = vld [vmem:[#allocation20 + $0x1cc] ss:$16 sps:$4 sm:$0xff]  }
0x131b   :  { %6316 = vmatprep.subr.bf16.mxu0 %v8663_v5  ;;  %v8741_v31 = vld [vmem:[#allocation20 + $0x3cc] ss:$16 sps:$4 sm:$0xff]   ;;  %v8736_v5 = vld [vmem:[#allocation20 + $0x1c8] ss:$16 sps:$4 sm:$0xff]  }
0x131d   :  { %6276 = vmatpush2.bf16.msra.mxu1 %v8658_v8  ;;  %v8739_v8 = vld [vmem:[#allocation20 + $0x3c8] ss:$16 sps:$4 sm:$0xff]  }
0x131e   :  { %6317 = vmatpush2.bf16.msra.mxu0 %v8661_v32  ;;  %6277 = vmatprep.subr.bf16.mxu1 %v8666_v24  ;;  %v8744_v32 = vld [vmem:[#allocation20 + $0x1ac] ss:$16 sps:$4 sm:$0xff]  }
0x131f   :  { %6318 = vmatprep.subr.bf16.mxu0 %v8669_v14  ;;  %v8747_v24 = vld [vmem:[#allocation20 + $0x3ac] ss:$16 sps:$4 sm:$0xff]   ;;  %v8742_v14 = vld [vmem:[#allocation20 + $0x1a8] ss:$16 sps:$4 sm:$0xff]  }
0x1321   :  { %6278 = vmatpush2.bf16.msra.mxu1 %v8664_v16  ;;  %v8745_v16 = vld [vmem:[#allocation20 + $0x3a8] ss:$16 sps:$4 sm:$0xff]  }
0x1322   :  { %6319 = vmatpush2.bf16.msra.mxu0 %v8667_v51  ;;  %6279 = vmatprep.subr.bf16.mxu1 %v8672_v22  ;;  %v8750_v51 = vld [vmem:[#allocation20 + $0x18c] ss:$16 sps:$4 sm:$0xff]  }
0x1323   :  { %6320 = vmatprep.subr.bf16.mxu0 %v8675_v42  ;;  %v8753_v22 = vld [vmem:[#allocation20 + $0x38c] ss:$16 sps:$4 sm:$0xff]   ;;  %v8748_v42 = vld [vmem:[#allocation20 + $0x188] ss:$16 sps:$4 sm:$0xff]  }
0x1325   :  { %6280 = vmatpush2.bf16.msra.mxu1 %v8670_v36  ;;  %v8751_v36 = vld [vmem:[#allocation20 + $0x388] ss:$16 sps:$4 sm:$0xff]  }
0x1326   :  { %6321 = vmatpush2.bf16.msra.mxu0 %v8673_v28  ;;  %6281 = vmatprep.subr.bf16.mxu1 %v8678_v44  ;;  %v8756_v28 = vld [vmem:[#allocation20 + $0x16c] ss:$16 sps:$4 sm:$0xff]  }
0x1327   :  { %6322 = vmatprep.subr.bf16.mxu0 %v8681_v55  ;;  %v8759_v44 = vld [vmem:[#allocation20 + $0x36c] ss:$16 sps:$4 sm:$0xff]   ;;  %v8754_v55 = vld [vmem:[#allocation20 + $0x168] ss:$16 sps:$4 sm:$0xff]  }
0x1329   :  { %6282 = vmatpush2.bf16.msra.mxu1 %v8676_v9  ;;  %v8757_v9 = vld [vmem:[#allocation20 + $0x368] ss:$16 sps:$4 sm:$0xff]  }
0x132a   :  { %6323 = vmatpush2.bf16.msra.mxu0 %v8679_v35  ;;  %6333 = vmatprep.subr.bf16.mxu1 %v8684_v56  ;;  %v8762_v35 = vld [vmem:[#allocation20 + $0x14c] ss:$16 sps:$4 sm:$0xff]  }
0x132b   :  { %6374 = vmatprep.subr.bf16.mxu0 %v8687_v46  ;;  %v8765_v56 = vld [vmem:[#allocation20 + $0x34c] ss:$16 sps:$4 sm:$0xff]   ;;  %v8760_v46 = vld [vmem:[#allocation20 + $0x148] ss:$16 sps:$4 sm:$0xff]  }
0x132c   :  { %6284 = vmatmul.mubr.bf16.vlgmr.msra.gmra.mxu1 %v10771_v43 }
0x132d   :  { %6325 = vmatmul.mubr.bf16.vlgmr.msra.gmra.mxu0 %v10775_v53  ;;  %6334 = vmatpush1.bf16.msra.mxu1 %v8682_v6  ;;  %v8763_v6 = vld [vmem:[#allocation20 + $0x348] ss:$16 sps:$4 sm:$0xff]  }
0x132e   :  { %6365 = vmatprep.mubr.bf16.mxu1 %v10739_v11  ;;  %6375 = vmatpush1.bf16.msra.mxu0 %v8685_v49  ;;  %v8703_v11 = vld [vmem:[#allocation20 + $0x288] ss:$16 sps:$4 sm:$0xff]   ;;  %v8768_v49 = vld [vmem:[#allocation20 + $0x12c] ss:$16 sps:$4 sm:$0xff]  }
0x132f   :  { %6406 = vmatprep.mubr.bf16.mxu0 %v10741_v40  ;;  %6335 = vmatprep.subr.bf16.mxu1 %v8690_v47  ;;  %v8706_v40 = vld [vmem:[#allocation20 + $0x68] ss:$16 sps:$4 sm:$0xff]   ;;  %v8771_v47 = vld [vmem:[#allocation20 + $0x32c] ss:$16 sps:$4 sm:$0xff]  }
0x1330   :  { %6376 = vmatprep.subr.bf16.mxu0 %v8693_v61  ;;  %v8766_v61 = vld [vmem:[#allocation20 + $0x128] ss:$16 sps:$4 sm:$0xff]  }
0x1331   :  { %6336 = vmatpush1.bf16.msra.mxu1 %v8688_v7  ;;  %v8769_v7 = vld [vmem:[#allocation20 + $0x328] ss:$16 sps:$4 sm:$0xff]  }
0x1332   :  { %6377 = vmatpush1.bf16.msra.mxu0 %v8691_v33  ;;  %6337 = vmatprep.subr.bf16.mxu1 %v8696_v10  ;;  %v8774_v33 = vld [vmem:[#allocation20 + $0x10c] ss:$16 sps:$4 sm:$0xff]  }
0x1333   :  { %6378 = vmatprep.subr.bf16.mxu0 %v8699_v17  ;;  %v8777_v10 = vld [vmem:[#allocation20 + $0x30c] ss:$16 sps:$4 sm:$0xff]   ;;  %v8772_v17 = vld [vmem:[#allocation20 + $0x108] ss:$16 sps:$4 sm:$0xff]  }
0x1335   :  { %6338 = vmatpush1.bf16.msra.mxu1 %v8694_v34  ;;  %v8775_v34 = vld [vmem:[#allocation20 + $0x308] ss:$16 sps:$4 sm:$0xff]  }
0x1336   :  { %6379 = vmatpush1.bf16.msra.mxu0 %v8697_v0  ;;  %6339 = vmatprep.subr.bf16.mxu1 %v8702_v4  ;;  %v8780_v0 = vld [vmem:[#allocation20 + $0x4ec] ss:$16 sps:$4 sm:$0xff]  }
0x1337   :  { %6380 = vmatprep.subr.bf16.mxu0 %v8705_v39  ;;  %v8783_v4 = vld [vmem:[#allocation20 + $0x6ec] ss:$16 sps:$4 sm:$0xff]   ;;  %v8778_v39 = vld [vmem:[#allocation20 + $0x4e8] ss:$16 sps:$4 sm:$0xff]  }
0x1339   :  { %6340 = vmatpush1.bf16.msra.mxu1 %v8700_v52  ;;  %v8781_v52 = vld [vmem:[#allocation20 + $0x6e8] ss:$16 sps:$4 sm:$0xff]  }
0x133a   :  { %6381 = vmatpush1.bf16.msra.mxu0 %v8703_v11  ;;  %6341 = vmatprep.subr.bf16.mxu1 %v8708_v57  ;;  %v8786_v11 = vld [vmem:[#allocation20 + $0x4cc] ss:$16 sps:$4 sm:$0xff]  }
0x133b   :  { %6382 = vmatprep.subr.bf16.mxu0 %v8711_v27  ;;  %v8789_v57 = vld [vmem:[#allocation20 + $0x6cc] ss:$16 sps:$4 sm:$0xff]   ;;  %v8784_v27 = vld [vmem:[#allocation20 + $0x4c8] ss:$16 sps:$4 sm:$0xff]  }
0x133d   :  { %6342 = vmatpush1.bf16.msra.mxu1 %v8706_v40  ;;  %v8787_v40 = vld [vmem:[#allocation20 + $0x6c8] ss:$16 sps:$4 sm:$0xff]  }
0x133e   :  { %6383 = vmatpush1.bf16.msra.mxu0 %v8709_v15  ;;  %6343 = vmatprep.subr.bf16.mxu1 %v8714_v25  ;;  %v8792_v15 = vld [vmem:[#allocation20 + $0x4ac] ss:$16 sps:$4 sm:$0xff]  }
0x133f   :  { %6384 = vmatprep.subr.bf16.mxu0 %v8717_v29  ;;  %v8795_v25 = vld [vmem:[#allocation20 + $0x6ac] ss:$16 sps:$4 sm:$0xff]   ;;  %v8790_v29 = vld [vmem:[#allocation20 + $0x4a8] ss:$16 sps:$4 sm:$0xff]  }
0x1341   :  { %6344 = vmatpush1.bf16.msra.mxu1 %v8712_v50  ;;  %v8798_v50 = vld [vmem:[#allocation20 + $0x48c] ss:$16 sps:$4 sm:$0xff]  }
0x1342   :  { %6385 = vmatpush1.bf16.msra.mxu0 %v8715_v23  ;;  %6345 = vmatprep.subr.bf16.mxu1 %v8720_v19  ;;  %v8796_v23 = vld [vmem:[#allocation20 + $0x488] ss:$16 sps:$4 sm:$0xff]   ;;  %v8804_v19 = vld [vmem:[#allocation20 + $0x46c] ss:$16 sps:$4 sm:$0xff]  }
0x1343   :  { %6386 = vmatprep.subr.bf16.mxu0 %v8723_v13  ;;  %v8807_v13 = vld [vmem:[#allocation20 + $0x66c] ss:$16 sps:$4 sm:$0xff]  }
0x1345   :  { %6346 = vmatpush1.bf16.msra.mxu1 %v8718_v1  ;;  %v8805_v1 = vld [vmem:[#allocation20 + $0x668] ss:$16 sps:$4 sm:$0xff]  }
0x1346   :  { %6387 = vmatpush1.bf16.msra.mxu0 %v8721_v30  ;;  %6347 = vmatprep.subr.bf16.mxu1 %v8726_v59  ;;  %v8810_v30 = vld [vmem:[#allocation20 + $0x44c] ss:$16 sps:$4 sm:$0xff]  }
0x1347   :  { %6388 = vmatprep.subr.bf16.mxu0 %v8729_v58  ;;  %v8813_v59 = vld [vmem:[#allocation20 + $0x64c] ss:$16 sps:$4 sm:$0xff]   ;;  %v8808_v58 = vld [vmem:[#allocation20 + $0x448] ss:$16 sps:$4 sm:$0xff]  }
0x1349   :  { %6348 = vmatpush1.bf16.msra.mxu1 %v8724_v60  ;;  %v8811_v60 = vld [vmem:[#allocation20 + $0x648] ss:$16 sps:$4 sm:$0xff]  }
0x134a   :  { %6389 = vmatpush1.bf16.msra.mxu0 %v8727_v62  ;;  %6349 = vmatprep.subr.bf16.mxu1 %v8732_v48  ;;  %v8816_v62 = vld [vmem:[#allocation20 + $0x42c] ss:$16 sps:$4 sm:$0xff]  }
0x134b   :  { %6390 = vmatprep.subr.bf16.mxu0 %v8735_v3  ;;  %v8819_v48 = vld [vmem:[#allocation20 + $0x62c] ss:$16 sps:$4 sm:$0xff]   ;;  %v8814_v3 = vld [vmem:[#allocation20 + $0x428] ss:$16 sps:$4 sm:$0xff]  }
0x134d   :  { %6350 = vmatpush2.bf16.msra.mxu1 %v8730_v38  ;;  %v8817_v38 = vld [vmem:[#allocation20 + $0x628] ss:$16 sps:$4 sm:$0xff]  }
0x134e   :  { %6391 = vmatpush2.bf16.msra.mxu0 %v8733_v12  ;;  %6351 = vmatprep.subr.bf16.mxu1 %v8738_v41  ;;  %v8822_v12 = vld [vmem:[#allocation20 + $0x40c] ss:$16 sps:$4 sm:$0xff]  }
0x134f   :  { %6392 = vmatprep.subr.bf16.mxu0 %v8741_v31  ;;  %v8825_v41 = vld [vmem:[#allocation20 + $0x60c] ss:$16 sps:$4 sm:$0xff]   ;;  %v8820_v31 = vld [vmem:[#allocation20 + $0x408] ss:$16 sps:$4 sm:$0xff]  }
0x1351   :  { %6352 = vmatpush2.bf16.msra.mxu1 %v8736_v5  ;;  %v8823_v5 = vld [vmem:[#allocation20 + $0x608] ss:$16 sps:$4 sm:$0xff]  }
0x1352   :  { %6393 = vmatpush2.bf16.msra.mxu0 %v8739_v8  ;;  %6353 = vmatprep.subr.bf16.mxu1 %v8744_v32  ;;  %v8828_v8 = vld [vmem:[#allocation20 + $0x5ec] ss:$16 sps:$4 sm:$0xff]  }
0x1353   :  { %6394 = vmatprep.subr.bf16.mxu0 %v8747_v24  ;;  %v8831_v32 = vld [vmem:[#allocation20 + $0x7ec] ss:$16 sps:$4 sm:$0xff]   ;;  %v8826_v24 = vld [vmem:[#allocation20 + $0x5e8] ss:$16 sps:$4 sm:$0xff]  }
0x1355   :  { %6354 = vmatpush2.bf16.msra.mxu1 %v8742_v14  ;;  %v8829_v14 = vld [vmem:[#allocation20 + $0x7e8] ss:$16 sps:$4 sm:$0xff]  }
0x1356   :  { %6395 = vmatpush2.bf16.msra.mxu0 %v8745_v16  ;;  %6355 = vmatprep.subr.bf16.mxu1 %v8750_v51  ;;  %v8834_v16 = vld [vmem:[#allocation20 + $0x5cc] ss:$16 sps:$4 sm:$0xff]  }
0x1357   :  { %6396 = vmatprep.subr.bf16.mxu0 %v8753_v22  ;;  %v8837_v51 = vld [vmem:[#allocation20 + $0x7cc] ss:$16 sps:$4 sm:$0xff]   ;;  %v8832_v22 = vld [vmem:[#allocation20 + $0x5c8] ss:$16 sps:$4 sm:$0xff]  }
0x1359   :  { %6356 = vmatpush2.bf16.msra.mxu1 %v8748_v42  ;;  %v8835_v42 = vld [vmem:[#allocation20 + $0x7c8] ss:$16 sps:$4 sm:$0xff]  }
0x135a   :  { %6397 = vmatpush2.bf16.msra.mxu0 %v8751_v36  ;;  %6357 = vmatprep.subr.bf16.mxu1 %v8756_v28  ;;  %v8840_v36 = vld [vmem:[#allocation20 + $0x5ac] ss:$16 sps:$4 sm:$0xff]  }
0x135b   :  { %6398 = vmatprep.subr.bf16.mxu0 %v8759_v44  ;;  %v8843_v28 = vld [vmem:[#allocation20 + $0x7ac] ss:$16 sps:$4 sm:$0xff]   ;;  %v8838_v44 = vld [vmem:[#allocation20 + $0x5a8] ss:$16 sps:$4 sm:$0xff]  }
0x135d   :  { %6358 = vmatpush2.bf16.msra.mxu1 %v8754_v55  ;;  %v8841_v55 = vld [vmem:[#allocation20 + $0x7a8] ss:$16 sps:$4 sm:$0xff]  }
0x135e   :  { %6399 = vmatpush2.bf16.msra.mxu0 %v8757_v9  ;;  %6359 = vmatprep.subr.bf16.mxu1 %v8762_v35  ;;  %v8846_v9 = vld [vmem:[#allocation20 + $0x58c] ss:$16 sps:$4 sm:$0xff]  }
0x135f   :  { %6400 = vmatprep.subr.bf16.mxu0 %v8765_v56  ;;  %v8849_v35 = vld [vmem:[#allocation20 + $0x78c] ss:$16 sps:$4 sm:$0xff]   ;;  %v8844_v56 = vld [vmem:[#allocation20 + $0x588] ss:$16 sps:$4 sm:$0xff]  }
0x1361   :  { %6360 = vmatpush2.bf16.msra.mxu1 %v8760_v46  ;;  %v8847_v46 = vld [vmem:[#allocation20 + $0x788] ss:$16 sps:$4 sm:$0xff]  }
0x1362   :  { %6401 = vmatpush2.bf16.msra.mxu0 %v8763_v6  ;;  %6361 = vmatprep.subr.bf16.mxu1 %v8768_v49  ;;  %v8852_v6 = vld [vmem:[#allocation20 + $0x56c] ss:$16 sps:$4 sm:$0xff]  }
0x1363   :  { %6402 = vmatprep.subr.bf16.mxu0 %v8771_v47  ;;  %v8855_v49 = vld [vmem:[#allocation20 + $0x76c] ss:$16 sps:$4 sm:$0xff]   ;;  %v8850_v47 = vld [vmem:[#allocation20 + $0x568] ss:$16 sps:$4 sm:$0xff]  }
0x1365   :  { %6362 = vmatpush2.bf16.msra.mxu1 %v8766_v61  ;;  %v8853_v61 = vld [vmem:[#allocation20 + $0x768] ss:$16 sps:$4 sm:$0xff]  }
0x1366   :  { %6403 = vmatpush2.bf16.msra.mxu0 %v8769_v7  ;;  %6363 = vmatprep.subr.bf16.mxu1 %v8774_v33  ;;  %v8858_v7 = vld [vmem:[#allocation20 + $0x54c] ss:$16 sps:$4 sm:$0xff]  }
0x1367   :  { %6404 = vmatprep.subr.bf16.mxu0 %v8777_v10  ;;  %v8861_v33 = vld [vmem:[#allocation20 + $0x74c] ss:$16 sps:$4 sm:$0xff]   ;;  %v8856_v10 = vld [vmem:[#allocation20 + $0x548] ss:$16 sps:$4 sm:$0xff]  }
0x1369   :  { %6364 = vmatpush2.bf16.msra.mxu1 %v8772_v17  ;;  %v8859_v17 = vld [vmem:[#allocation20 + $0x748] ss:$16 sps:$4 sm:$0xff]  }
0x136a   :  { %6405 = vmatpush2.bf16.msra.mxu0 %v8775_v34  ;;  %6415 = vmatprep.subr.bf16.mxu1 %v8780_v0  ;;  %v8864_v34 = vld [vmem:[#allocation20 + $0x52c] ss:$16 sps:$4 sm:$0xff]  }
0x136b   :  { %6456 = vmatprep.subr.bf16.mxu0 %v8783_v4  ;;  %v8867_v0 = vld [vmem:[#allocation20 + $0x72c] ss:$16 sps:$4 sm:$0xff]   ;;  %v8862_v4 = vld [vmem:[#allocation20 + $0x528] ss:$16 sps:$4 sm:$0xff]  }
0x136c   :  { %6366 = vmatmul.mubr.bf16.vlgmr.msra.gmra.mxu1 %v10743_v45  ;;  %v8793_v45 = vld [vmem:[#allocation20 + $0x6a8] ss:$16 sps:$4 sm:$0xff]  }
0x136d   :  { %6407 = vmatmul.mubr.bf16.vlgmr.msra.gmra.mxu0 %v10745_v21  ;;  %6416 = vmatpush1.bf16.msra.mxu1 %v8778_v39  ;;  %v8801_v21 = vld [vmem:[#allocation20 + $0x68c] ss:$16 sps:$4 sm:$0xff]   ;;  %v8865_v39 = vld [vmem:[#allocation20 + $0x728] ss:$16 sps:$4 sm:$0xff]  }
0x136e   :  { %6447 = vmatprep.mubr.bf16.mxu1 %v10763_v54  ;;  %6457 = vmatpush1.bf16.msra.mxu0 %v8781_v52  ;;  %v8799_v54 = vld [vmem:[#allocation20 + $0x688] ss:$16 sps:$4 sm:$0xff]   ;;  %v8870_v52 = vld [vmem:[#allocation20 + $0x50c] ss:$16 sps:$4 sm:$0xff]  }
0x136f   :  { %6488 = vmatprep.mubr.bf16.mxu0 %v10765_v63  ;;  %6417 = vmatprep.subr.bf16.mxu1 %v8786_v11  ;;  %v8802_v63 = vld [vmem:[#allocation20 + $0x468] ss:$16 sps:$4 sm:$0xff]   ;;  %v8873_v11 = vld [vmem:[#allocation20 + $0x70c] ss:$16 sps:$4 sm:$0xff]  }
0x1370   :  { %6458 = vmatprep.subr.bf16.mxu0 %v8789_v57  ;;  %v8868_v57 = vld [vmem:[#allocation20 + $0x508] ss:$16 sps:$4 sm:$0xff]  }
0x1371   :  { %6418 = vmatpush1.bf16.msra.mxu1 %v8784_v27  ;;  %v8871_v27 = vld [vmem:[#allocation20 + $0x708] ss:$16 sps:$4 sm:$0xff]  }
0x1372   :  { %6459 = vmatpush1.bf16.msra.mxu0 %v8787_v40  ;;  %6419 = vmatprep.subr.bf16.mxu1 %v8792_v15  ;;  %v8876_v40 = vld [vmem:[#allocation23 + $0x74] ss:$8 sps:$4 sm:$0xff]   ;;  %v8874_v15 = vld [vmem:[#allocation23 + $0x70] ss:$8 sps:$4 sm:$0xff]  }
0x1373   :  { %6460 = vmatprep.subr.bf16.mxu0 %v8795_v25  ;;  %v8879_v25 = vld [vmem:[#allocation23 + $0x64] ss:$8 sps:$4 sm:$0xff]  }
0x1375   :  { %6420 = vmatpush1.bf16.msra.mxu1 %v8790_v29 }
0x1376   :  { %6461 = vmatpush1.bf16.msra.mxu0 %v8793_v45  ;;  %6421 = vmatprep.subr.bf16.mxu1 %v8798_v50  ;;  %v8877_v50 = vld [vmem:[#allocation23 + $0x60] ss:$8 sps:$4 sm:$0xff]  }
0x1377   :  { %6462 = vmatprep.subr.bf16.mxu0 %v8801_v21 }
0x1379   :  { %6422 = vmatpush1.bf16.msra.mxu1 %v8796_v23 }
0x137a   :  { %6463 = vmatpush1.bf16.msra.mxu0 %v8799_v54  ;;  %6423 = vmatprep.subr.bf16.mxu1 %v8804_v19  ;;  %v8882_v54 = vld [vmem:[#allocation23 + $0x54] ss:$8 sps:$4 sm:$0xff]  }
0x137b   :  { %6464 = vmatprep.subr.bf16.mxu0 %v8807_v13 }
0x137d   :  { %6424 = vmatpush1.bf16.msra.mxu1 %v8802_v63  ;;  %v8880_v63 = vld [vmem:[#allocation23 + $0x50] ss:$8 sps:$4 sm:$0xff]  }
0x137e   :  { %6465 = vmatpush1.bf16.msra.mxu0 %v8805_v1  ;;  %6425 = vmatprep.subr.bf16.mxu1 %v8810_v30  ;;  %v8885_v30 = vld [vmem:[#allocation23 + $0x44] ss:$8 sps:$4 sm:$0xff]  }
0x137f   :  { %6466 = vmatprep.subr.bf16.mxu0 %v8813_v59  ;;  %v8922_v59 = vld [vmem:[#allocation23 + $0x170] ss:$8 sps:$4 sm:$0xff]  }
0x1381   :  { %6426 = vmatpush1.bf16.msra.mxu1 %v8808_v58  ;;  %v8924_v58 = vld [vmem:[#allocation23 + $0x174] ss:$8 sps:$4 sm:$0xff]  }
0x1382   :  { %6467 = vmatpush1.bf16.msra.mxu0 %v8811_v60  ;;  %6427 = vmatprep.subr.bf16.mxu1 %v8816_v62  ;;  %v8927_v60 = vld [vmem:[#allocation23 + $0x164] ss:$8 sps:$4 sm:$0xff]   ;;  %v8888_v62 = vld [vmem:[#allocation23 + $0x34] ss:$8 sps:$4 sm:$0xff]  }
0x1383   :  { %6468 = vmatprep.subr.bf16.mxu0 %v8819_v48  ;;  %v8925_v48 = vld [vmem:[#allocation23 + $0x160] ss:$8 sps:$4 sm:$0xff]  }
0x1385   :  { %6428 = vmatpush1.bf16.msra.mxu1 %v8814_v3  ;;  %v8930_v3 = vld [vmem:[#allocation23 + $0x154] ss:$8 sps:$4 sm:$0xff]  }
0x1386   :  { %6469 = vmatpush1.bf16.msra.mxu0 %v8817_v38  ;;  %6429 = vmatprep.subr.bf16.mxu1 %v8822_v12  ;;  %v8886_v38 = vld [vmem:[#allocation23 + $0x30] ss:$8 sps:$4 sm:$0xff]   ;;  %v8891_v12 = vld [vmem:[#allocation23 + $0x24] ss:$8 sps:$4 sm:$0xff]  }
0x1387   :  { %6470 = vmatprep.subr.bf16.mxu0 %v8825_v41  ;;  %v8928_v41 = vld [vmem:[#allocation23 + $0x150] ss:$8 sps:$4 sm:$0xff]  }
0x1389   :  { %6430 = vmatpush1.bf16.msra.mxu1 %v8820_v31  ;;  %v8933_v31 = vld [vmem:[#allocation23 + $0x144] ss:$8 sps:$4 sm:$0xff]  }
0x138a   :  { %6471 = vmatpush1.bf16.msra.mxu0 %v8823_v5  ;;  %6431 = vmatprep.subr.bf16.mxu1 %v8828_v8  ;;  %v8889_v5 = vld [vmem:[#allocation23 + $0x20] ss:$8 sps:$4 sm:$0xff]   ;;  %v8894_v8 = vld [vmem:[#allocation23 + $0x14] ss:$8 sps:$4 sm:$0xff]  }
0x138b   :  { %6472 = vmatprep.subr.bf16.mxu0 %v8831_v32  ;;  %v8931_v32 = vld [vmem:[#allocation23 + $0x140] ss:$8 sps:$4 sm:$0xff]  }
0x138d   :  { %6432 = vmatpush2.bf16.msra.mxu1 %v8826_v24  ;;  %v8936_v24 = vld [vmem:[#allocation23 + $0x134] ss:$8 sps:$4 sm:$0xff]  }
0x138e   :  { %6473 = vmatpush2.bf16.msra.mxu0 %v8829_v14  ;;  %6433 = vmatprep.subr.bf16.mxu1 %v8834_v16  ;;  %v8892_v14 = vld [vmem:[#allocation23 + $0x10] ss:$8 sps:$4 sm:$0xff]   ;;  %v8897_v16 = vld [vmem:[#allocation23 + $0x4] ss:$8 sps:$4 sm:$0xff]  }
0x138f   :  { %6474 = vmatprep.subr.bf16.mxu0 %v8837_v51  ;;  %v8934_v51 = vld [vmem:[#allocation23 + $0x130] ss:$8 sps:$4 sm:$0xff]  }
0x1391   :  { %6434 = vmatpush2.bf16.msra.mxu1 %v8832_v22  ;;  %v8939_v22 = vld [vmem:[#allocation23 + $0x124] ss:$8 sps:$4 sm:$0xff]  }
0x1392   :  { %6475 = vmatpush2.bf16.msra.mxu0 %v8835_v42  ;;  %6435 = vmatprep.subr.bf16.mxu1 %v8840_v36  ;;  %v8895_v42 = vld [vmem:[#allocation23] ss:$8 sps:$4 sm:$0xff]   ;;  %v8900_v36 = vld [vmem:[#allocation23 + $0xf4] ss:$8 sps:$4 sm:$0xff]  }
0x1393   :  { %6476 = vmatprep.subr.bf16.mxu0 %v8843_v28  ;;  %v8937_v28 = vld [vmem:[#allocation23 + $0x120] ss:$8 sps:$4 sm:$0xff]  }
0x1395   :  { %6436 = vmatpush2.bf16.msra.mxu1 %v8838_v44  ;;  %v8942_v44 = vld [vmem:[#allocation23 + $0x114] ss:$8 sps:$4 sm:$0xff]  }
0x1396   :  { %6477 = vmatpush2.bf16.msra.mxu0 %v8841_v55  ;;  %6437 = vmatprep.subr.bf16.mxu1 %v8846_v9  ;;  %v8898_v55 = vld [vmem:[#allocation23 + $0xf0] ss:$8 sps:$4 sm:$0xff]   ;;  %v8903_v9 = vld [vmem:[#allocation23 + $0xe4] ss:$8 sps:$4 sm:$0xff]  }
0x1397   :  { %6478 = vmatprep.subr.bf16.mxu0 %v8849_v35  ;;  %v8940_v35 = vld [vmem:[#allocation23 + $0x110] ss:$8 sps:$4 sm:$0xff]  }
0x1399   :  { %6438 = vmatpush2.bf16.msra.mxu1 %v8844_v56  ;;  %v8945_v56 = vld [vmem:[#allocation23 + $0x104] ss:$8 sps:$4 sm:$0xff]  }
0x139a   :  { %6479 = vmatpush2.bf16.msra.mxu0 %v8847_v46  ;;  %6439 = vmatprep.subr.bf16.mxu1 %v8852_v6  ;;  %v8901_v46 = vld [vmem:[#allocation23 + $0xe0] ss:$8 sps:$4 sm:$0xff]   ;;  %v8906_v6 = vld [vmem:[#allocation23 + $0xd4] ss:$8 sps:$4 sm:$0xff]  }
0x139b   :  { %6480 = vmatprep.subr.bf16.mxu0 %v8855_v49  ;;  %v8943_v49 = vld [vmem:[#allocation23 + $0x100] ss:$8 sps:$4 sm:$0xff]  }
0x139d   :  { %6440 = vmatpush2.bf16.msra.mxu1 %v8850_v47  ;;  %v8948_v47 = vld [vmem:[#allocation23 + $0x1f4] ss:$8 sps:$4 sm:$0xff]  }
0x139e   :  { %6481 = vmatpush2.bf16.msra.mxu0 %v8853_v61  ;;  %6441 = vmatprep.subr.bf16.mxu1 %v8858_v7  ;;  %v8904_v61 = vld [vmem:[#allocation23 + $0xd0] ss:$8 sps:$4 sm:$0xff]   ;;  %v8909_v7 = vld [vmem:[#allocation23 + $0xc4] ss:$8 sps:$4 sm:$0xff]  }
0x139f   :  { %6482 = vmatprep.subr.bf16.mxu0 %v8861_v33  ;;  %v8946_v33 = vld [vmem:[#allocation23 + $0x1f0] ss:$8 sps:$4 sm:$0xff]  }
0x13a1   :  { %6442 = vmatpush2.bf16.msra.mxu1 %v8856_v10  ;;  %v8951_v10 = vld [vmem:[#allocation23 + $0x1e4] ss:$8 sps:$4 sm:$0xff]  }
0x13a2   :  { %6483 = vmatpush2.bf16.msra.mxu0 %v8859_v17  ;;  %6443 = vmatprep.subr.bf16.mxu1 %v8864_v34  ;;  %v8907_v17 = vld [vmem:[#allocation23 + $0xc0] ss:$8 sps:$4 sm:$0xff]   ;;  %v8912_v34 = vld [vmem:[#allocation23 + $0xb4] ss:$8 sps:$4 sm:$0xff]  }
0x13a3   :  { %6484 = vmatprep.subr.bf16.mxu0 %v8867_v0  ;;  %v8949_v0 = vld [vmem:[#allocation23 + $0x1e0] ss:$8 sps:$4 sm:$0xff]  }
0x13a5   :  { %6444 = vmatpush2.bf16.msra.mxu1 %v8862_v4  ;;  %v8954_v4 = vld [vmem:[#allocation23 + $0x1d4] ss:$8 sps:$4 sm:$0xff]  }
0x13a6   :  { %6485 = vmatpush2.bf16.msra.mxu0 %v8865_v39  ;;  %6445 = vmatprep.subr.bf16.mxu1 %v8870_v52  ;;  %v8910_v39 = vld [vmem:[#allocation23 + $0xb0] ss:$8 sps:$4 sm:$0xff]   ;;  %v8915_v52 = vld [vmem:[#allocation23 + $0xa4] ss:$8 sps:$4 sm:$0xff]  }
0x13a7   :  { %6486 = vmatprep.subr.bf16.mxu0 %v8873_v11  ;;  %v8952_v11 = vld [vmem:[#allocation23 + $0x1d0] ss:$8 sps:$4 sm:$0xff]  }
0x13a9   :  { %6446 = vmatpush2.bf16.msra.mxu1 %v8868_v57  ;;  %v8957_v57 = vld [vmem:[#allocation23 + $0x1c4] ss:$8 sps:$4 sm:$0xff]  }
0x13aa   :  { %6487 = vmatpush2.bf16.msra.mxu0 %v8871_v27  ;;  %6901 = vmatprep.subr.bf16.mxu1 %v8876_v40  ;;  %v8913_v27 = vld [vmem:[#allocation23 + $0xa0] ss:$8 sps:$4 sm:$0xff]   ;;  %v8918_v40 = vld [vmem:[#allocation23 + $0x94] ss:$8 sps:$4 sm:$0xff]  }
0x13ab   :  { %6942 = vmatprep.subr.bf16.mxu0 %v8924_v58 }
0x13ac   :  { %6448 = vmatmul.mubr.bf16.vlgmr.msra.gmra.mxu1 %v10771_v43  ;;  %v10786_v29 = vpop.f32.mrf.mxu1  ;;  %v10788_v45 = vpop.f32.mrf.mxu0 }
0x13ad   :  { %6489 = vmatmul.mubr.bf16.vlgmr.msra.gmra.mxu0 %v10775_v53  ;;  %6902 = vmatpush1.bf16.msra.mxu1 %v8874_v15  ;;  %v8883_v53 = vld [vmem:[#allocation23 + $0x40] ss:$8 sps:$4 sm:$0xff]  }
0x13ae   :  { %v10791_v21 = vpop.f32.mrf.mxu1  ;;  %v10793_v23 = vpop.f32.mrf.mxu0  ;;  %6903 = vmatprep.subr.bf16.mxu1 %v8879_v25  ;;  %6943 = vmatpush1.bf16.msra.mxu0 %v8922_v59  ;;  %v8955_v15 = vld [vmem:[#allocation23 + $0x1c0] ss:$8 sps:$4 sm:$0xff]   ;;  %v8960_v25 = vld [vmem:[#allocation23 + $0x1b4] ss:$8 sps:$4 sm:$0xff]  }
0x13af   :  { %6944 = vmatprep.subr.bf16.mxu0 %v8927_v60 }
0x13b0   :  { %v6207_v19 = vpop.f32.mrf.mxu1  ;;  %v6248_v13 = vpop.f32.mrf.mxu0 }
0x13b1   :  { %6904 = vmatpush1.bf16.msra.mxu1 %v8877_v50  ;;  %v10795_v50 = vld [vmem:[#allocation22] sm:$0xf]  ;;  %v8921_v19 = vld [vmem:[#allocation23 + $0x84] ss:$8 sps:$4 sm:$0xff]   ;;  %v8958_v13 = vld [vmem:[#allocation23 + $0x1b0] ss:$8 sps:$4 sm:$0xff]  }
0x13b2   :  { %v6208_v1 = vpop.f32.mrf.mxu1  ;;  %v6249_v43 = vpop.f32.mrf.mxu0  ;;  %6905 = vmatprep.subr.bf16.mxu1 %v8882_v54  ;;  %6945 = vmatpush1.bf16.msra.mxu0 %v8925_v48  ;;  %v8916_v54 = vld [vmem:[#allocation23 + $0x90] ss:$8 sps:$4 sm:$0xff]  }
0x13b3   :  { %6946 = vmatprep.subr.bf16.mxu0 %v8930_v3  ;;  %v6156_v1 = vrot.slane %v10795_v50, %v10730_v2  ;;  %v8919_v43 = vld [vmem:[#allocation23 + $0x80] ss:$8 sps:$4 sm:$0xff]  }
0x13b5   :  { %6906 = vmatpush1.bf16.msra.mxu1 %v8880_v63  ;;  %v6152_v63 = vrot.slane %v10795_v50, %v9537_v20  ;;  %v6206_v59 = vadd.f32 %v10791_v21, %v6156_v1  ;;  %v7005_v1 = vld [vmem:[%s10939_s18 + $0xa0] sm:$0xff] }
0x13b6   :  { %6907 = vmatprep.subr.bf16.mxu1 %v8885_v30  ;;  %6947 = vmatpush1.bf16.msra.mxu0 %v8928_v41 }
0x13b7   :  { %6948 = vmatprep.subr.bf16.mxu0 %v8933_v31  ;;  %v6204_v30 = vadd.f32 %v10786_v29, %v6152_v63  ;;  %v8966_v29 = vld [vmem:[#allocation23 + $0x194] ss:$8 sps:$4 sm:$0xff]   ;;  %v6990_v63 = vld [vmem:[%s10939_s18 + $0x28] sm:$0xff] }
0x13b9   :  { %6908 = vmatpush1.bf16.msra.mxu1 %v8883_v53  ;;  %v6245_v58 = vadd.f32 %v10788_v45, %v6204_v30  ;;  %v8963_v53 = vld [vmem:[#allocation23 + $0x1a4] ss:$8 sps:$4 sm:$0xff]   ;;  %v6160_v30 = vrot.slane %v10795_v50, %v4565_v37 }
0x13ba   :  { %6909 = vmatprep.subr.bf16.mxu1 %v8888_v62  ;;  %6949 = vmatpush1.bf16.msra.mxu0 %v8931_v32  ;;  %v6247_v62 = vadd.f32 %v10793_v23, %v6206_v59  ;;  %v8969_v23 = vld [vmem:[#allocation23 + $0x184] ss:$8 sps:$4 sm:$0xff]   ;;  %v6164_v59 = vrot.slane %v10795_v50, %v4569_v26 }
0x13bb   :  { %6950 = vmatprep.subr.bf16.mxu0 %v8936_v24  ;;  %v8964_v24 = vld [vmem:[#allocation23 + $0x190] ss:$8 sps:$4 sm:$0xff]  }
0x13bd   :  { %6910 = vmatpush1.bf16.msra.mxu1 %v8886_v38  ;;  %v8961_v38 = vld [vmem:[#allocation23 + $0x1a0] ss:$8 sps:$4 sm:$0xff]  }
0x13be   :  { %6911 = vmatprep.subr.bf16.mxu1 %v8891_v12  ;;  %6951 = vmatpush1.bf16.msra.mxu0 %v8934_v51 }
0x13bf   :  { %6952 = vmatprep.subr.bf16.mxu0 %v8939_v22 }
0x13c1   :  { %6912 = vmatpush1.bf16.msra.mxu1 %v8889_v5 }
0x13c2   :  { %6913 = vmatprep.subr.bf16.mxu1 %v8894_v8  ;;  %6953 = vmatpush1.bf16.msra.mxu0 %v8937_v28 }
0x13c3   :  { %6954 = vmatprep.subr.bf16.mxu0 %v8942_v44 }
0x13c5   :  { %6914 = vmatpush1.bf16.msra.mxu1 %v8892_v14 }
0x13c6   :  { %6915 = vmatprep.subr.bf16.mxu1 %v8897_v16  ;;  %6955 = vmatpush1.bf16.msra.mxu0 %v8940_v35 }
0x13c7   :  { %6956 = vmatprep.subr.bf16.mxu0 %v8945_v56 }
0x13c9   :  { %6916 = vmatpush1.bf16.msra.mxu1 %v8895_v42  ;;  %v8967_v42 = vld [vmem:[#allocation23 + $0x180] ss:$8 sps:$4 sm:$0xff]  }
0x13ca   :  { %6917 = vmatprep.subr.bf16.mxu1 %v8900_v36  ;;  %6957 = vmatpush1.bf16.msra.mxu0 %v8943_v49  ;;  %v7016_v49 = vld [vmem:[%s10939_s18 + $0xf8] sm:$0xff] }
0x13cb   :  { %6958 = vmatprep.subr.bf16.mxu0 %v8948_v47  ;;  %v7000_v47 = vld [vmem:[%s10939_s18 + $0x78] sm:$0xff] }
0x13cd   :  { %6918 = vmatpush2.bf16.msra.mxu1 %v8898_v55 }
0x13ce   :  { %6919 = vmatprep.subr.bf16.mxu1 %v8903_v9  ;;  %6959 = vmatpush2.bf16.msra.mxu0 %v8946_v33  ;;  %v7014_v33 = vld [vmem:[%s10939_s18 + $0xe8] sm:$0xff] }
0x13cf   :  { %6960 = vmatprep.subr.bf16.mxu0 %v8951_v10  ;;  %v6998_v10 = vld [vmem:[%s10939_s18 + $0x68] sm:$0xff] }
0x13d1   :  { %6920 = vmatpush2.bf16.msra.mxu1 %v8901_v46 }
0x13d2   :  { %6921 = vmatprep.subr.bf16.mxu1 %v8906_v6  ;;  %6961 = vmatpush2.bf16.msra.mxu0 %v8949_v0  ;;  %v7012_v0 = vld [vmem:[%s10939_s18 + $0xd8] sm:$0xff] }
0x13d3   :  { %6962 = vmatprep.subr.bf16.mxu0 %v8954_v4  ;;  %v6996_v4 = vld [vmem:[%s10939_s18 + $0x58] sm:$0xff] }
0x13d5   :  { %6922 = vmatpush2.bf16.msra.mxu1 %v8904_v61  ;;  %v7015_v61 = vld [vmem:[%s10939_s18 + $0xf0] sm:$0xff] }
0x13d6   :  { %6923 = vmatprep.subr.bf16.mxu1 %v8909_v7  ;;  %6963 = vmatpush2.bf16.msra.mxu0 %v8952_v11  ;;  %v6999_v7 = vld [vmem:[%s10939_s18 + $0x70] sm:$0xff]  ;;  %v7010_v11 = vld [vmem:[%s10939_s18 + $0xc8] sm:$0xff] }
0x13d7   :  { %6964 = vmatprep.subr.bf16.mxu0 %v8957_v57  ;;  %v6994_v57 = vld [vmem:[%s10939_s18 + $0x48] sm:$0xff] }
0x13d9   :  { %6924 = vmatpush2.bf16.msra.mxu1 %v8907_v17  ;;  %v7013_v17 = vld [vmem:[%s10939_s18 + $0xe0] sm:$0xff] }
0x13da   :  { %6925 = vmatprep.subr.bf16.mxu1 %v8912_v34  ;;  %6965 = vmatpush2.bf16.msra.mxu0 %v8955_v15  ;;  %v6997_v34 = vld [vmem:[%s10939_s18 + $0x60] sm:$0xff]  ;;  %v7008_v15 = vld [vmem:[%s10939_s18 + $0xb8] sm:$0xff] }
0x13db   :  { %6966 = vmatprep.subr.bf16.mxu0 %v8960_v25  ;;  %v6992_v25 = vld [vmem:[%s10939_s18 + $0x38] sm:$0xff] }
0x13dd   :  { %6926 = vmatpush2.bf16.msra.mxu1 %v8910_v39  ;;  %v7011_v39 = vld [vmem:[%s10939_s18 + $0xd0] sm:$0xff] }
0x13de   :  { %6927 = vmatprep.subr.bf16.mxu1 %v8915_v52  ;;  %6967 = vmatpush2.bf16.msra.mxu0 %v8958_v13  ;;  %v6995_v52 = vld [vmem:[%s10939_s18 + $0x50] sm:$0xff]  ;;  %v7006_v13 = vld [vmem:[%s10939_s18 + $0xa8] sm:$0xff] }
0x13df   :  { %6968 = vmatprep.subr.bf16.mxu0 %v8963_v53 }
0x13e1   :  { %6928 = vmatpush2.bf16.msra.mxu1 %v8913_v27  ;;  %v7009_v27 = vld [vmem:[%s10939_s18 + $0xc0] sm:$0xff] }
0x13e2   :  { %6929 = vmatprep.subr.bf16.mxu1 %v8918_v40  ;;  %6969 = vmatpush2.bf16.msra.mxu0 %v8961_v38  ;;  %v6993_v40 = vld [vmem:[%s10939_s18 + $0x40] sm:$0xff] }
0x13e3   :  { %6970 = vmatprep.subr.bf16.mxu0 %v8966_v29 }
0x13e5   :  { %6930 = vmatpush2.bf16.msra.mxu1 %v8916_v54  ;;  %v7007_v54 = vld [vmem:[%s10939_s18 + $0xb0] sm:$0xff] }
0x13e6   :  { %6931 = vmatprep.subr.bf16.mxu1 %v8921_v19  ;;  %6971 = vmatpush2.bf16.msra.mxu0 %v8964_v24  ;;  %v6991_v19 = vld [vmem:[%s10939_s18 + $0x30] sm:$0xff] }
0x13e7   :  { %6972 = vmatprep.subr.bf16.mxu0 %v8969_v23  ;;  %v7003_v23 = vld [vmem:[%s10939_s18 + $0x90] sm:$0xff] }
0x13e9   :  { %6932 = vmatpush2.bf16.msra.mxu1 %v8919_v43  ;;  %v6989_v43 = vld [vmem:[%s10939_s18 + $0x20] sm:$0xff] }
0x13ea   :  { %6973 = vmatpush2.bf16.msra.mxu0 %v8967_v42  ;;  %7966 = vmatprep.subr.mxu1 %v7016_v49  ;;  %v6987_v42 = vld [vmem:[%s10939_s18 + $0x10] sm:$0xff] }
0x13ec   :  { %v6285_v60 = vpop.f32.mrf.mxu1 }
0x13ed   :  { %v6286_v48 = vadd.f32 %v6285_v60, %v6245_v58  ;;  %v6326_v3 = vpop.f32.mrf.mxu0 }
0x13ee   :  { %v6287_v12 = vpop.f32.mrf.mxu1 }
0x13ef   :  { %v6327_v41 = vadd.f32 %v6326_v3, %v6286_v48  ;;  %v6288_v31 = vadd.f32 %v6287_v12, %v6247_v62  ;;  %v6328_v5 = vpop.f32.mrf.mxu0 }
0x13f0   :  { %v6289_v8 = vpop.f32.mrf.mxu1 }
0x13f1   :  { %v6329_v32 = vadd.f32 %v6328_v5, %v6288_v31  ;;  %v6330_v21 = vpop.f32.mrf.mxu0  ;;  %v6497_v14 = vmax.f32 %v6327_v41, 0.0 }
0x13f2   :  { %v6290_v45 = vpop.f32.mrf.mxu1 }
0x13f3   :  { %v6498_v16 = vmax.f32 %v6329_v32, 0.0  ;;  %v6331_v51 = vpop.f32.mrf.mxu0  ;;  %v6501_v36 = vpack.c.bf16 %v6497_v14, %v6497_v14  ;;  %v7004_v45 = vld [vmem:[%s10939_s18 + $0x98] sm:$0xff] }
0x13f4   :  { %v6988_v51 = vld [vmem:[%s10939_s18 + $0x18] sm:$0xff] }
0x13f5   :  { %v6502_v22 = vpack.c.bf16 %v6498_v16, %v6498_v16 }
0x13f7   :  { %6933 = vmatprep.mubr.bf16.mxu1 %v6502_v22 }
0x13f8   :  { %6934 = vmatmul.mubr.bf16.vlgmr.msra.gmra.mxu1 %v6501_v36  ;;  %v7002_v36 = vld [vmem:[%s10939_s18 + $0x88] sm:$0xff] }
0x13f9   :  { %7967 = vmatpush3.msra.mxu1 %v7000_v47 }
0x13fa   :  { %7968 = vmatprep.subr.mxu1 %v7015_v61 }
0x13fb   :  { %7969 = vmatpush3.msra.mxu1 %v6999_v7 }
0x13fc   :  { %7970 = vmatprep.subr.mxu1 %v7014_v33 }
0x13fd   :  { %7971 = vmatpush3.msra.mxu1 %v6998_v10 }
0x13fe   :  { %7972 = vmatprep.subr.mxu1 %v7013_v17 }
0x13ff   :  { %7973 = vmatpush3.msra.mxu1 %v6997_v34 }
0x1400   :  { %7974 = vmatprep.subr.mxu1 %v7012_v0 }
0x1401   :  { %7975 = vmatpush3.msra.mxu1 %v6996_v4 }
0x1402   :  { %7976 = vmatprep.subr.mxu1 %v7011_v39 }
0x1403   :  { %7977 = vmatpush3.msra.mxu1 %v6995_v52 }
0x1404   :  { %7978 = vmatprep.subr.mxu1 %v7010_v11 }
0x1405   :  { %7979 = vmatpush3.msra.mxu1 %v6994_v57 }
0x1406   :  { %7980 = vmatprep.subr.mxu1 %v7009_v27 }
0x1407   :  { %7981 = vmatpush3.msra.mxu1 %v6993_v40 }
0x1408   :  { %7982 = vmatprep.subr.mxu1 %v7008_v15 }
0x1409   :  { %7983 = vmatpush3.msra.mxu1 %v6992_v25 }
0x140a   :  { %7984 = vmatprep.subr.mxu1 %v7007_v54 }
0x140b   :  { %7985 = vmatpush3.msra.mxu1 %v6991_v19 }
0x140c   :  { %7986 = vmatprep.subr.mxu1 %v7006_v13 }
0x140d   :  { %7987 = vmatpush3.msra.mxu1 %v6990_v63 }
0x140e   :  { %7988 = vmatprep.subr.mxu1 %v7005_v1 }
0x140f   :  { %7989 = vmatpush3.msra.mxu1 %v6989_v43 }
0x1410   :  { %7990 = vmatprep.subr.mxu1 %v7004_v45 }
0x1411   :  { %7991 = vmatpush3.msra.mxu1 %v6988_v51 }
0x1412   :  { %7992 = vmatprep.subr.mxu1 %v7003_v23 }
0x1413   :  { %7993 = vmatpush3.msra.mxu1 %v6987_v42 }
0x1414   :  { %7994 = vmatprep.subr.mxu1 %v7002_v36 }
0x142c   :  { %v6367_v28 = vpop.f32.mrf.mxu1 }
0x142d   :  { %v6408_v44 = vpop.f32.mrf.mxu0  ;;  %v6368_v58 = vadd.f32 %v6367_v28, %v6160_v30  ;;  %v6986_v28 = vld [vmem:[%s10939_s18 + $0x8] sm:$0xff] }
0x142e   :  { %v6369_v55 = vpop.f32.mrf.mxu1  ;;  %7995 = vmatpush3.msra.mxu1 %v6986_v28 }
0x142f   :  { %v6410_v9 = vpop.f32.mrf.mxu0  ;;  %v6370_v60 = vadd.f32 %v6369_v55, %v6164_v59  ;;  %v6409_v53 = vadd.f32 %v6408_v44, %v6368_v58  ;;  %v7001_v55 = vld [vmem:[%s10939_s18 + $0x80] sm:$0xff] }
0x1430   :  { %v6371_v35 = vpop.f32.mrf.mxu1  ;;  %7996 = vmatprep.subr.mxu1 %v7001_v55 }
0x1431   :  { %v6412_v56 = vpop.f32.mrf.mxu0  ;;  %v6411_v48 = vadd.f32 %v6410_v9, %v6370_v60  ;;  %v6985_v9 = vld [vmem:[%s10939_s18] sm:$0xff] }
0x1432   :  { %v6372_v46 = vpop.f32.mrf.mxu1  ;;  %7997 = vmatpush3.msra.mxu1 %v6985_v9  ;;  %v6569_v35 = vld [vmem:[%s10938_s17] sm:$0x3] }
0x1433   :  { %v6413_v6 = vpop.f32.mrf.mxu0  ;;  %v6894_v56 = vrot.slane %v6569_v35, %v9537_v20  ;;  %v6898_v46 = vrot.slane %v6569_v35, %v10730_v2  ;;  %v7017_v20 = vld [vmem:[%s10940_s19] sm:$0x1]  ;;  %s9258_s19 = scalar_lea.vmem %s7109_s30, 16 }
0x1434   :  { %p9259_p0 = scmp.ne.s32.totalorder %s7109_s30, %s9258_s19  ;;  %p9264_p2 = scmp.lt.s32.totalorder %s9262_s0, %s9258_s19 }
0x1436   :  { %p9265_p3 = por %p9264_p2, %p9263_p1 }
0x1438   :  { %p9266_p4 = pnand %p9265_p3, %p9259_p0 }
0x146c   :  { %v6449_v62 = vpop.f32.mrf.mxu1 }
0x146d   :  { %v6450_v3 = vadd.f32 %v6449_v62, %v6409_v53  ;;  %v6490_v38 = vpop.f32.mrf.mxu0 }
0x146e   :  { %v6451_v12 = vpop.f32.mrf.mxu1 }
0x146f   :  { %v6491_v41 = vadd.f32 %v6490_v38, %v6450_v3  ;;  %v6452_v31 = vadd.f32 %v6451_v12, %v6411_v48  ;;  %v6492_v5 = vpop.f32.mrf.mxu0 }
0x1470   :  { %v6453_v8 = vpop.f32.mrf.mxu1 }
0x1471   :  { %v6493_v29 = vadd.f32 %v6492_v5, %v6452_v31  ;;  %v6494_v32 = vpop.f32.mrf.mxu0  ;;  %v6499_v21 = vmax.f32 %v6491_v41, 0.0 }
0x1472   :  { %v6454_v37 = vpop.f32.mrf.mxu1 }
0x1473   :  { %v6500_v24 = vmax.f32 %v6493_v29, 0.0  ;;  %v6495_v18 = vpop.f32.mrf.mxu0  ;;  %v6503_v26 = vpack.c.bf16 %v6499_v21, %v6499_v21 }
0x1475   :  { %v6504_v14 = vpack.c.bf16 %v6500_v24, %v6500_v24 }
0x1477   :  { %6974 = vmatprep.mubr.bf16.mxu0 %v6504_v14 }
0x1478   :  { %6975 = vmatmul.mubr.bf16.vlgmr.msra.gmra.mxu0 %v6503_v26 }
0x14b8   :  { %v6935_v50 = vpop.f32.mrf.mxu1 }
0x14b9   :  { %v6936_v6 = vadd.f32 %v6935_v50, %v6894_v56 }
0x14ba   :  { %v6937_v16 = vpop.f32.mrf.mxu1 }
0x14bb   :  { %v6938_v47 = vadd.f32 %v6937_v16, %v6898_v46 }
0x14bc   :  { %v6939_v22 = vpop.f32.mrf.mxu1 }
0x14be   :  { %v6940_v44 = vpop.f32.mrf.mxu1 }
0x1538   :  { %v6976_v49 = vpop.f32.mrf.mxu0 }
0x1539   :  { %v6977_v61 = vadd.f32 %v6976_v49, %v6936_v6 }
0x153a   :  { %v6978_v7 = vpop.f32.mrf.mxu0 }
0x153b   :  { %v6979_v33 = vadd.f32 %v6978_v7, %v6938_v47  ;;  %v6983_v34 = vmax.f32 %v6977_v61, 0.0 }
0x153c   :  { %v6980_v10 = vpop.f32.mrf.mxu0 }
0x153d   :  { %v6984_v17 = vmax.f32 %v6979_v33, 0.0 }
0x153e   :  { %v6981_v0 = vpop.f32.mrf.mxu0 }
0x153f   :  { %7082 = vmatprep.mubr.f32.mxu1 %v6984_v17 }
0x1540   :  { %7083 = vmatmul.mubr.f32.vlgmr.msra.gmra.mxu1 %v6983_v34 }
0x1600   :  { %v7998_v4 = vpop.f32.mrf.mxu1 }
0x1602   :  { %v7999_v39 = vpop.f32.mrf.mxu1 }
0x1603   :  { %v8000_v52 = vadd.f32 %v7999_v39, %v7998_v4 }
0x1605   :  { %v7085_v2 = vadd.f32 %v8000_v52, %v7017_v20 }
0x1607   :  { %v7089_v11 = vsel %vm7088_vm2, %v7085_v2, -inf }
0x1608   :  { %7090 = vmax.xlane.f32.xlu0 %v7089_v11 }
0x1691   :  { %v7091_v57 = vpop.xlane.xlu0 %7090 }
0x1692   :  { %v7092_v27 = vsub.f32 %v7085_v2, %v7091_v57 }
0x1694   :  { %v7093_v40 = vmul.f32 1.442695, %v7092_v27 }
0x1696   :  { %8970 = vpow2.f32 %v7093_v40 }
0x16a3   :  { %v8971_v15 = vpop.eup %8970 }
0x16a4   :  { %v7095_v25 = vsel %vm7088_vm2, %v8971_v15, 0.0 }
0x16a5   :  { %7096 = vadd.xlane.f32.xlu1 %v7095_v25 }
0x172e   :  { %v7097_v54 = vpop.xlane.xlu1 %7096 }
0x172f   :  { %8972 = vlog2.f32 %v7097_v54 }
0x173c   :  { %v8973_v19 = vpop.eup %8972 }
0x173d   :  { %v7099_v13 = vmul.f32 0.6931472, %v8973_v19 }
0x173f   :  { %v7100_v63 = vsub.f32 %v7092_v27, %v7099_v13 }
0x1741   :  { %7101 = vst.msk [vmem:[#allocation25] sm:$0x1] %vm7088_vm2, %v7100_v63 }
0x1742   :  { %9269 = shalt.err (!%p9266_p4)
}
0x1743   :  { %7111 = dma.vmem_to_hbm [thread:$0]  %s7109_s30, 16, %s10941_s20, [#allocation4]  }
0x1744   :  { %9294 = dma.done.wait [#allocation4], 16  }
0x1745   :  { %9295 = vsyncadd [#allocation4], 4294967280 }
0x1746   :  { %7115 = vsyncpa [#allocation3], 1 }
0x1747   :  { %7116 = vsyncpa [#allocation6], 1 }
0x1748   :  { %7117 = vsyncpa [#allocation9], 1 }
0x1749   :  { %7118 = vsyncpa [#allocation12], 1 }
0x174a   :  { %7119 = vsyncpa [#allocation15], 1 }
0x174b   :  { %7120 = vsyncpa [#allocation18], 1 }
0x174c   :  { %7121 = vsyncpa [#allocation21], 1 }
0x174d   :  { %7122 = vsyncpa [#allocation24], 1 }
0x174e   :  { %7123 = vsyncpa [#allocation4], 1 }

</bundles_post_ra>
